<compile_context>
chip_gen: v7x
topology: tpu7x:2x2x1
jax: 0.10.0
libtpu: 0.0.40
codegen_flags: <defaults>
</compile_context>

<pallas_src>
import functools

import jax
import jax.numpy as jnp
from jax import lax
from jax.experimental import pallas as pl
from jax.experimental.pallas import tpu as pltpu

jax.config.update("jax_default_matmul_precision", "highest")


def inverted_residual_kernel(x_ref, w1_ref, b1_ref, dw_ref, b2_ref, m_ref,
                             w3_ref, b3_ref, o_ref, pad_ref,
                             *, offsets, pad, use_res):
    # x_ref block: (1, C_in, S); pad_ref scratch: (Ch, S + 2*pad) f32
    S = x_ref.shape[2]

    x = x_ref[0]                                                    # (C_in, S)

    # 1) expand 1x1x1 conv (BN folded) + ReLU6
    h = jnp.dot(w1_ref[...], x, preferred_element_type=jnp.float32) + b1_ref[...]
    h = jnp.clip(h, 0.0, 6.0)                                       # (Ch, S)

    # 2) depthwise 3x3x3 conv, stride 1, padding 1 (BN folded) + ReLU6.
    #    Write h into a zero-padded line; each tap reads a statically shifted
    #    window; border masks kill contributions that cross a spatial edge.
    pad_ref[...] = jnp.zeros_like(pad_ref)
    pad_ref[:, pad:pad + S] = h

    acc = jnp.zeros_like(h)
    for t, off in enumerate(offsets):
        win = pad_ref[:, pad + off: pad + off + S]                  # (Ch, S)
        acc = acc + dw_ref[:, t:t + 1] * (m_ref[t:t + 1, :] * win)
    hd = jnp.clip(acc + b2_ref[...], 0.0, 6.0)                      # (Ch, S)

    # 3) project 1x1x1 conv (BN folded), optional residual
    y = jnp.dot(w3_ref[...], hd, preferred_element_type=jnp.float32) + b3_ref[...]
    if use_res:
        y = y + x
    o_ref[0] = y


def inverted_residual(x, params, stride=(1, 1, 1)):
    """x: (B, C_in, D, H, W) float32 -> (B, C_out, D, H, W) float32."""
    w1f, b1f, dwf, b2f, w3f, b3f = params
    B, C_in, D, H, W = x.shape
    Ch = w1f.shape[0]
    C_out = w3f.shape[0]
    S = D * H * W
    use_res = (tuple(stride) == (1, 1, 1)) and (C_in == C_out)

    assert tuple(stride) == (1, 1, 1), "TODO(synk): stride>1 not implemented in-kernel"
    assert S % 128 == 0 and C_in % 8 == 0 and Ch % 8 == 0 and C_out % 8 == 0

    xf = x.reshape(B, C_in, S).astype(jnp.float32)
    dw2 = dwf.reshape(Ch, 27)

    # Per-tap flat-spatial shift offsets + border-validity masks (27, S).
    sp = jnp.arange(S)
    d_i, h_i, w_i = sp // (H * W), (sp // W) % H, sp % W
    offsets, masks = [], []
    for kd in range(3):
        for kh in range(3):
            for kw in range(3):
                od, oh, ow = kd - 1, kh - 1, kw - 1
                offsets.append(od * H * W + oh * W + ow)
                m = ((d_i + od >= 0) & (d_i + od < D) &
                     (h_i + oh >= 0) & (h_i + oh < H) &
                     (w_i + ow >= 0) & (w_i + ow < W))
                masks.append(m)
    masks = jnp.stack(masks).astype(jnp.float32)                    # (27, S)

    max_off = H * W + W + 1
    pad = ((max_off + 127) // 128) * 128                            # lane-aligned interior

    kernel = functools.partial(inverted_residual_kernel,
                               offsets=tuple(offsets), pad=pad, use_res=use_res)

    out = pl.pallas_call(
        kernel,
        out_shape=jax.ShapeDtypeStruct((B, C_out, S), jnp.float32),
        grid=(B,),
        in_specs=[
            pl.BlockSpec((1, C_in, S), lambda b: (b, 0, 0)),   # x
            pl.BlockSpec((Ch, C_in),   lambda b: (0, 0)),      # expand conv (BN folded)
            pl.BlockSpec((Ch, 1),      lambda b: (0, 0)),      # expand bias (from BN)
            pl.BlockSpec((Ch, 27),     lambda b: (0, 0)),      # depthwise taps (BN folded)
            pl.BlockSpec((Ch, 1),      lambda b: (0, 0)),      # depthwise bias (from BN)
            pl.BlockSpec((27, S),      lambda b: (0, 0)),      # border masks
            pl.BlockSpec((C_out, Ch),  lambda b: (0, 0)),      # project conv (BN folded)
            pl.BlockSpec((C_out, 1),   lambda b: (0, 0)),      # project bias (from BN)
        ],
        out_specs=pl.BlockSpec((1, C_out, S), lambda b: (b, 0, 0)),
        scratch_shapes=[pltpu.VMEM((Ch, S + 2 * pad), jnp.float32)],
        compiler_params=pltpu.CompilerParams(
            dimension_semantics=("parallel",),
            vmem_limit_bytes=32 * 1024 * 1024),
    )(xf, w1f, b1f, dw2, b2f, masks, w3f, b3f)

    return out.reshape(B, C_out, D, H, W)


def make_params(key, inp, oup, expand_ratio, eps=1e-5):
    """Raw conv weights + eval-mode BN stats, folded into (weight, bias) per conv."""
    hidden = int(round(inp * expand_ratio))
    ks = jax.random.split(key, 15)

    w1 = 0.2 * jax.random.normal(ks[0], (hidden, inp), jnp.float32)     # Conv3d(inp, hidden, 1)
    dw = 0.2 * jax.random.normal(ks[1], (hidden, 3, 3, 3), jnp.float32)  # depthwise 3x3x3
    w3 = 0.2 * jax.random.normal(ks[2], (oup, hidden), jnp.float32)     # Conv3d(hidden, oup, 1)

    def bn_fold(keys, n):
        gamma = 1.0 + 0.1 * jax.random.normal(keys[0], (n,), jnp.float32)
        beta = 0.1 * jax.random.normal(keys[1], (n,), jnp.float32)
        mean = 0.05 * jax.random.normal(keys[2], (n,), jnp.float32)
        var = jnp.abs(1.0 + 0.1 * jax.random.normal(keys[3], (n,), jnp.float32))
        s = gamma / jnp.sqrt(var + eps)
        return s, beta - mean * s

    s1, t1 = bn_fold(ks[3:7], hidden)
    s2, t2 = bn_fold(ks[7:11], hidden)
    s3, t3 = bn_fold(ks[11:15], oup)

    w1f = w1 * s1[:, None]
    b1f = t1.reshape(hidden, 1)
    dwf = dw * s2[:, None, None, None]
    b2f = t2.reshape(hidden, 1)
    w3f = w3 * s3[:, None]
    b3f = t3.reshape(oup, 1)
    return (w1f, b1f, dwf, b2f, w3f, b3f)


def reference(x, params, stride=(1, 1, 1)):
    """Pure-JAX reference mirroring the PyTorch forward (eval-mode BN folded)."""
    w1f, b1f, dwf, b2f, w3f, b3f = params
    B, C, D, H, W = x.shape
    Ch = w1f.shape[0]
    C_out = w3f.shape[0]

    h = jnp.einsum('oc,bcdhw->bodhw', w1f, x) + b1f.reshape(1, Ch, 1, 1, 1)
    h = jnp.clip(h, 0.0, 6.0)
    d = lax.conv_general_dilated(
        h, dwf.reshape(Ch, 1, 3, 3, 3),
        window_strides=stride, padding=[(1, 1)] * 3,
        dimension_numbers=('NCDHW', 'OIDHW', 'NCDHW'),
        feature_group_count=Ch)
    d = jnp.clip(d + b2f.reshape(1, Ch, 1, 1, 1), 0.0, 6.0)
    y = jnp.einsum('oc,bcdhw->bodhw', w3f, d) + b3f.reshape(1, C_out, 1, 1, 1)
    use_res = (tuple(stride) == (1, 1, 1)) and (C == C_out)
    return x + y if use_res else y


if __name__ == "__main__":
    B, inp, oup = 2, 8, 8
    D, H, W = 4, 8, 16              # S = 512: lane-dense (multiple of 128)
    expand_ratio = 2                # hidden = 16
    stride = (1, 1, 1)              # -> residual path active (inp == oup)

    key = jax.random.PRNGKey(0)
    kx, kw = jax.random.split(key)
    x = jax.random.normal(kx, (B, inp, D, H, W), jnp.float32)
    params = make_params(kw, inp, oup, expand_ratio)

    out = inverted_residual(x, params, stride)
    out = jax.block_until_ready(out)

    ref = reference(x, params, stride)
    assert out.shape == (B, oup, D, H, W)
    err = float(jnp.max(jnp.abs(out - ref)))
    assert jnp.allclose(out, ref, atol=1e-3, rtol=1e-3), f"max abs err {err}"
    print("KERNEL_OK")
</pallas_src>

<mosaic_0001>
module attributes {stable_mosaic.version = 11 : i64} {
  func.func @inverted_residual_kernel(%arg0: i32, %arg1: memref<1x8x512xf32, #tpu.memory_space<vmem>>, %arg2: memref<16x8xf32, #tpu.memory_space<vmem>>, %arg3: memref<16x1xf32, #tpu.memory_space<vmem>>, %arg4: memref<16x27xf32, #tpu.memory_space<vmem>>, %arg5: memref<16x1xf32, #tpu.memory_space<vmem>>, %arg6: memref<27x512xf32, #tpu.memory_space<vmem>>, %arg7: memref<8x16xf32, #tpu.memory_space<vmem>>, %arg8: memref<8x1xf32, #tpu.memory_space<vmem>>, %arg9: memref<1x8x512xf32, #tpu.memory_space<vmem>>, %arg10: memref<16x1024xf32, #tpu.memory_space<vmem>>) attributes {dimension_semantics = [#tpu.dimension_semantics<parallel>], iteration_bounds = array<i64: 2>, scalar_prefetch = 0 : i64, scratch_operands = 1 : i64, tpu.core_type = #tpu.core_type<tc>, window_params = [{transform_indices = @transform_0, window_bounds = array<i64: 1, 8, 512>}, {pipeline_mode = #tpu.pipeline_mode<synchronous>, transform_indices = @transform_1, window_bounds = array<i64: 16, 8>}, {pipeline_mode = #tpu.pipeline_mode<synchronous>, transform_indices = @transform_2, window_bounds = array<i64: 16, 1>}, {pipeline_mode = #tpu.pipeline_mode<synchronous>, transform_indices = @transform_3, window_bounds = array<i64: 16, 27>}, {pipeline_mode = #tpu.pipeline_mode<synchronous>, transform_indices = @transform_4, window_bounds = array<i64: 16, 1>}, {pipeline_mode = #tpu.pipeline_mode<synchronous>, transform_indices = @transform_5, window_bounds = array<i64: 27, 512>}, {pipeline_mode = #tpu.pipeline_mode<synchronous>, transform_indices = @transform_6, window_bounds = array<i64: 8, 16>}, {pipeline_mode = #tpu.pipeline_mode<synchronous>, transform_indices = @transform_7, window_bounds = array<i64: 8, 1>}, {transform_indices = @transform_8, window_bounds = array<i64: 1, 8, 512>}]} {
    %c0 = arith.constant 0 : index
    %c0_0 = arith.constant 0 : index
    %c0_1 = arith.constant 0 : index
    %0 = vector.load %arg1[%c0, %c0_0, %c0_1] : memref<1x8x512xf32, #tpu.memory_space<vmem>>, vector<1x8x512xf32>
    %1 = vector.shape_cast %0 : vector<1x8x512xf32> to vector<8x512xf32>
    %c0_2 = arith.constant 0 : index
    %c0_3 = arith.constant 0 : index
    %2 = vector.load %arg2[%c0_2, %c0_3] : memref<16x8xf32, #tpu.memory_space<vmem>>, vector<16x8xf32>
    %cst = arith.constant dense<0.000000e+00> : vector<16x512xf32>
    %3 = tpu.matmul %2, %1, %cst {dimension_numbers = #tpu.dot_dimension_numbers<[1], [0], [0], [1], [0, 0, 1, 1], [], []>, precision = #tpu.contract_precision<fp32>} : vector<16x8xf32>, vector<8x512xf32>, vector<16x512xf32> -> vector<16x512xf32>
    %c0_4 = arith.constant 0 : index
    %c0_5 = arith.constant 0 : index
    %4 = vector.load %arg3[%c0_4, %c0_5] : memref<16x1xf32, #tpu.memory_space<vmem>>, vector<16x1xf32>
    %5 = vector.broadcast %4 : vector<16x1xf32> to vector<16x512xf32>
    %6 = arith.addf %3, %5 : vector<16x512xf32>
    %cst_6 = arith.constant 0.000000e+00 : f32
    %cst_7 = arith.constant 6.000000e+00 : f32
    %7 = vector.broadcast %cst_6 : f32 to vector<16x512xf32>
    %8 = arith.maximumf %7, %6 : vector<16x512xf32>
    %9 = vector.broadcast %cst_7 : f32 to vector<16x512xf32>
    %10 = arith.minimumf %9, %8 : vector<16x512xf32>
    %cst_8 = arith.constant 0.000000e+00 : f32
    %11 = vector.broadcast %cst_8 : f32 to vector<16x1024xf32>
    %c0_9 = arith.constant 0 : index
    %c0_10 = arith.constant 0 : index
    %12 = vector.load %arg10[%c0_9, %c0_10] : memref<16x1024xf32, #tpu.memory_space<vmem>>, vector<16x1024xf32>
    tpu.vector_store %arg10[%c0_9, %c0_10], %11 {strides = array<i32>} : memref<16x1024xf32, #tpu.memory_space<vmem>>, vector<16x1024xf32>,
    %c0_11 = arith.constant 0 : index
    %c256 = arith.constant 256 : index
    %13 = vector.load %arg10[%c0_11, %c256] : memref<16x1024xf32, #tpu.memory_space<vmem>>, vector<16x512xf32>
    tpu.vector_store %arg10[%c0_11, %c256], %10 {strides = array<i32>} : memref<16x1024xf32, #tpu.memory_space<vmem>>, vector<16x512xf32>,
    %cst_12 = arith.constant 0.000000e+00 : f32
    %14 = vector.broadcast %cst_12 : f32 to vector<16x512xf32>
    %c0_13 = arith.constant 0 : index
    %c111 = arith.constant 111 : index
    %15 = vector.load %arg10[%c0_13, %c111] : memref<16x1024xf32, #tpu.memory_space<vmem>>, vector<16x512xf32>
    %c0_14 = arith.constant 0 : index
    %c0_15 = arith.constant 0 : index
    %16 = vector.load %arg4[%c0_14, %c0_15] : memref<16x27xf32, #tpu.memory_space<vmem>>, vector<16x1xf32>
    %c0_16 = arith.constant 0 : index
    %c0_17 = arith.constant 0 : index
    %17 = vector.load %arg6[%c0_16, %c0_17] : memref<27x512xf32, #tpu.memory_space<vmem>>, vector<1x512xf32>
    %18 = vector.broadcast %17 : vector<1x512xf32> to vector<16x512xf32>
    %19 = arith.mulf %18, %15 : vector<16x512xf32>
    %20 = vector.broadcast %16 : vector<16x1xf32> to vector<16x512xf32>
    %21 = arith.mulf %20, %19 : vector<16x512xf32>
    %22 = arith.addf %14, %21 : vector<16x512xf32>
    %c0_18 = arith.constant 0 : index
    %c112 = arith.constant 112 : index
    %23 = vector.load %arg10[%c0_18, %c112] : memref<16x1024xf32, #tpu.memory_space<vmem>>, vector<16x512xf32>
    %c0_19 = arith.constant 0 : index
    %c1 = arith.constant 1 : index
    %24 = vector.load %arg4[%c0_19, %c1] : memref<16x27xf32, #tpu.memory_space<vmem>>, vector<16x1xf32>
    %c1_20 = arith.constant 1 : index
    %c0_21 = arith.constant 0 : index
    %25 = vector.load %arg6[%c1_20, %c0_21] : memref<27x512xf32, #tpu.memory_space<vmem>>, vector<1x512xf32>
    %26 = vector.broadcast %25 : vector<1x512xf32> to vector<16x512xf32>
    %27 = arith.mulf %26, %23 : vector<16x512xf32>
    %28 = vector.broadcast %24 : vector<16x1xf32> to vector<16x512xf32>
    %29 = arith.mulf %28, %27 : vector<16x512xf32>
    %30 = arith.addf %22, %29 : vector<16x512xf32>
    %c0_22 = arith.constant 0 : index
    %c113 = arith.constant 113 : index
    %31 = vector.load %arg10[%c0_22, %c113] : memref<16x1024xf32, #tpu.memory_space<vmem>>, vector<16x512xf32>
    %c0_23 = arith.constant 0 : index
    %c2 = arith.constant 2 : index
    %32 = vector.load %arg4[%c0_23, %c2] : memref<16x27xf32, #tpu.memory_space<vmem>>, vector<16x1xf32>
    %c2_24 = arith.constant 2 : index
    %c0_25 = arith.constant 0 : index
    %33 = vector.load %arg6[%c2_24, %c0_25] : memref<27x512xf32, #tpu.memory_space<vmem>>, vector<1x512xf32>
    %34 = vector.broadcast %33 : vector<1x512xf32> to vector<16x512xf32>
    %35 = arith.mulf %34, %31 : vector<16x512xf32>
    %36 = vector.broadcast %32 : vector<16x1xf32> to vector<16x512xf32>
    %37 = arith.mulf %36, %35 : vector<16x512xf32>
    %38 = arith.addf %30, %37 : vector<16x512xf32>
    %c0_26 = arith.constant 0 : index
    %c127 = arith.constant 127 : index
    %39 = vector.load %arg10[%c0_26, %c127] : memref<16x1024xf32, #tpu.memory_space<vmem>>, vector<16x512xf32>
    %c0_27 = arith.constant 0 : index
    %c3 = arith.constant 3 : index
    %40 = vector.load %arg4[%c0_27, %c3] : memref<16x27xf32, #tpu.memory_space<vmem>>, vector<16x1xf32>
    %c3_28 = arith.constant 3 : index
    %c0_29 = arith.constant 0 : index
    %41 = vector.load %arg6[%c3_28, %c0_29] : memref<27x512xf32, #tpu.memory_space<vmem>>, vector<1x512xf32>
    %42 = vector.broadcast %41 : vector<1x512xf32> to vector<16x512xf32>
    %43 = arith.mulf %42, %39 : vector<16x512xf32>
    %44 = vector.broadcast %40 : vector<16x1xf32> to vector<16x512xf32>
    %45 = arith.mulf %44, %43 : vector<16x512xf32>
    %46 = arith.addf %38, %45 : vector<16x512xf32>
    %c0_30 = arith.constant 0 : index
    %c128 = arith.constant 128 : index
    %47 = vector.load %arg10[%c0_30, %c128] : memref<16x1024xf32, #tpu.memory_space<vmem>>, vector<16x512xf32>
    %c0_31 = arith.constant 0 : index
    %c4 = arith.constant 4 : index
    %48 = vector.load %arg4[%c0_31, %c4] : memref<16x27xf32, #tpu.memory_space<vmem>>, vector<16x1xf32>
    %c4_32 = arith.constant 4 : index
    %c0_33 = arith.constant 0 : index
    %49 = vector.load %arg6[%c4_32, %c0_33] : memref<27x512xf32, #tpu.memory_space<vmem>>, vector<1x512xf32>
    %50 = vector.broadcast %49 : vector<1x512xf32> to vector<16x512xf32>
    %51 = arith.mulf %50, %47 : vector<16x512xf32>
    %52 = vector.broadcast %48 : vector<16x1xf32> to vector<16x512xf32>
    %53 = arith.mulf %52, %51 : vector<16x512xf32>
    %54 = arith.addf %46, %53 : vector<16x512xf32>
    %c0_34 = arith.constant 0 : index
    %c129 = arith.constant 129 : index
    %55 = vector.load %arg10[%c0_34, %c129] : memref<16x1024xf32, #tpu.memory_space<vmem>>, vector<16x512xf32>
    %c0_35 = arith.constant 0 : index
    %c5 = arith.constant 5 : index
    %56 = vector.load %arg4[%c0_35, %c5] : memref<16x27xf32, #tpu.memory_space<vmem>>, vector<16x1xf32>
    %c5_36 = arith.constant 5 : index
    %c0_37 = arith.constant 0 : index
    %57 = vector.load %arg6[%c5_36, %c0_37] : memref<27x512xf32, #tpu.memory_space<vmem>>, vector<1x512xf32>
    %58 = vector.broadcast %57 : vector<1x512xf32> to vector<16x512xf32>
    %59 = arith.mulf %58, %55 : vector<16x512xf32>
    %60 = vector.broadcast %56 : vector<16x1xf32> to vector<16x512xf32>
    %61 = arith.mulf %60, %59 : vector<16x512xf32>
    %62 = arith.addf %54, %61 : vector<16x512xf32>
    %c0_38 = arith.constant 0 : index
    %c143 = arith.constant 143 : index
    %63 = vector.load %arg10[%c0_38, %c143] : memref<16x1024xf32, #tpu.memory_space<vmem>>, vector<16x512xf32>
    %c0_39 = arith.constant 0 : index
    %c6 = arith.constant 6 : index
    %64 = vector.load %arg4[%c0_39, %c6] : memref<16x27xf32, #tpu.memory_space<vmem>>, vector<16x1xf32>
    %c6_40 = arith.constant 6 : index
    %c0_41 = arith.constant 0 : index
    %65 = vector.load %arg6[%c6_40, %c0_41] : memref<27x512xf32, #tpu.memory_space<vmem>>, vector<1x512xf32>
    %66 = vector.broadcast %65 : vector<1x512xf32> to vector<16x512xf32>
    %67 = arith.mulf %66, %63 : vector<16x512xf32>
    %68 = vector.broadcast %64 : vector<16x1xf32> to vector<16x512xf32>
    %69 = arith.mulf %68, %67 : vector<16x512xf32>
    %70 = arith.addf %62, %69 : vector<16x512xf32>
    %c0_42 = arith.constant 0 : index
    %c144 = arith.constant 144 : index
    %71 = vector.load %arg10[%c0_42, %c144] : memref<16x1024xf32, #tpu.memory_space<vmem>>, vector<16x512xf32>
    %c0_43 = arith.constant 0 : index
    %c7 = arith.constant 7 : index
    %72 = vector.load %arg4[%c0_43, %c7] : memref<16x27xf32, #tpu.memory_space<vmem>>, vector<16x1xf32>
    %c7_44 = arith.constant 7 : index
    %c0_45 = arith.constant 0 : index
    %73 = vector.load %arg6[%c7_44, %c0_45] : memref<27x512xf32, #tpu.memory_space<vmem>>, vector<1x512xf32>
    %74 = vector.broadcast %73 : vector<1x512xf32> to vector<16x512xf32>
    %75 = arith.mulf %74, %71 : vector<16x512xf32>
    %76 = vector.broadcast %72 : vector<16x1xf32> to vector<16x512xf32>
    %77 = arith.mulf %76, %75 : vector<16x512xf32>
    %78 = arith.addf %70, %77 : vector<16x512xf32>
    %c0_46 = arith.constant 0 : index
    %c145 = arith.constant 145 : index
    %79 = vector.load %arg10[%c0_46, %c145] : memref<16x1024xf32, #tpu.memory_space<vmem>>, vector<16x512xf32>
    %c0_47 = arith.constant 0 : index
    %c8 = arith.constant 8 : index
    %80 = vector.load %arg4[%c0_47, %c8] : memref<16x27xf32, #tpu.memory_space<vmem>>, vector<16x1xf32>
    %c8_48 = arith.constant 8 : index
    %c0_49 = arith.constant 0 : index
    %81 = vector.load %arg6[%c8_48, %c0_49] : memref<27x512xf32, #tpu.memory_space<vmem>>, vector<1x512xf32>
    %82 = vector.broadcast %81 : vector<1x512xf32> to vector<16x512xf32>
    %83 = arith.mulf %82, %79 : vector<16x512xf32>
    %84 = vector.broadcast %80 : vector<16x1xf32> to vector<16x512xf32>
    %85 = arith.mulf %84, %83 : vector<16x512xf32>
    %86 = arith.addf %78, %85 : vector<16x512xf32>
    %c0_50 = arith.constant 0 : index
    %c239 = arith.constant 239 : index
    %87 = vector.load %arg10[%c0_50, %c239] : memref<16x1024xf32, #tpu.memory_space<vmem>>, vector<16x512xf32>
    %c0_51 = arith.constant 0 : index
    %c9 = arith.constant 9 : index
    %88 = vector.load %arg4[%c0_51, %c9] : memref<16x27xf32, #tpu.memory_space<vmem>>, vector<16x1xf32>
    %c9_52 = arith.constant 9 : index
    %c0_53 = arith.constant 0 : index
    %89 = vector.load %arg6[%c9_52, %c0_53] : memref<27x512xf32, #tpu.memory_space<vmem>>, vector<1x512xf32>
    %90 = vector.broadcast %89 : vector<1x512xf32> to vector<16x512xf32>
    %91 = arith.mulf %90, %87 : vector<16x512xf32>
    %92 = vector.broadcast %88 : vector<16x1xf32> to vector<16x512xf32>
    %93 = arith.mulf %92, %91 : vector<16x512xf32>
    %94 = arith.addf %86, %93 : vector<16x512xf32>
    %c0_54 = arith.constant 0 : index
    %c240 = arith.constant 240 : index
    %95 = vector.load %arg10[%c0_54, %c240] : memref<16x1024xf32, #tpu.memory_space<vmem>>, vector<16x512xf32>
    %c0_55 = arith.constant 0 : index
    %c10 = arith.constant 10 : index
    %96 = vector.load %arg4[%c0_55, %c10] : memref<16x27xf32, #tpu.memory_space<vmem>>, vector<16x1xf32>
    %c10_56 = arith.constant 10 : index
    %c0_57 = arith.constant 0 : index
    %97 = vector.load %arg6[%c10_56, %c0_57] : memref<27x512xf32, #tpu.memory_space<vmem>>, vector<1x512xf32>
    %98 = vector.broadcast %97 : vector<1x512xf32> to vector<16x512xf32>
    %99 = arith.mulf %98, %95 : vector<16x512xf32>
    %100 = vector.broadcast %96 : vector<16x1xf32> to vector<16x512xf32>
    %101 = arith.mulf %100, %99 : vector<16x512xf32>
    %102 = arith.addf %94, %101 : vector<16x512xf32>
    %c0_58 = arith.constant 0 : index
    %c241 = arith.constant 241 : index
    %103 = vector.load %arg10[%c0_58, %c241] : memref<16x1024xf32, #tpu.memory_space<vmem>>, vector<16x512xf32>
    %c0_59 = arith.constant 0 : index
    %c11 = arith.constant 11 : index
    %104 = vector.load %arg4[%c0_59, %c11] : memref<16x27xf32, #tpu.memory_space<vmem>>, vector<16x1xf32>
    %c11_60 = arith.constant 11 : index
    %c0_61 = arith.constant 0 : index
    %105 = vector.load %arg6[%c11_60, %c0_61] : memref<27x512xf32, #tpu.memory_space<vmem>>, vector<1x512xf32>
    %106 = vector.broadcast %105 : vector<1x512xf32> to vector<16x512xf32>
    %107 = arith.mulf %106, %103 : vector<16x512xf32>
    %108 = vector.broadcast %104 : vector<16x1xf32> to vector<16x512xf32>
    %109 = arith.mulf %108, %107 : vector<16x512xf32>
    %110 = arith.addf %102, %109 : vector<16x512xf32>
    %c0_62 = arith.constant 0 : index
    %c255 = arith.constant 255 : index
    %111 = vector.load %arg10[%c0_62, %c255] : memref<16x1024xf32, #tpu.memory_space<vmem>>, vector<16x512xf32>
    %c0_63 = arith.constant 0 : index
    %c12 = arith.constant 12 : index
    %112 = vector.load %arg4[%c0_63, %c12] : memref<16x27xf32, #tpu.memory_space<vmem>>, vector<16x1xf32>
    %c12_64 = arith.constant 12 : index
    %c0_65 = arith.constant 0 : index
    %113 = vector.load %arg6[%c12_64, %c0_65] : memref<27x512xf32, #tpu.memory_space<vmem>>, vector<1x512xf32>
    %114 = vector.broadcast %113 : vector<1x512xf32> to vector<16x512xf32>
    %115 = arith.mulf %114, %111 : vector<16x512xf32>
    %116 = vector.broadcast %112 : vector<16x1xf32> to vector<16x512xf32>
    %117 = arith.mulf %116, %115 : vector<16x512xf32>
    %118 = arith.addf %110, %117 : vector<16x512xf32>
    %c0_66 = arith.constant 0 : index
    %c256_67 = arith.constant 256 : index
    %119 = vector.load %arg10[%c0_66, %c256_67] : memref<16x1024xf32, #tpu.memory_space<vmem>>, vector<16x512xf32>
    %c0_68 = arith.constant 0 : index
    %c13 = arith.constant 13 : index
    %120 = vector.load %arg4[%c0_68, %c13] : memref<16x27xf32, #tpu.memory_space<vmem>>, vector<16x1xf32>
    %c13_69 = arith.constant 13 : index
    %c0_70 = arith.constant 0 : index
    %121 = vector.load %arg6[%c13_69, %c0_70] : memref<27x512xf32, #tpu.memory_space<vmem>>, vector<1x512xf32>
    %122 = vector.broadcast %121 : vector<1x512xf32> to vector<16x512xf32>
    %123 = arith.mulf %122, %119 : vector<16x512xf32>
    %124 = vector.broadcast %120 : vector<16x1xf32> to vector<16x512xf32>
    %125 = arith.mulf %124, %123 : vector<16x512xf32>
    %126 = arith.addf %118, %125 : vector<16x512xf32>
    %c0_71 = arith.constant 0 : index
    %c257 = arith.constant 257 : index
    %127 = vector.load %arg10[%c0_71, %c257] : memref<16x1024xf32, #tpu.memory_space<vmem>>, vector<16x512xf32>
    %c0_72 = arith.constant 0 : index
    %c14 = arith.constant 14 : index
    %128 = vector.load %arg4[%c0_72, %c14] : memref<16x27xf32, #tpu.memory_space<vmem>>, vector<16x1xf32>
    %c14_73 = arith.constant 14 : index
    %c0_74 = arith.constant 0 : index
    %129 = vector.load %arg6[%c14_73, %c0_74] : memref<27x512xf32, #tpu.memory_space<vmem>>, vector<1x512xf32>
    %130 = vector.broadcast %129 : vector<1x512xf32> to vector<16x512xf32>
    %131 = arith.mulf %130, %127 : vector<16x512xf32>
    %132 = vector.broadcast %128 : vector<16x1xf32> to vector<16x512xf32>
    %133 = arith.mulf %132, %131 : vector<16x512xf32>
    %134 = arith.addf %126, %133 : vector<16x512xf32>
    %c0_75 = arith.constant 0 : index
    %c271 = arith.constant 271 : index
    %135 = vector.load %arg10[%c0_75, %c271] : memref<16x1024xf32, #tpu.memory_space<vmem>>, vector<16x512xf32>
    %c0_76 = arith.constant 0 : index
    %c15 = arith.constant 15 : index
    %136 = vector.load %arg4[%c0_76, %c15] : memref<16x27xf32, #tpu.memory_space<vmem>>, vector<16x1xf32>
    %c15_77 = arith.constant 15 : index
    %c0_78 = arith.constant 0 : index
    %137 = vector.load %arg6[%c15_77, %c0_78] : memref<27x512xf32, #tpu.memory_space<vmem>>, vector<1x512xf32>
    %138 = vector.broadcast %137 : vector<1x512xf32> to vector<16x512xf32>
    %139 = arith.mulf %138, %135 : vector<16x512xf32>
    %140 = vector.broadcast %136 : vector<16x1xf32> to vector<16x512xf32>
    %141 = arith.mulf %140, %139 : vector<16x512xf32>
    %142 = arith.addf %134, %141 : vector<16x512xf32>
    %c0_79 = arith.constant 0 : index
    %c272 = arith.constant 272 : index
    %143 = vector.load %arg10[%c0_79, %c272] : memref<16x1024xf32, #tpu.memory_space<vmem>>, vector<16x512xf32>
    %c0_80 = arith.constant 0 : index
    %c16 = arith.constant 16 : index
    %144 = vector.load %arg4[%c0_80, %c16] : memref<16x27xf32, #tpu.memory_space<vmem>>, vector<16x1xf32>
    %c16_81 = arith.constant 16 : index
    %c0_82 = arith.constant 0 : index
    %145 = vector.load %arg6[%c16_81, %c0_82] : memref<27x512xf32, #tpu.memory_space<vmem>>, vector<1x512xf32>
    %146 = vector.broadcast %145 : vector<1x512xf32> to vector<16x512xf32>
    %147 = arith.mulf %146, %143 : vector<16x512xf32>
    %148 = vector.broadcast %144 : vector<16x1xf32> to vector<16x512xf32>
    %149 = arith.mulf %148, %147 : vector<16x512xf32>
    %150 = arith.addf %142, %149 : vector<16x512xf32>
    %c0_83 = arith.constant 0 : index
    %c273 = arith.constant 273 : index
    %151 = vector.load %arg10[%c0_83, %c273] : memref<16x1024xf32, #tpu.memory_space<vmem>>, vector<16x512xf32>
    %c0_84 = arith.constant 0 : index
    %c17 = arith.constant 17 : index
    %152 = vector.load %arg4[%c0_84, %c17] : memref<16x27xf32, #tpu.memory_space<vmem>>, vector<16x1xf32>
    %c17_85 = arith.constant 17 : index
    %c0_86 = arith.constant 0 : index
    %153 = vector.load %arg6[%c17_85, %c0_86] : memref<27x512xf32, #tpu.memory_space<vmem>>, vector<1x512xf32>
    %154 = vector.broadcast %153 : vector<1x512xf32> to vector<16x512xf32>
    %155 = arith.mulf %154, %151 : vector<16x512xf32>
    %156 = vector.broadcast %152 : vector<16x1xf32> to vector<16x512xf32>
    %157 = arith.mulf %156, %155 : vector<16x512xf32>
    %158 = arith.addf %150, %157 : vector<16x512xf32>
    %c0_87 = arith.constant 0 : index
    %c367 = arith.constant 367 : index
    %159 = vector.load %arg10[%c0_87, %c367] : memref<16x1024xf32, #tpu.memory_space<vmem>>, vector<16x512xf32>
    %c0_88 = arith.constant 0 : index
    %c18 = arith.constant 18 : index
    %160 = vector.load %arg4[%c0_88, %c18] : memref<16x27xf32, #tpu.memory_space<vmem>>, vector<16x1xf32>
    %c18_89 = arith.constant 18 : index
    %c0_90 = arith.constant 0 : index
    %161 = vector.load %arg6[%c18_89, %c0_90] : memref<27x512xf32, #tpu.memory_space<vmem>>, vector<1x512xf32>
    %162 = vector.broadcast %161 : vector<1x512xf32> to vector<16x512xf32>
    %163 = arith.mulf %162, %159 : vector<16x512xf32>
    %164 = vector.broadcast %160 : vector<16x1xf32> to vector<16x512xf32>
    %165 = arith.mulf %164, %163 : vector<16x512xf32>
    %166 = arith.addf %158, %165 : vector<16x512xf32>
    %c0_91 = arith.constant 0 : index
    %c368 = arith.constant 368 : index
    %167 = vector.load %arg10[%c0_91, %c368] : memref<16x1024xf32, #tpu.memory_space<vmem>>, vector<16x512xf32>
    %c0_92 = arith.constant 0 : index
    %c19 = arith.constant 19 : index
    %168 = vector.load %arg4[%c0_92, %c19] : memref<16x27xf32, #tpu.memory_space<vmem>>, vector<16x1xf32>
    %c19_93 = arith.constant 19 : index
    %c0_94 = arith.constant 0 : index
    %169 = vector.load %arg6[%c19_93, %c0_94] : memref<27x512xf32, #tpu.memory_space<vmem>>, vector<1x512xf32>
    %170 = vector.broadcast %169 : vector<1x512xf32> to vector<16x512xf32>
    %171 = arith.mulf %170, %167 : vector<16x512xf32>
    %172 = vector.broadcast %168 : vector<16x1xf32> to vector<16x512xf32>
    %173 = arith.mulf %172, %171 : vector<16x512xf32>
    %174 = arith.addf %166, %173 : vector<16x512xf32>
    %c0_95 = arith.constant 0 : index
    %c369 = arith.constant 369 : index
    %175 = vector.load %arg10[%c0_95, %c369] : memref<16x1024xf32, #tpu.memory_space<vmem>>, vector<16x512xf32>
    %c0_96 = arith.constant 0 : index
    %c20 = arith.constant 20 : index
    %176 = vector.load %arg4[%c0_96, %c20] : memref<16x27xf32, #tpu.memory_space<vmem>>, vector<16x1xf32>
    %c20_97 = arith.constant 20 : index
    %c0_98 = arith.constant 0 : index
    %177 = vector.load %arg6[%c20_97, %c0_98] : memref<27x512xf32, #tpu.memory_space<vmem>>, vector<1x512xf32>
    %178 = vector.broadcast %177 : vector<1x512xf32> to vector<16x512xf32>
    %179 = arith.mulf %178, %175 : vector<16x512xf32>
    %180 = vector.broadcast %176 : vector<16x1xf32> to vector<16x512xf32>
    %181 = arith.mulf %180, %179 : vector<16x512xf32>
    %182 = arith.addf %174, %181 : vector<16x512xf32>
    %c0_99 = arith.constant 0 : index
    %c383 = arith.constant 383 : index
    %183 = vector.load %arg10[%c0_99, %c383] : memref<16x1024xf32, #tpu.memory_space<vmem>>, vector<16x512xf32>
    %c0_100 = arith.constant 0 : index
    %c21 = arith.constant 21 : index
    %184 = vector.load %arg4[%c0_100, %c21] : memref<16x27xf32, #tpu.memory_space<vmem>>, vector<16x1xf32>
    %c21_101 = arith.constant 21 : index
    %c0_102 = arith.constant 0 : index
    %185 = vector.load %arg6[%c21_101, %c0_102] : memref<27x512xf32, #tpu.memory_space<vmem>>, vector<1x512xf32>
    %186 = vector.broadcast %185 : vector<1x512xf32> to vector<16x512xf32>
    %187 = arith.mulf %186, %183 : vector<16x512xf32>
    %188 = vector.broadcast %184 : vector<16x1xf32> to vector<16x512xf32>
    %189 = arith.mulf %188, %187 : vector<16x512xf32>
    %190 = arith.addf %182, %189 : vector<16x512xf32>
    %c0_103 = arith.constant 0 : index
    %c384 = arith.constant 384 : index
    %191 = vector.load %arg10[%c0_103, %c384] : memref<16x1024xf32, #tpu.memory_space<vmem>>, vector<16x512xf32>
    %c0_104 = arith.constant 0 : index
    %c22 = arith.constant 22 : index
    %192 = vector.load %arg4[%c0_104, %c22] : memref<16x27xf32, #tpu.memory_space<vmem>>, vector<16x1xf32>
    %c22_105 = arith.constant 22 : index
    %c0_106 = arith.constant 0 : index
    %193 = vector.load %arg6[%c22_105, %c0_106] : memref<27x512xf32, #tpu.memory_space<vmem>>, vector<1x512xf32>
    %194 = vector.broadcast %193 : vector<1x512xf32> to vector<16x512xf32>
    %195 = arith.mulf %194, %191 : vector<16x512xf32>
    %196 = vector.broadcast %192 : vector<16x1xf32> to vector<16x512xf32>
    %197 = arith.mulf %196, %195 : vector<16x512xf32>
    %198 = arith.addf %190, %197 : vector<16x512xf32>
    %c0_107 = arith.constant 0 : index
    %c385 = arith.constant 385 : index
    %199 = vector.load %arg10[%c0_107, %c385] : memref<16x1024xf32, #tpu.memory_space<vmem>>, vector<16x512xf32>
    %c0_108 = arith.constant 0 : index
    %c23 = arith.constant 23 : index
    %200 = vector.load %arg4[%c0_108, %c23] : memref<16x27xf32, #tpu.memory_space<vmem>>, vector<16x1xf32>
    %c23_109 = arith.constant 23 : index
    %c0_110 = arith.constant 0 : index
    %201 = vector.load %arg6[%c23_109, %c0_110] : memref<27x512xf32, #tpu.memory_space<vmem>>, vector<1x512xf32>
    %202 = vector.broadcast %201 : vector<1x512xf32> to vector<16x512xf32>
    %203 = arith.mulf %202, %199 : vector<16x512xf32>
    %204 = vector.broadcast %200 : vector<16x1xf32> to vector<16x512xf32>
    %205 = arith.mulf %204, %203 : vector<16x512xf32>
    %206 = arith.addf %198, %205 : vector<16x512xf32>
    %c0_111 = arith.constant 0 : index
    %c399 = arith.constant 399 : index
    %207 = vector.load %arg10[%c0_111, %c399] : memref<16x1024xf32, #tpu.memory_space<vmem>>, vector<16x512xf32>
    %c0_112 = arith.constant 0 : index
    %c24 = arith.constant 24 : index
    %208 = vector.load %arg4[%c0_112, %c24] : memref<16x27xf32, #tpu.memory_space<vmem>>, vector<16x1xf32>
    %c24_113 = arith.constant 24 : index
    %c0_114 = arith.constant 0 : index
    %209 = vector.load %arg6[%c24_113, %c0_114] : memref<27x512xf32, #tpu.memory_space<vmem>>, vector<1x512xf32>
    %210 = vector.broadcast %209 : vector<1x512xf32> to vector<16x512xf32>
    %211 = arith.mulf %210, %207 : vector<16x512xf32>
    %212 = vector.broadcast %208 : vector<16x1xf32> to vector<16x512xf32>
    %213 = arith.mulf %212, %211 : vector<16x512xf32>
    %214 = arith.addf %206, %213 : vector<16x512xf32>
    %c0_115 = arith.constant 0 : index
    %c400 = arith.constant 400 : index
    %215 = vector.load %arg10[%c0_115, %c400] : memref<16x1024xf32, #tpu.memory_space<vmem>>, vector<16x512xf32>
    %c0_116 = arith.constant 0 : index
    %c25 = arith.constant 25 : index
    %216 = vector.load %arg4[%c0_116, %c25] : memref<16x27xf32, #tpu.memory_space<vmem>>, vector<16x1xf32>
    %c25_117 = arith.constant 25 : index
    %c0_118 = arith.constant 0 : index
    %217 = vector.load %arg6[%c25_117, %c0_118] : memref<27x512xf32, #tpu.memory_space<vmem>>, vector<1x512xf32>
    %218 = vector.broadcast %217 : vector<1x512xf32> to vector<16x512xf32>
    %219 = arith.mulf %218, %215 : vector<16x512xf32>
    %220 = vector.broadcast %216 : vector<16x1xf32> to vector<16x512xf32>
    %221 = arith.mulf %220, %219 : vector<16x512xf32>
    %222 = arith.addf %214, %221 : vector<16x512xf32>
    %c0_119 = arith.constant 0 : index
    %c401 = arith.constant 401 : index
    %223 = vector.load %arg10[%c0_119, %c401] : memref<16x1024xf32, #tpu.memory_space<vmem>>, vector<16x512xf32>
    %c0_120 = arith.constant 0 : index
    %c26 = arith.constant 26 : index
    %224 = vector.load %arg4[%c0_120, %c26] : memref<16x27xf32, #tpu.memory_space<vmem>>, vector<16x1xf32>
    %c26_121 = arith.constant 26 : index
    %c0_122 = arith.constant 0 : index
    %225 = vector.load %arg6[%c26_121, %c0_122] : memref<27x512xf32, #tpu.memory_space<vmem>>, vector<1x512xf32>
    %226 = vector.broadcast %225 : vector<1x512xf32> to vector<16x512xf32>
    %227 = arith.mulf %226, %223 : vector<16x512xf32>
    %228 = vector.broadcast %224 : vector<16x1xf32> to vector<16x512xf32>
    %229 = arith.mulf %228, %227 : vector<16x512xf32>
    %230 = arith.addf %222, %229 : vector<16x512xf32>
    %c0_123 = arith.constant 0 : index
    %c0_124 = arith.constant 0 : index
    %231 = vector.load %arg5[%c0_123, %c0_124] : memref<16x1xf32, #tpu.memory_space<vmem>>, vector<16x1xf32>
    %232 = vector.broadcast %231 : vector<16x1xf32> to vector<16x512xf32>
    %233 = arith.addf %230, %232 : vector<16x512xf32>
    %cst_125 = arith.constant 0.000000e+00 : f32
    %cst_126 = arith.constant 6.000000e+00 : f32
    %234 = vector.broadcast %cst_125 : f32 to vector<16x512xf32>
    %235 = arith.maximumf %234, %233 : vector<16x512xf32>
    %236 = vector.broadcast %cst_126 : f32 to vector<16x512xf32>
    %237 = arith.minimumf %236, %235 : vector<16x512xf32>
    %c0_127 = arith.constant 0 : index
    %c0_128 = arith.constant 0 : index
    %238 = vector.load %arg7[%c0_127, %c0_128] : memref<8x16xf32, #tpu.memory_space<vmem>>, vector<8x16xf32>
    %cst_129 = arith.constant dense<0.000000e+00> : vector<8x512xf32>
    %239 = tpu.matmul %238, %237, %cst_129 {dimension_numbers = #tpu.dot_dimension_numbers<[1], [0], [0], [1], [0, 0, 1, 1], [], []>, precision = #tpu.contract_precision<fp32>} : vector<8x16xf32>, vector<16x512xf32>, vector<8x512xf32> -> vector<8x512xf32>
    %c0_130 = arith.constant 0 : index
    %c0_131 = arith.constant 0 : index
    %240 = vector.load %arg8[%c0_130, %c0_131] : memref<8x1xf32, #tpu.memory_space<vmem>>, vector<8x1xf32>
    %241 = vector.broadcast %240 : vector<8x1xf32> to vector<8x512xf32>
    %242 = arith.addf %239, %241 : vector<8x512xf32>
    %243 = arith.addf %242, %1 : vector<8x512xf32>
    %c0_132 = arith.constant 0 : index
    %c0_133 = arith.constant 0 : index
    %c0_134 = arith.constant 0 : index
    %244 = vector.load %arg9[%c0_132, %c0_133, %c0_134] : memref<1x8x512xf32, #tpu.memory_space<vmem>>, vector<1x8x512xf32>
    %245 = vector.shape_cast %244 : vector<1x8x512xf32> to vector<8x512xf32>
    %246 = vector.shape_cast %243 : vector<8x512xf32> to vector<1x8x512xf32>
    tpu.vector_store %arg9[%c0_132, %c0_133, %c0_134], %246 {strides = array<i32>} : memref<1x8x512xf32, #tpu.memory_space<vmem>>, vector<1x8x512xf32>,
    return
  }
  func.func @transform_0(%arg0: i32) -> (i32, i32, i32) {
    %c0_i32 = arith.constant 0 : i32
    %c0_i32_0 = arith.constant 0 : i32
    %c0_i32_1 = arith.constant 0 : i32
    return %arg0, %c0_i32, %c0_i32_0 : i32, i32, i32
  }
  func.func @transform_1(%arg0: i32) -> (i32, i32) {
    %c0_i32 = arith.constant 0 : i32
    %c0_i32_0 = arith.constant 0 : i32
    %c0_i32_1 = arith.constant 0 : i32
    return %c0_i32, %c0_i32_0 : i32, i32
  }
  func.func @transform_2(%arg0: i32) -> (i32, i32) {
    %c0_i32 = arith.constant 0 : i32
    %c0_i32_0 = arith.constant 0 : i32
    %c0_i32_1 = arith.constant 0 : i32
    return %c0_i32, %c0_i32_0 : i32, i32
  }
  func.func @transform_3(%arg0: i32) -> (i32, i32) {
    %c0_i32 = arith.constant 0 : i32
    %c0_i32_0 = arith.constant 0 : i32
    %c0_i32_1 = arith.constant 0 : i32
    return %c0_i32, %c0_i32_0 : i32, i32
  }
  func.func @transform_4(%arg0: i32) -> (i32, i32) {
    %c0_i32 = arith.constant 0 : i32
    %c0_i32_0 = arith.constant 0 : i32
    %c0_i32_1 = arith.constant 0 : i32
    return %c0_i32, %c0_i32_0 : i32, i32
  }
  func.func @transform_5(%arg0: i32) -> (i32, i32) {
    %c0_i32 = arith.constant 0 : i32
    %c0_i32_0 = arith.constant 0 : i32
    %c0_i32_1 = arith.constant 0 : i32
    return %c0_i32, %c0_i32_0 : i32, i32
  }
  func.func @transform_6(%arg0: i32) -> (i32, i32) {
    %c0_i32 = arith.constant 0 : i32
    %c0_i32_0 = arith.constant 0 : i32
    %c0_i32_1 = arith.constant 0 : i32
    return %c0_i32, %c0_i32_0 : i32, i32
  }
  func.func @transform_7(%arg0: i32) -> (i32, i32) {
    %c0_i32 = arith.constant 0 : i32
    %c0_i32_0 = arith.constant 0 : i32
    %c0_i32_1 = arith.constant 0 : i32
    return %c0_i32, %c0_i32_0 : i32, i32
  }
  func.func @transform_8(%arg0: i32) -> (i32, i32, i32) {
    %c0_i32 = arith.constant 0 : i32
    %c0_i32_0 = arith.constant 0 : i32
    %c0_i32_1 = arith.constant 0 : i32
    return %arg0, %c0_i32, %c0_i32_0 : i32, i32, i32
  }
}

</mosaic_0001>

<bundles_post_ra>
// kernel: tpu_custom_call.1
= control target key start
LH: loop header
LB: loop body
LE: loop exit
PB: predicated region body
PF: predicated region fallthrough
CT: control target
= control target key end

     0   :  { %13 = vsyncpa [#allocation4], 0  ;;  %s8426_s0 = inlined_call_operand.vmem [shape: f32[2,8,512], index: 0, kind: input, shape index: {}]   ;;  %s8427_s1 = inlined_call_operand.vmem [shape: f32[16,8], index: 1, kind: input, shape index: {}]   ;;  %s8428_s2 = inlined_call_operand.vmem [shape: f32[16,1], index: 2, kind: input, shape index: {}]   ;;  %s8429_s3 = inlined_call_operand.hbm [shape: f32[16,27], index: 3, kind: input, shape index: {}]   ;;  %s8430_s4 = inlined_call_operand.vmem [shape: f32[16,1], index: 4, kind: input, shape index: {}]   ;;  %s8431_s5 = inlined_call_operand.hbm [shape: f32[27,512], index: 5, kind: input, shape index: {}]   ;;  %s8432_s6 = inlined_call_operand.vmem [shape: f32[8,16], index: 6, kind: input, shape index: {}]   ;;  %s8433_s7 = inlined_call_operand.vmem [shape: f32[8,1], index: 7, kind: input, shape index: {}]   ;;  %s8434_s8 = inlined_call_operand.hbm [shape: f32[2,8,512], index: 8, kind: output, shape index: {}]  }
   0x1   :  { %14 = vsyncpa [#allocation7], 0 }
   0x2   :  { %15 = vsyncpa [#allocation5], 0 }
   0x3   :  { %17 = vsyncpa [#allocation5 + $0x1], 0  ;;  %s5676_s27 = smov 0   ;;  %s5678_s28 = smov 0  }
   0x4   :  { %s5680_s29 = smov 0   ;;  %s5682_s30 = smov 0  }
   0x5 LB: > { %8649 = sst [smem:[#allocation12_spill]] %s5582_s29  ;;  %s5697_s9 = sadd.s32 4294967295, %s5586_s30   ;;  %s5586_s30 = sphi %s5682_s30, %s9155_s30   ;;  %s5582_s29 = sphi %s5680_s29, %s9152_s29   ;;  %s5578_s28 = sphi %s5678_s28, %s9154_s28   ;;  %s5574_s27 = sphi %s5676_s27, %s9153_s27  }
   0x6   : > { %s4999_s10 = sadd.s32 4294967294, %s5586_s30   ;;  %s5701_s11 = sadd.s32 1, %s5586_s30  }
   0x7   : > { %s203_s12 = sadd.s32 1, %s5582_s29  ;;  %s200_s13 = ssub.s32 %s5586_s30, %s5701_s11 }
   0x8   : > { %p213_p0 = scmp.ne.s32.totalorder %s5582_s29, %s5578_s28  ;;  %p201_p1 = scmp.eq.s32.totalorder %s200_s13, 0 }
   0x9   : > { %p214_p2 = scmp.eq.s32.totalorder %s5697_s9, 1  ;;  %p219_p3 = scmp.ne.s32.totalorder %s5578_s28, %s5574_s27 }
   0xa   : > { %p220_p4 = scmp.eq.s32.totalorder %s4999_s10, 1  ;;  %p5000_p7 = scmp.ge.s32.totalorder %s5586_s30, 1 }
   0xb   : > { %s5712_s14 = scalar_select %p201_p1, %s5582_s29, %s203_s12  }
   0xc   : > { %p5714_p5 = por %p214_p2, %p213_p0  ;;  %p5718_p6 = por %p220_p4, %p219_p3 }
   0xd   : > { %8650 = sst [smem:[#allocation13_spill]] %s5712_s14  ;;  %p227_p8 = scmp.lt.s32.totalorder %s5586_s30, 3 }
   0xe   : > { %s8651_s15 = scalar_select %p5714_p5, 1, 0 }
   0xf   : > { %s8652_s16 = scalar_select %p5718_p6, 1, 0 }
  0x10   : > { %p8435_p9 = scmp.eq.s32.totalorder %s5697_s9, 0  ;;  %p5725_p10 = pnand %p5000_p7, %p227_p8 }
  0x11   : > { %s5588_s18 = smov [#allocation3]   ;;  %s5589_s21 = smov [#allocation6]  }
  0x12   : > { %s8653_s17 = scalar_select %p5725_p10, 1, 0 }
  0x13   : > { %s245_s19 = sshll.u32 %s5588_s18, 4  ;;  %p5147_p11 = pneg %p5725_p10  ;;  %s246_s19 = int_to_ptr.vmem [resolvable:$true] %s245_s19 }
  0x14   : > { %s261_s22 = sshll.u32 %s5589_s21, 4  ;;  %s5460_s25 = scalar_lea.hbm %s8429_s3, 256  ;;  %s5737_s22 = int_to_ptr.vmem [resolvable:$true] %s261_s22 }
  0x15   : > { %p5733_p12 = pnand %p8435_p9, %p5147_p11  ;;  %p5461_p13 = scmp.ne.s32.totalorder %s8429_s3, %s5460_s25 }
  0x16   : > { %p5467_p3 = scmp.lt.u32.totalorder %s5460_s25, %s8429_s3 }
  0x17   : > { %p5462_p0 = pneg %p5733_p12 }
  0x19   : > { %p5463_p1 = pnand %p5462_p0, %p5461_p13 }
  0x1b   : > { %p5464_p2 = pneg %p5463_p1 }
  0x1d   : > { %p5469_p4 = pnand %p5467_p3, %p5464_p2 }
  0x1f   : > { %5472 = shalt.err (!%p5469_p4)
}
  0x20   : > { %s5473_s18 = scalar_lea.vmem %s246_s19, 256  ;;  %p5481_p9 = scmp.lt.s32.totalorder %s246_s19, %s246_s19 }
  0x21   : > { %p5474_p7 = scmp.ne.s32.totalorder %s246_s19, %s5473_s18  ;;  %p5482_p6 = scmp.lt.s32.totalorder %s5473_s18, %s5473_s18 }
  0x23   : > { %p5476_p8 = pnand %p5474_p7, %p5462_p0  ;;  %p5483_p5 = por %p5482_p6, %p5481_p9 }
  0x25   : > { %p5477_p11 = pneg %p5476_p8 }
  0x27   : > { %p5484_p10 = pnand %p5483_p5, %p5477_p11 }
  0x29   : > { %5487 = shalt.err (!%p5484_p10)
}
  0x2a   : > { %s5590_s21 = smov 128   ;;  %s5591_s23 = smov 8  }
  0x2b   : > { %5150 = dma.hbm_to_vmem [thread:$0]  (!%p5733_p12), %s8429_s3, 256, %s246_s19, [#allocation4], %s5590_s21, %s5590_s21, %s5591_s23  }
  0x2c   : > { %s5488_s12 = scalar_lea.hbm %s8431_s5, 2048 }
  0x2d   : > { %p5489_p13 = scmp.ne.s32.totalorder %s8431_s5, %s5488_s12  ;;  %p5495_p9 = scmp.lt.u32.totalorder %s5488_s12, %s8431_s5 }
  0x2f   : > { %p5491_p5 = pnand %p5489_p13, %p5462_p0 }
  0x31   : > { %p5492_p6 = pneg %p5491_p5 }
  0x33   : > { %p5497_p10 = pnand %p5495_p9, %p5492_p6 }
  0x35   : > { %5500 = shalt.err (!%p5497_p10)
}
  0x36   : > { %s5501_s19 = scalar_lea.vmem %s5737_s22, 2048  ;;  %p5509_p4 = scmp.lt.s32.totalorder %s5737_s22, %s5737_s22 }
  0x37   : > { %p5502_p1 = scmp.ne.s32.totalorder %s5737_s22, %s5501_s19  ;;  %p5510_p7 = scmp.lt.s32.totalorder %s5501_s19, %s5501_s19 }
  0x39   : > { %p5504_p2 = pnand %p5502_p1, %p5462_p0  ;;  %p5511_p8 = por %p5510_p7, %p5509_p4 }
  0x3b   : > { %p5505_p3 = pneg %p5504_p2 }
  0x3d   : > { %p5512_p11 = pnand %p5511_p8, %p5505_p3 }
  0x3f   : > { %5515 = shalt.err (!%p5512_p11)
}
  0x40   : > { %s5592_s29 = smov 512   ;;  %s5593_s14 = smov 32  }
  0x41   : > { %5153 = dma.hbm_to_vmem [thread:$0]  (!%p5733_p12), %s8431_s5, 2048, %s5737_s22, [#allocation7], %s5592_s29, %s5592_s29, %s5593_s14  }
  0x42   : > { %p8655_p13 = scmp.ne.s32.totalorder %s8653_s17, 0 }
  0x44   : > { %291 = sbr.rel (%p8655_p13) target bundleno = 1259 (0x4eb), region = 52 }
  0x4b   : > { %p8656_p0 = scmp.eq.s32.totalorder %s5697_s9, 0 }
  0x4d   : > { %5561 = dma.done.wait (%p8656_p0), [#allocation4], 256   ;;  %p8657_p5 = pmov %p8656_p0 }
  0x4e   : > { %p8658_p6 = pmov %p8656_p0 }
  0x4f   : > { %5563 = vsyncadd (%p8657_p5), [#allocation4], 4294967040 }
  0x50   : > { %5565 = dma.done.wait (%p8658_p6), [#allocation7], 2048   ;;  %p8659_p9 = pmov %p8656_p0 }
  0x51   : > { %p329_p10 = scmp.lt.s32.totalorder %s5697_s9, 1  ;;  %v8441_v0 = vmov 0.0   ;;  %v8439_v1 = vmov 0   ;;  %s5596_s20 = smov 17   ;;  %vm352_vm0 = vcmask 64512   ;;  %v338_v9 = vld [vmem:[%s8427_s1] sm:$0xff] }
  0x52   : > { %5567 = vsyncadd (%p8659_p9), [#allocation7], 4294965248  ;;  %425 = vmatprep.mubr.f32.mxu0 %v8441_v0  ;;  %939 = vmatprep.mubr.f32.mxu1 %v8441_v0  ;;  %v339_v10 = vld [vmem:[%s8427_s1 + $0x8] sm:$0xff]  ;;  %v354_v12 = vsel %vm352_vm0, %v338_v9, 0  ;;  %v340_v14 = vld [vmem:[%s8428_s2] sm:$0xff]  ;;  %v5597_v38 = vmov 1  }
  0x53   : > { %s330_s17 = scalar_select %p329_p10, %s5697_s9, 1  ;;  %5247 = vset.pattern.permute.xlu0 %v8439_v1  ;;  %5258 = vset.pattern.permute.xlu1 %v8439_v1  ;;  %v357_v13 = vsel %vm352_vm0, %v339_v10, 0  ;;  %v5837_v16 = vand.u32 4294901760, %v354_v12  ;;  %v5844_v19 = vld [vmem:[#allocation3 + $0x8] sm:$0xff]  ;;  %v5895_v44 = vld [vmem:[#allocation3] sm:$0xff]  ;;  %v5599_v45 = vmov 2  }
  0x54   : > { %5243 = vrot.lane.b32.xlu0 %v8441_v0, %s5596_s20  ;;  %5238 = vrot.lane.b32.xlu1 %v8441_v0, %s5596_s20  ;;  %v5839_v17 = vand.u32 4294901760, %v357_v13  ;;  %v341_v28 = vld [vmem:[%s8428_s2 + $0x8] sm:$0xff]  ;;  %s5598_s23 = smov 15   ;;  %v5602_v46 = vmov 3   ;;  %v5603_v47 = vmov 4   ;;  %s5604_s24 = smov 127  }
  0x55   : > { %s5015_s22 = sshll.u32 %s330_s17, 5  ;;  %v5855_v22 = vsub.f32 %v354_v12, %v5837_v16  ;;  %s5600_s17 = smov 16   ;;  %v5605_v48 = vmov 5   ;;  %v5607_v49 = vmov 6   ;;  %v5609_v50 = vmov 7  }
  0x56   : > { %s5809_s26 = scalar_lea.vmem %s8426_s0, %s5015_s22  ;;  %v5858_v23 = vsub.f32 %v357_v13, %v5839_v17  ;;  %s5601_s22 = smov 1   ;;  %v5611_v51 = vmov 8   ;;  %v5612_v52 = vmov 9   ;;  %v5613_v53 = vmov 10  }
  0x57   : > { %v335_v2 = vld [vmem:[%s5809_s26 + $0x8] sm:$0xff]  ;;  %v337_v3 = vld [vmem:[%s5809_s26 + $0x18] sm:$0xff]  ;;  %v334_v4 = vld [vmem:[%s5809_s26] sm:$0xff]  ;;  %v5869_v29 = vand.u32 4294901760, %v5855_v22  ;;  %s5606_s25 = smov 113   ;;  %s5608_s10 = smov 112  }
  0x58   : > { %v5814_v5 = vand.u32 4294901760, %v335_v2  ;;  %v5816_v6 = vand.u32 4294901760, %v337_v3  ;;  %v5818_v7 = vand.u32 4294901760, %v334_v4  ;;  %v336_v8 = vld [vmem:[%s5809_s26 + $0x10] sm:$0xff]  ;;  %344 = vperm.xlu0 %5247, %v340_v14   ;;  %1523 = vperm.xlu1 %5258, %v5844_v19   ;;  %v5872_v30 = vand.u32 4294901760, %v5858_v23  ;;  %s5610_s12 = smov 111  }
  0x59   : > { %v5827_v11 = vand.u32 4294901760, %v336_v8  ;;  %v429_v35 = vsub.f32 %v5855_v22, %v5869_v29  ;;  %v5614_v54 = vmov 11   ;;  %v5615_v55 = vmov 12   ;;  %p9149_p1 = scmp.ne.s32.totalorder %s8651_s15, 0 }
  0x5a   : > { %360 = vmatprep.subr.mxu0 %v5814_v5  ;;  %874 = vmatprep.subr.mxu1 %v5816_v6  ;;  %v5835_v15 = vsub.f32 %v334_v4, %v5818_v7  ;;  %v5842_v18 = vsub.f32 %v335_v2, %v5814_v5  ;;  %v5852_v21 = vsub.f32 %v337_v3, %v5816_v6  ;;  %vm1491_vm1 = vcmask 138240  }
  0x5b   : > { %362 = vmatpush1.msra.mxu0 %v5818_v7  ;;  %876 = vmatpush1.msra.mxu1 %v5827_v11  ;;  %v5849_v20 = vsub.f32 %v336_v8, %v5827_v11  ;;  %v440_v36 = vsub.f32 %v5858_v23, %v5872_v30  ;;  %v430_v40 = vand.u32 4294901760, %v429_v35  ;;  %vm1585_vm2 = vcmask 130048  }
  0x5c   : > { %v450_v24 = vand.u32 4294901760, %v5842_v18  ;;  %v456_v25 = vand.u32 4294901760, %v5835_v15  ;;  %v964_v26 = vand.u32 4294901760, %v5852_v21  ;;  %349 = vperm.xlu0 %5247, %v341_v28   ;;  %5260 = vset.pattern.permute.xlu1 %v5597_v38  ;;  %vm1677_vm3 = vcmask 121856  }
  0x5d   : > { %v970_v27 = vand.u32 4294901760, %v5849_v20  ;;  %1615 = vperm.xlu1 %5260, %v5844_v19   ;;  %431 = vmatmul.mubr.f32.vlgmr.msra.gmra.mrb[0].mxu0 %v430_v40  ;;  %v441_v43 = vand.u32 4294901760, %v440_v36  ;;  %vm1769_vm4 = vcmask 7168   ;;  %vm1936_vm5 = vcmask 1039360  }
  0x5e   : > { %v451_v31 = vsub.f32 %v5842_v18, %v450_v24  ;;  %v457_v32 = vsub.f32 %v5835_v15, %v456_v25  ;;  %v965_v33 = vsub.f32 %v5852_v21, %v964_v26  ;;  %945 = vmatmul.mubr.f32.vlgmr.msra.gmra.mrb[0].mxu1 %v430_v40  ;;  %436 = vmatprep.mubr.f32.mxu0 %v8441_v0  ;;  %v5616_v40 = vmov 13  }
  0x5f   : > { %v971_v34 = vsub.f32 %v5849_v20, %v970_v27  ;;  %950 = vmatprep.mubr.f32.mxu1 %v8441_v0  ;;  %vm2028_vm6 = vcmask 924672   ;;  %vm2120_vm7 = vcmask 916480   ;;  %vm2212_vm8 = vcmask 908288  }
  0x60   : > { %v452_v37 = vand.u32 4294901760, %v451_v31  ;;  %v966_v39 = vand.u32 4294901760, %v965_v33  ;;  %v458_v41 = vand.u32 4294901760, %v457_v32  ;;  %1518 = vperm.xlu0 %5247, %v5895_v44  }
  0x61   : > { %v972_v42 = vand.u32 4294901760, %v971_v34  ;;  %442 = vmatmul.mubr.f32.gmra.mrb[2].mxu0 %v441_v43  ;;  %5262 = vrot.lane.b32.xlu1 %v8441_v0, %s5598_s23 }
  0x62   : > { %453 = vmatprep.subr.mxu0 %v452_v37  ;;  %967 = vmatprep.subr.mxu1 %v966_v39 }
  0x63   : > { %459 = vmatpush1.msra.mxu0 %v458_v41  ;;  %973 = vmatpush1.msra.mxu1 %v972_v42 }
  0x64   : > { %539 = vmatprep.subr.mxu0 %v5842_v18  ;;  %1053 = vmatprep.subr.mxu1 %v5852_v21 }
  0x65   : > { %956 = vmatmul.mubr.f32.gmra.mrb[2].mxu1 %v441_v43  ;;  %522 = vmatprep.mubr.f32.mxu0 %v8441_v0 }
  0x66   : > { %1036 = vmatprep.mubr.f32.mxu1 %v8441_v0  ;;  %5271 = vset.pattern.permute.xlu1 %v5599_v45 }
  0x67   : > { %524 = vmatmul.mubr.f32.vlgmr.msra.gmra.mrb[0].mxu0 %v5837_v16  ;;  %5249 = vrot.lane.b32.xlu0 %v8441_v0, %s5600_s17 }
  0x68   : > { %529 = vmatprep.mubr.f32.mxu0 %v8441_v0  ;;  %542 = vmatpush1.msra.mxu0 %v5835_v15 }
  0x69   : > { %1038 = vmatmul.mubr.f32.vlgmr.msra.gmra.mrb[0].mxu1 %v5837_v16  ;;  %623 = vmatprep.subr.mxu0 %v5814_v5 }
  0x6a   : > { %1043 = vmatprep.mubr.f32.mxu1 %v8441_v0  ;;  %1056 = vmatpush1.msra.mxu1 %v5849_v20 }
  0x6b   : > { %1137 = vmatprep.subr.mxu1 %v5816_v6  ;;  %531 = vmatmul.mubr.f32.gmra.mrb[2].mxu0 %v5839_v17 }
  0x6c   : > { %605 = vmatprep.mubr.f32.mxu0 %v8441_v0  ;;  %5267 = vrot.lane.b32.xlu1 %v8441_v0, %s5598_s23 }
  0x6d   : > { %1045 = vmatmul.mubr.f32.gmra.mrb[2].mxu1 %v5839_v17  ;;  %5259 = vset.pattern.permute.xlu0 %v5597_v38 }
  0x6e   : > { %1119 = vmatprep.mubr.f32.mxu1 %v8441_v0  ;;  %5254 = vrot.lane.b32.xlu0 %v8441_v0, %s5600_s17 }
  0x6f   : > { %608 = vmatmul.mubr.f32.vlgmr.msra.gmra.mrb[0].mxu0 %v5855_v22 }
  0x70   : > { %613 = vmatprep.mubr.f32.mxu0 %v8441_v0  ;;  %625 = vmatpush1.msra.mxu0 %v5818_v7 }
  0x71   : > { %1122 = vmatmul.mubr.f32.vlgmr.msra.gmra.mrb[0].mxu1 %v5855_v22  ;;  %710 = vmatprep.subr.mxu0 %v450_v24 }
  0x72   : > { %1127 = vmatprep.mubr.f32.mxu1 %v8441_v0  ;;  %1139 = vmatpush1.msra.mxu1 %v5827_v11 }
  0x73   : > { %1224 = vmatprep.subr.mxu1 %v964_v26  ;;  %616 = vmatmul.mubr.f32.gmra.mrb[2].mxu0 %v5858_v23 }
  0x74   : > { %688 = vmatprep.mubr.f32.mxu0 %v8441_v0  ;;  %1703 = vperm.xlu1 %5271, %v5895_v44  }
  0x75   : > { %1130 = vmatmul.mubr.f32.gmra.mrb[2].mxu1 %v5858_v23  ;;  %1611 = vperm.xlu0 %5259, %v5895_v44  }
  0x76   : > { %1202 = vmatprep.mubr.f32.mxu1 %v8441_v0 }
  0x77   : > { %692 = vmatmul.mubr.f32.vlgmr.msra.gmra.mrb[0].mxu0 %v5869_v29 }
  0x78   : > { %697 = vmatprep.mubr.f32.mxu0 %v8441_v0  ;;  %714 = vmatpush1.msra.mxu0 %v456_v25 }
  0x79   : > { %1206 = vmatmul.mubr.f32.vlgmr.msra.gmra.mrb[0].mxu1 %v5869_v29  ;;  %793 = vmatprep.subr.mxu0 %v5814_v5 }
  0x7a   : > { %1211 = vmatprep.mubr.f32.mxu1 %v8441_v0  ;;  %1228 = vmatpush1.msra.mxu1 %v970_v27 }
  0x7b   : > { %1307 = vmatprep.subr.mxu1 %v5816_v6  ;;  %701 = vmatmul.mubr.f32.gmra.mrb[2].mxu0 %v5872_v30 }
  0x7c   : > { %777 = vmatprep.mubr.f32.mxu0 %v8441_v0  ;;  %5274 = vrot.lane.b32.xlu1 %v8441_v0, %s5601_s22 }
  0x7d   : > { %1215 = vmatmul.mubr.f32.gmra.mrb[2].mxu1 %v5872_v30  ;;  %5284 = vset.pattern.permute.xlu1 %v5602_v46 }
  0x7e   : > { %1291 = vmatprep.mubr.f32.mxu1 %v8441_v0  ;;  %5272 = vset.pattern.permute.xlu0 %v5599_v45 }
  0x7f   : > { %779 = vmatmul.mubr.f32.vlgmr.msra.gmra.mrb[0].mxu0 %v5837_v16  ;;  %1707 = vperm.xlu0 %5272, %v5844_v19  }
  0x80   : > { %784 = vmatprep.mubr.f32.mxu0 %v8441_v0  ;;  %795 = vmatpush1.msra.mxu0 %v5818_v7 }
  0x81   : > { %1293 = vmatmul.mubr.f32.vlgmr.msra.gmra.mrb[0].mxu1 %v5837_v16  ;;  %1799 = vperm.xlu1 %5284, %v5844_v19  }
  0x82   : > { %1298 = vmatprep.mubr.f32.mxu1 %v8441_v0  ;;  %1309 = vmatpush1.msra.mxu1 %v5827_v11 }
  0x83   : > { %786 = vmatmul.mubr.f32.gmra.mrb[2].mxu0 %v5839_v17  ;;  %5279 = vrot.lane.b32.xlu0 %v8441_v0, %s5601_s22 }
  0x84   : > { %858 = vmatprep.mubr.f32.mxu0 %v8441_v0  ;;  %5283 = vset.pattern.permute.xlu0 %v5602_v46 }
  0x85   : > { %1300 = vmatmul.mubr.f32.gmra.mrb[2].mxu1 %v5839_v17  ;;  %5285 = vset.pattern.permute.xlu1 %v5603_v47 }
  0x86   : > { %1372 = vmatprep.mubr.f32.mxu1 %v8441_v0  ;;  %1850 = vperm.xlu1 %5285, %v5895_v44  }
  0x87   : > { %860 = vmatmul.mubr.f32.vlgmr.msra.gmra.mrb[0].mxu0 %v5837_v16  ;;  %1795 = vperm.xlu0 %5283, %v5895_v44  }
  0x88   : > { %865 = vmatprep.mubr.f32.mxu0 %v8441_v0 }
  0x89   : > { %1374 = vmatmul.mubr.f32.vlgmr.msra.gmra.mrb[0].mxu1 %v5837_v16 }
  0x8a   : > { %1379 = vmatprep.mubr.f32.mxu1 %v8441_v0  ;;  %5288 = vrot.lane.b32.xlu1 %v8441_v0, %s5604_s24 }
  0x8b   : > { %867 = vmatmul.mubr.f32.gmra.mrb[2].mxu0 %v5839_v17  ;;  %5292 = vset.pattern.permute.xlu1 %v5605_v48 }
  0x8c   : > { %3981 = vmatprep.mubr.f32.mxu0 %v8441_v0  ;;  %5286 = vset.pattern.permute.xlu0 %v5603_v47 }
  0x8d   : > { %1381 = vmatmul.mubr.f32.gmra.mrb[2].mxu1 %v5839_v17  ;;  %1854 = vperm.xlu0 %5286, %v5844_v19  }
  0x8e   : > { %4472 = vmatprep.mubr.f32.mxu1 %v8441_v0  ;;  %1962 = vperm.xlu1 %5292, %v5895_v44  }
  0x91   : > { %5293 = vset.pattern.permute.xlu0 %v5605_v48 }
  0x92   : > { %5295 = vrot.lane.b32.xlu1 %v8441_v0, %s5606_s25  ;;  %1966 = vperm.xlu0 %5293, %v5844_v19  }
  0x93   : > { %5299 = vset.pattern.permute.xlu1 %v5607_v49 }
  0x96   : > { %2054 = vperm.xlu1 %5299, %v5895_v44   ;;  %5300 = vset.pattern.permute.xlu0 %v5607_v49 }
  0x97   : > { %2058 = vperm.xlu0 %5300, %v5844_v19  }
  0x9a   : > { %5302 = vrot.lane.b32.xlu1 %v8441_v0, %s5608_s10 }
  0x9b   : > { %5306 = vset.pattern.permute.xlu1 %v5609_v50  ;;  %5307 = vset.pattern.permute.xlu0 %v5609_v50 }
  0x9c   : > { %2150 = vperm.xlu0 %5307, %v5844_v19  }
  0x9e   : > { %2146 = vperm.xlu1 %5306, %v5895_v44  }
  0xa0   : > { %5314 = vset.pattern.permute.xlu0 %v5611_v51 }
  0xa1   : > { %2242 = vperm.xlu0 %5314, %v5844_v19  }
  0xa2   : > { %5309 = vrot.lane.b32.xlu1 %v8441_v0, %s5610_s12 }
  0xa3   : > { %5313 = vset.pattern.permute.xlu1 %v5611_v51 }
  0xa5   : > { %5321 = vset.pattern.permute.xlu0 %v5612_v52 }
  0xa6   : > { %2238 = vperm.xlu1 %5313, %v5895_v44   ;;  %2333 = vperm.xlu0 %5321, %v5844_v19  }
  0xaa   : > { %5316 = vrot.lane.b32.xlu1 %v8441_v0, %s5596_s20  ;;  %5328 = vset.pattern.permute.xlu0 %v5613_v53 }
  0xab   : > { %5320 = vset.pattern.permute.xlu1 %v5612_v52  ;;  %2424 = vperm.xlu0 %5328, %v5844_v19  }
  0xae   : > { %2329 = vperm.xlu1 %5320, %v5895_v44  }
  0xaf   : > { %5335 = vset.pattern.permute.xlu0 %v5614_v54 }
  0xb0   : > { %2515 = vperm.xlu0 %5335, %v5844_v19  }
  0xb2   : > { %5323 = vrot.lane.b32.xlu1 %v8441_v0, %s5600_s17 }
  0xb3   : > { %5327 = vset.pattern.permute.xlu1 %v5613_v53 }
  0xb4   : > { %5342 = vset.pattern.permute.xlu0 %v5615_v55 }
  0xb6   : > { %2420 = vperm.xlu1 %5327, %v5895_v44  }
  0xba   : > { %5330 = vrot.lane.b32.xlu1 %v8441_v0, %s5598_s23 }
  0xbb   : > { %5334 = vset.pattern.permute.xlu1 %v5614_v54 }
  0xbe   : > { %2511 = vperm.xlu1 %5334, %v5895_v44  }
  0xc2   : > { %5337 = vrot.lane.b32.xlu1 %v8441_v0, %s5601_s22 }
  0xc3   : > { %5341 = vset.pattern.permute.xlu1 %v5615_v55 }
  0xc6   : > { %2602 = vperm.xlu1 %5341, %v5895_v44   ;;  %v6008_v56 = vpop.permute.xlu1 %5238  ;;  %v6016_v60 = vpop.permute.xlu0 %5243 }
  0xc7   : > { %8662 = vst [vmem:[#allocation16_spill] sm:$0xff] %v6016_v60 }
  0xca   : > { %5343 = vset.pattern.permute.xlu1 %v5616_v40 }
  0xd7   : > { %v6010_v57 = vpop.permute.xlu1 %1523  ;;  %v345_v62 = vpop.permute.xlu0 %344 }
  0xd8   : > { %8660 = vst [vmem:[#allocation14_spill] sm:$0xff] %v6010_v57 }
  0xdb   : > { %v6064_v26 = vpop.permute.xlu0 %349 }
  0xdc   : > { %v6012_v58 = vpop.permute.xlu1 %1615 }
  0xdd   : > { %8661 = vst [vmem:[#allocation15_spill] sm:$0xff] %v6012_v58 }
  0xdf   : > { %v6078_v29 = vpop.permute.xlu0 %1518 }
  0xe0   : > { %v6014_v59 = vpop.permute.xlu1 %5262 }
  0xe3   : > { %v6086_v31 = vpop.permute.xlu0 %5249 }
  0xe4   : > { %v6018_v61 = vpop.permute.xlu1 %5267 }
  0xe5   : > { %8663 = vst [vmem:[#allocation17_spill] sm:$0xff] %v6018_v61 }
  0xe7   : > { %v6098_v33 = vpop.permute.xlu0 %5254 }
  0xe8   : > { %8671 = vst [vmem:[#allocation25_spill] sm:$0xff] %v6098_v33 }
  0xf3   : > { %v6020_v7 = vpop.permute.xlu1 %1703 }
  0xf4   : > { %v6106_v35 = vpop.permute.xlu0 %1611 }
  0xf7   : > { %v6038_v18 = vpop.permute.xlu1 %5274 }
  0xfe   : > { %v6118_v37 = vpop.permute.xlu0 %1707 }
  0xff   : > { %8674 = vst [vmem:[#allocation28_spill] sm:$0xff] %v6118_v37 }
 0x100   : > { %v6050_v21 = vpop.permute.xlu1 %1799 }
 0x101   : > { %8666 = vst [vmem:[#allocation20_spill] sm:$0xff] %v6050_v21 }
 0x102   : > { %v6126_v39 = vpop.permute.xlu0 %5279 }
 0x103   : > { %8676 = vst [vmem:[#allocation30_spill] sm:$0xff] %v6126_v39 }
 0x105   : > { %v6056_v23 = vpop.permute.xlu1 %1850 }
 0x106   : > { %v6138_v42 = vpop.permute.xlu0 %1795 }
 0x109   : > { %v6062_v25 = vpop.permute.xlu1 %5288 }
 0x10a   : > { %8667 = vst [vmem:[#allocation21_spill] sm:$0xff] %v6062_v25 }
 0x10c   : > { %v6146_v45 = vpop.permute.xlu0 %1854 }
 0x10d   : > { %v6076_v28 = vpop.permute.xlu1 %1962 }
 0x10e   : > { %8669 = vst [vmem:[#allocation23_spill] sm:$0xff] %v6076_v28  ;;  %v8759_v28 = vunpack.i.h.bf16 %v6086_v31 }
 0x111   : > { %v6084_v30 = vpop.permute.xlu1 %5295  ;;  %v6158_v47 = vpop.permute.xlu0 %1966 }
 0x112   : > { %8680 = vst [vmem:[#allocation34_spill] sm:$0xff] %v6158_v47 }
 0x115   : > { %v6096_v32 = vpop.permute.xlu1 %2054 }
 0x116   : > { %8670 = vst [vmem:[#allocation24_spill] sm:$0xff] %v6096_v32  ;;  %v6170_v52 = vpop.permute.xlu0 %2058  ;;  %v5619_v32 = vmov 16  }
 0x117   : > { %8682 = vst [vmem:[#allocation36_spill] sm:$0xff] %v6170_v52 }
 0x119   : > { %v6104_v34 = vpop.permute.xlu1 %5302 }
 0x11a   : > { %8672 = vst [vmem:[#allocation26_spill] sm:$0xff] %v6104_v34 }
 0x11d   : > { %v6116_v36 = vpop.permute.xlu1 %2146 }
 0x11e   : > { %8673 = vst [vmem:[#allocation27_spill] sm:$0xff] %v6116_v36 }
 0x121   : > { %v6124_v38 = vpop.permute.xlu1 %5309 }
 0x122   : > { %8675 = vst [vmem:[#allocation29_spill] sm:$0xff] %v6124_v38 }
 0x125   : > { %v6136_v41 = vpop.permute.xlu1 %2238 }
 0x126   : > { %8677 = vst [vmem:[#allocation31_spill] sm:$0xff] %v6136_v41 }
 0x129   : > { %v6144_v43 = vpop.permute.xlu1 %5316 }
 0x12a   : > { %8678 = vst [vmem:[#allocation32_spill] sm:$0xff] %v6144_v43 }
 0x12d   : > { %v6156_v46 = vpop.permute.xlu1 %2329 }
 0x12e   : > { %8679 = vst [vmem:[#allocation33_spill] sm:$0xff] %v6156_v46 }
 0x131   : > { %v6168_v51 = vpop.permute.xlu1 %5323 }
 0x132   : > { %8681 = vst [vmem:[#allocation35_spill] sm:$0xff] %v6168_v51 }
 0x15a   : > { %v861_v63 = vpop.f32.mrb[0].mxu0 }
 0x15b   : > { %v5065_v3 = vadd.f32 %v861_v63, %v345_v62  ;;  %v863_v5 = vpop.f32.mrb[1].mxu0  ;;  %v6186_v63 = vpop.permute.xlu0 %2150 }
 0x15c   : > { %v1375_v2 = vpop.f32.mrb[0].mxu1  ;;  %v5066_v13 = vadd.f32 %v863_v5, %v345_v62  ;;  %8684 = vst [vmem:[#allocation38_spill] sm:$0xff] %v6186_v63 }
 0x15d   : > { %v5069_v4 = vadd.f32 %v1375_v2, %v345_v62  ;;  %v1377_v6 = vpop.f32.mrb[1].mxu1  ;;  %v1387_v8 = vmax.f32 %v5065_v3, 0.0 }
 0x15e   : > { %v6022_v9 = vpop.f32.mrb[2].mxu0  ;;  %v1388_v17 = vmax.f32 %v5066_v13, 0.0  ;;  %v5070_v22 = vadd.f32 %v1377_v6, %v345_v62  ;;  %v6184_v62 = vpop.permute.xlu1 %2420 }
 0x15f   : > { %v6026_v11 = vmin.f32 %v1387_v8, 6.0  ;;  %v1389_v12 = vmax.f32 %v5069_v4, 0.0  ;;  %v6028_v14 = vpop.f32.mrb[3].mxu0  ;;  %v5067_v48 = vadd.f32 %v6022_v9, %v6064_v26  ;;  %8683 = vst [vmem:[#allocation37_spill] sm:$0xff] %v6184_v62  ;;  %v6198_v6 = vpop.permute.xlu0 %2242 }
 0x160   : > { %v6024_v10 = vpop.f32.mrb[2].mxu1  ;;  %v6044_v20 = vmin.f32 %v1388_v17, 6.0  ;;  %v1390_v24 = vmax.f32 %v5070_v22, 0.0  ;;  %v5068_v55 = vadd.f32 %v6028_v14, %v6064_v26  ;;  %8688 = vst [vmem:[#allocation42_spill] sm:$0xff] %v6198_v6 }
 0x161   : > { %v6030_v15 = vpop.f32.mrb[3].mxu1  ;;  %1661 = vrot.lane.b32.xlu0 %v6026_v11, %s5598_s23  ;;  %1475 = vrot.lane.b32.xlu1 %v6026_v11, %s5596_s20  ;;  %v6036_v16 = vmin.f32 %v1389_v12, 6.0  ;;  %v1391_v49 = vmax.f32 %v5067_v48, 0.0  ;;  %v5071_v50 = vadd.f32 %v6024_v10, %v6064_v26 }
 0x162   : > { %8665 = vst [vmem:[#allocation19_spill] sm:$0xff] %v6044_v20  ;;  %v6070_v27 = vmin.f32 %v1390_v24, 6.0  ;;  %v1392_v3 = vmax.f32 %v5068_v55, 0.0  ;;  %v6196_v5 = vpop.permute.xlu1 %5330  ;;  %v5072_v10 = vadd.f32 %v6030_v15, %v6064_v26 }
 0x163   : > { %8664 = vst [vmem:[#allocation18_spill] sm:$0xff] %v6036_v16  ;;  %v6176_v53 = vmin.f32 %v1391_v49, 6.0  ;;  %v1393_v54 = vmax.f32 %v5071_v50, 0.0  ;;  %8687 = vst [vmem:[#allocation41_spill] sm:$0xff] %v6196_v5  ;;  %v6210_v9 = vpop.permute.xlu0 %2333 }
 0x164   : > { %8668 = vst [vmem:[#allocation22_spill] sm:$0xff] %v6070_v27  ;;  %v6194_v4 = vmin.f32 %v1392_v3, 6.0  ;;  %8690 = vst [vmem:[#allocation44_spill] sm:$0xff] %v6210_v9  ;;  %v1394_v12 = vmax.f32 %v5072_v10, 0.0 }
 0x165   : > { %1665 = vrot.lane.b32.xlu0 %v6036_v16, %s5598_s23  ;;  %1479 = vrot.lane.b32.xlu1 %v6036_v16, %s5596_s20  ;;  %v6188_v2 = vmin.f32 %v1393_v54, 6.0 }
 0x166   : > { %8686 = vst [vmem:[#allocation40_spill] sm:$0xff] %v6194_v4  ;;  %v6208_v8 = vpop.permute.xlu1 %2511  ;;  %v6226_v17 = vmin.f32 %v1394_v12, 6.0 }
 0x167   : > { %8685 = vst [vmem:[#allocation39_spill] sm:$0xff] %v6188_v2  ;;  %8689 = vst [vmem:[#allocation43_spill] sm:$0xff] %v6208_v8  ;;  %v6220_v14 = vpop.permute.xlu0 %2424 }
 0x168   : > { %8692 = vst [vmem:[#allocation46_spill] sm:$0xff] %v6220_v14  ;;  %8693 = vst [vmem:[#allocation47_spill] sm:$0xff] %v6226_v17 }
 0x169   : > { %1477 = vrot.lane.b32.xlu0 %v6044_v20, %s5596_s20  ;;  %1569 = vrot.lane.b32.xlu1 %v6026_v11, %s5600_s17 }
 0x16a   : > { %v6218_v13 = vpop.permute.xlu1 %5337 }
 0x16b   : > { %8691 = vst [vmem:[#allocation45_spill] sm:$0xff] %v6218_v13  ;;  %v6234_v22 = vpop.permute.xlu0 %2515 }
 0x16c   : > { %8695 = vst [vmem:[#allocation49_spill] sm:$0xff] %v6234_v22 }
 0x16d   : > { %1571 = vrot.lane.b32.xlu0 %v6044_v20, %s5600_s17  ;;  %1573 = vrot.lane.b32.xlu1 %v6036_v16, %s5600_s17 }
 0x16e   : > { %v6232_v15 = vpop.permute.xlu1 %2602 }
 0x16f   : > { %8694 = vst [vmem:[#allocation48_spill] sm:$0xff] %v6232_v15 }
 0x171   : > { %1755 = vrot.lane.b32.xlu0 %v6044_v20, %s5601_s22  ;;  %1753 = vrot.lane.b32.xlu1 %v6026_v11, %s5601_s22 }
 0x175   : > { %1920 = vrot.lane.b32.xlu0 %v6044_v20, %s5604_s24  ;;  %1757 = vrot.lane.b32.xlu1 %v6036_v16, %s5601_s22 }
 0x179   : > { %1924 = vrot.lane.b32.xlu0 %v6070_v27, %s5604_s24  ;;  %1918 = vrot.lane.b32.xlu1 %v6026_v11, %s5604_s24 }
 0x17d   : > { %2012 = vrot.lane.b32.xlu0 %v6044_v20, %s5606_s25  ;;  %1922 = vrot.lane.b32.xlu1 %v6036_v16, %s5604_s24 }
 0x181   : > { %2016 = vrot.lane.b32.xlu0 %v6070_v27, %s5606_s25  ;;  %2010 = vrot.lane.b32.xlu1 %v6026_v11, %s5606_s25 }
 0x185   : > { %2104 = vrot.lane.b32.xlu0 %v6044_v20, %s5608_s10  ;;  %2014 = vrot.lane.b32.xlu1 %v6036_v16, %s5606_s25 }
 0x189   : > { %2108 = vrot.lane.b32.xlu0 %v6070_v27, %s5608_s10  ;;  %2102 = vrot.lane.b32.xlu1 %v6026_v11, %s5608_s10 }
 0x18d   : > { %2196 = vrot.lane.b32.xlu0 %v6044_v20, %s5610_s12  ;;  %2106 = vrot.lane.b32.xlu1 %v6036_v16, %s5608_s10 }
 0x191   : > { %2200 = vrot.lane.b32.xlu0 %v6070_v27, %s5610_s12  ;;  %2194 = vrot.lane.b32.xlu1 %v6026_v11, %s5610_s12 }
 0x195   : > { %2288 = vrot.lane.b32.xlu0 %v6044_v20, %s5596_s20  ;;  %2198 = vrot.lane.b32.xlu1 %v6036_v16, %s5610_s12 }
 0x199   : > { %2292 = vrot.lane.b32.xlu0 %v6070_v27, %s5596_s20  ;;  %2286 = vrot.lane.b32.xlu1 %v6026_v11, %s5596_s20 }
 0x19d   : > { %2379 = vrot.lane.b32.xlu0 %v6044_v20, %s5600_s17  ;;  %2290 = vrot.lane.b32.xlu1 %v6036_v16, %s5596_s20 }
 0x1a1   : > { %2383 = vrot.lane.b32.xlu0 %v6070_v27, %s5600_s17  ;;  %2377 = vrot.lane.b32.xlu1 %v6026_v11, %s5600_s17 }
 0x1a5   : > { %2470 = vrot.lane.b32.xlu0 %v6044_v20, %s5598_s23  ;;  %2381 = vrot.lane.b32.xlu1 %v6036_v16, %s5600_s17 }
 0x1a9   : > { %2474 = vrot.lane.b32.xlu0 %v6070_v27, %s5598_s23  ;;  %2468 = vrot.lane.b32.xlu1 %v6026_v11, %s5598_s23 }
 0x1ad   : > { %2561 = vrot.lane.b32.xlu0 %v6044_v20, %s5601_s22  ;;  %2472 = vrot.lane.b32.xlu1 %v6036_v16, %s5598_s23 }
 0x1b1   : > { %2565 = vrot.lane.b32.xlu0 %v6070_v27, %s5601_s22  ;;  %2559 = vrot.lane.b32.xlu1 %v6026_v11, %s5601_s22 }
 0x1b5   : > { %1671 = vrot.lane.b32.xlu0 %v6176_v53, %s5598_s23  ;;  %2563 = vrot.lane.b32.xlu1 %v6036_v16, %s5601_s22 }
 0x1b9   : > { %1675 = vrot.lane.b32.xlu0 %v6188_v2, %s5598_s23  ;;  %1663 = vrot.lane.b32.xlu1 %v6044_v20, %s5598_s23 }
 0x1bd   : > { %1487 = vrot.lane.b32.xlu0 %v6194_v4, %s5596_s20  ;;  %1485 = vrot.lane.b32.xlu1 %v6176_v53, %s5596_s20 }
 0x1c1   : > { %1581 = vrot.lane.b32.xlu0 %v6194_v4, %s5600_s17  ;;  %1489 = vrot.lane.b32.xlu1 %v6188_v2, %s5596_s20 }
 0x1c5   : > { %1765 = vrot.lane.b32.xlu0 %v6194_v4, %s5601_s22  ;;  %1579 = vrot.lane.b32.xlu1 %v6176_v53, %s5600_s17 }
 0x1c9   : > { %1930 = vrot.lane.b32.xlu0 %v6194_v4, %s5604_s24  ;;  %1583 = vrot.lane.b32.xlu1 %v6188_v2, %s5600_s17 }
 0x1cd   : > { %1934 = vrot.lane.b32.xlu0 %v6226_v17, %s5604_s24  ;;  %1763 = vrot.lane.b32.xlu1 %v6176_v53, %s5601_s22 }
 0x1d1   : > { %2022 = vrot.lane.b32.xlu0 %v6194_v4, %s5606_s25  ;;  %1767 = vrot.lane.b32.xlu1 %v6188_v2, %s5601_s22 }
 0x1d3   : > { %v6240_v24 = vpop.permute.xlu0 %1661  ;;  %v6242_v26 = vpop.permute.xlu1 %1475 }
 0x1d5   : > { %2026 = vrot.lane.b32.xlu0 %v6226_v17, %s5606_s25  ;;  %1928 = vrot.lane.b32.xlu1 %v6176_v53, %s5604_s24 }
 0x1d7   : > { %v6248_v40 = vpop.permute.xlu0 %1665  ;;  %v6250_v48 = vpop.permute.xlu1 %1479 }
 0x1d8   : > { %8696 = vst [vmem:[#allocation50_spill] sm:$0xff] %v6248_v40  ;;  %8697 = vst [vmem:[#allocation51_spill] sm:$0xff] %v6250_v48  ;;  %v5276_v48 = vunpack.i.l.bf16 %v6038_v18 }
 0x1d9   : > { %2114 = vrot.lane.b32.xlu0 %v6194_v4, %s5608_s10  ;;  %1932 = vrot.lane.b32.xlu1 %v6188_v2, %s5604_s24 }
 0x1db   : > { %v6256_v49 = vpop.permute.xlu0 %1477  ;;  %v6258_v50 = vpop.permute.xlu1 %1569 }
 0x1dd   : > { %2118 = vrot.lane.b32.xlu0 %v6226_v17, %s5608_s10  ;;  %2020 = vrot.lane.b32.xlu1 %v6176_v53, %s5606_s25 }
 0x1df   : > { %v6264_v54 = vpop.permute.xlu0 %1571  ;;  %v6266_v55 = vpop.permute.xlu1 %1573 }
 0x1e1   : > { %2206 = vrot.lane.b32.xlu0 %v6194_v4, %s5610_s12  ;;  %2024 = vrot.lane.b32.xlu1 %v6188_v2, %s5606_s25 }
 0x1e3   : > { %v6272_v3 = vpop.permute.xlu0 %1755  ;;  %v6274_v10 = vpop.permute.xlu1 %1753 }
 0x1e4   : > { %8698 = vst [vmem:[#allocation52_spill] sm:$0xff] %v6272_v3 }
 0x1e5   : > { %2210 = vrot.lane.b32.xlu0 %v6226_v17, %s5610_s12  ;;  %2112 = vrot.lane.b32.xlu1 %v6176_v53, %s5608_s10 }
 0x1e7   : > { %v6280_v12 = vpop.permute.xlu0 %1920  ;;  %v6282_v1 = vpop.permute.xlu1 %1757 }
 0x1e8   : > { %8699 = vst [vmem:[#allocation53_spill] sm:$0xff] %v6280_v12  ;;  %8700 = vst [vmem:[#allocation54_spill] sm:$0xff] %v6282_v1  ;;  %v5264_v12 = vunpack.i.l.bf16 %v6014_v59 }
 0x1e9   : > { %2298 = vrot.lane.b32.xlu0 %v6194_v4, %s5596_s20  ;;  %2116 = vrot.lane.b32.xlu1 %v6188_v2, %s5608_s10 }
 0x1eb   : > { %v6288_v0 = vpop.permute.xlu0 %1924  ;;  %v6290_v22 = vpop.permute.xlu1 %1918 }
 0x1ec   : > { %8701 = vst [vmem:[#allocation55_spill] sm:$0xff] %v6288_v0  ;;  %8702 = vst [vmem:[#allocation56_spill] sm:$0xff] %v6290_v22  ;;  %v8757_v0 = vunpack.i.h.bf16 %v6016_v60 }
 0x1ed   : > { %2302 = vrot.lane.b32.xlu0 %v6226_v17, %s5596_s20  ;;  %2204 = vrot.lane.b32.xlu1 %v6176_v53, %s5610_s12 }
 0x1ef   : > { %v6296_v14 = vpop.permute.xlu0 %2012  ;;  %v6298_v9 = vpop.permute.xlu1 %1922 }
 0x1f0   : > { %8703 = vst [vmem:[#allocation57_spill] sm:$0xff] %v6296_v14  ;;  %8704 = vst [vmem:[#allocation58_spill] sm:$0xff] %v6298_v9  ;;  %v5256_v14 = vunpack.i.l.bf16 %v6098_v33 }
 0x1f1   : > { %2389 = vrot.lane.b32.xlu0 %v6194_v4, %s5600_s17  ;;  %2208 = vrot.lane.b32.xlu1 %v6188_v2, %s5610_s12 }
 0x1f3   : > { %v6304_v6 = vpop.permute.xlu0 %2016  ;;  %v6306_v63 = vpop.permute.xlu1 %2010 }
 0x1f4   : > { %8705 = vst [vmem:[#allocation59_spill] sm:$0xff] %v6304_v6  ;;  %8706 = vst [vmem:[#allocation60_spill] sm:$0xff] %v6306_v63 }
 0x1f5   : > { %2393 = vrot.lane.b32.xlu0 %v6226_v17, %s5600_s17  ;;  %2296 = vrot.lane.b32.xlu1 %v6176_v53, %s5596_s20 }
 0x1f7   : > { %v6312_v52 = vpop.permute.xlu0 %2104  ;;  %v6314_v47 = vpop.permute.xlu1 %2014 }
 0x1f8   : > { %8707 = vst [vmem:[#allocation61_spill] sm:$0xff] %v6312_v52  ;;  %8708 = vst [vmem:[#allocation62_spill] sm:$0xff] %v6314_v47  ;;  %v6489_v52 = vld [vmem:[#allocation6] ss:$8 sm:$0xf] }
 0x1f9   : > { %2480 = vrot.lane.b32.xlu0 %v6194_v4, %s5598_s23  ;;  %2300 = vrot.lane.b32.xlu1 %v6188_v2, %s5596_s20 }
 0x1fb   : > { %v6320_v15 = vpop.permute.xlu0 %2108  ;;  %v6322_v8 = vpop.permute.xlu1 %2102 }
 0x1fc   : > { %8709 = vst [vmem:[#allocation63_spill] sm:$0xff] %v6320_v15  ;;  %8710 = vst [vmem:[#allocation64_spill] sm:$0xff] %v6322_v8  ;;  %v6493_v8 = vld [vmem:[#allocation6 + $0x1] ss:$8 sm:$0xf] }
 0x1fd   : > { %2484 = vrot.lane.b32.xlu0 %v6226_v17, %s5598_s23  ;;  %2387 = vrot.lane.b32.xlu1 %v6176_v53, %s5600_s17 }
 0x1ff   : > { %v6328_v62 = vpop.permute.xlu0 %2196  ;;  %v6330_v13 = vpop.permute.xlu1 %2106 }
 0x200   : > { %8711 = vst [vmem:[#allocation65_spill] sm:$0xff] %v6328_v62  ;;  %8712 = vst [vmem:[#allocation66_spill] sm:$0xff] %v6330_v13 }
 0x201   : > { %2571 = vrot.lane.b32.xlu0 %v6194_v4, %s5601_s22  ;;  %2391 = vrot.lane.b32.xlu1 %v6188_v2, %s5600_s17 }
 0x203   : > { %v6336_v46 = vpop.permute.xlu0 %2200  ;;  %v6338_v41 = vpop.permute.xlu1 %2194 }
 0x204   : > { %8713 = vst [vmem:[#allocation67_spill] sm:$0xff] %v6336_v46  ;;  %8714 = vst [vmem:[#allocation68_spill] sm:$0xff] %v6338_v41  ;;  %v5617_v41 = vmov 14  }
 0x205   : > { %2575 = vrot.lane.b32.xlu0 %v6226_v17, %s5601_s22  ;;  %2478 = vrot.lane.b32.xlu1 %v6176_v53, %s5598_s23 }
 0x207   : > { %v6344_v15 = vpop.permute.xlu0 %2288  ;;  %v6346_v36 = vpop.permute.xlu1 %2198 }
 0x208   : > { %8715 = vst [vmem:[#allocation69_spill] sm:$0xff] %v6344_v15  ;;  %8716 = vst [vmem:[#allocation70_spill] sm:$0xff] %v6346_v36  ;;  %v5618_v36 = vmov 15  }
 0x209   : > { %2606 = vperm.xlu0 %5342, %v5844_v19   ;;  %2482 = vrot.lane.b32.xlu1 %v6188_v2, %s5598_s23 }
 0x20b   : > { %v6351_v62 = vpop.permute.xlu0 %2292  ;;  %v6353_v46 = vpop.permute.xlu1 %2286 }
 0x20c   : > { %8717 = vst [vmem:[#allocation71_spill] sm:$0xff] %v6351_v62  ;;  %8718 = vst [vmem:[#allocation72_spill] sm:$0xff] %v6353_v46 }
 0x20d   : > { %5344 = vset.pattern.permute.xlu0 %v5617_v41  ;;  %2569 = vrot.lane.b32.xlu1 %v6176_v53, %s5601_s22 }
 0x20e   : > { %2768 = vperm.xlu0 %5344, %v5895_v44  }
 0x20f   : > { %v6358_v13 = vpop.permute.xlu0 %2379  ;;  %v6360_v15 = vpop.permute.xlu1 %2290 }
 0x210   : > { %8719 = vst [vmem:[#allocation73_spill] sm:$0xff] %v6358_v13  ;;  %8720 = vst [vmem:[#allocation74_spill] sm:$0xff] %v6360_v15 }
 0x211   : > { %2573 = vrot.lane.b32.xlu1 %v6188_v2, %s5601_s22 }
 0x212   : > { %5347 = vset.pattern.permute.xlu0 %v5618_v36 }
 0x213   : > { %2863 = vperm.xlu0 %5347, %v5844_v19   ;;  %v6365_v62 = vpop.permute.xlu0 %2383  ;;  %v6367_v46 = vpop.permute.xlu1 %2377 }
 0x214   : > { %8721 = vst [vmem:[#allocation75_spill] sm:$0xff] %v6365_v62  ;;  %8722 = vst [vmem:[#allocation76_spill] sm:$0xff] %v6367_v46 }
 0x215   : > { %1673 = vrot.lane.b32.xlu1 %v6194_v4, %s5598_s23 }
 0x217   : > { %2729 = vrot.lane.b32.xlu0 %v6070_v27, %s5604_s24  ;;  %v6373_v13 = vpop.permute.xlu0 %2470  ;;  %v6375_v15 = vpop.permute.xlu1 %2381 }
 0x218   : > { %8723 = vst [vmem:[#allocation77_spill] sm:$0xff] %v6373_v13  ;;  %8724 = vst [vmem:[#allocation78_spill] sm:$0xff] %v6375_v15  ;;  %5354 = vset.pattern.permute.xlu0 %v5619_v32 }
 0x219   : > { %2657 = vperm.xlu1 %5343, %v5895_v44  }
 0x21b   : > { %2735 = vrot.lane.b32.xlu0 %v6194_v4, %s5604_s24  ;;  %v6380_v62 = vpop.permute.xlu0 %2474  ;;  %v6382_v46 = vpop.permute.xlu1 %2468 }
 0x21c   : > { %8725 = vst [vmem:[#allocation79_spill] sm:$0xff] %v6380_v62  ;;  %8726 = vst [vmem:[#allocation80_spill] sm:$0xff] %v6382_v46 }
 0x21d   : > { %2661 = vperm.xlu1 %5343, %v5844_v19  }
 0x21f   : > { %2739 = vrot.lane.b32.xlu0 %v6226_v17, %s5604_s24  ;;  %v6387_v6 = vpop.permute.xlu0 %2561  ;;  %v6389_v13 = vpop.permute.xlu1 %2472 }
 0x220   : > { %8727 = vst [vmem:[#allocation81_spill] sm:$0xff] %v6387_v6  ;;  %8728 = vst [vmem:[#allocation82_spill] sm:$0xff] %v6389_v13  ;;  %v5620_v13 = vmov 17   ;;  %v8739_v6 = vmov 0.0  }
 0x221   : > { %5345 = vset.pattern.permute.xlu1 %v5617_v41 }
 0x222   : > { %2772 = vperm.xlu1 %5345, %v5844_v19  }
 0x223   : > { %2954 = vperm.xlu0 %5354, %v5844_v19   ;;  %v6393_v15 = vpop.permute.xlu0 %2565  ;;  %v6395_v47 = vpop.permute.xlu1 %2559 }
 0x224   : > { %8729 = vst [vmem:[#allocation83_spill] sm:$0xff] %v6393_v15  ;;  %8730 = vst [vmem:[#allocation84_spill] sm:$0xff] %v6395_v47 }
 0x226   : > { %5346 = vset.pattern.permute.xlu1 %v5618_v36 }
 0x227   : > { %2816 = vrot.lane.b32.xlu0 %v6044_v20, %s5606_s25  ;;  %v6399_v62 = vpop.permute.xlu0 %1671  ;;  %v6401_v46 = vpop.permute.xlu1 %2563  ;;  %2859 = vperm.xlu1 %5346, %v5895_v44  }
 0x228   : > { %8731 = vst [vmem:[#allocation85_spill] sm:$0xff] %v6399_v62  ;;  %8732 = vst [vmem:[#allocation86_spill] sm:$0xff] %v6401_v46  ;;  %5361 = vset.pattern.permute.xlu0 %v5620_v13 }
 0x22b   : > { %2820 = vrot.lane.b32.xlu0 %v6070_v27, %s5606_s25  ;;  %v6406_v41 = vpop.permute.xlu0 %1675  ;;  %v6408_v15 = vpop.permute.xlu1 %1663  ;;  %2725 = vrot.lane.b32.xlu1 %v6044_v20, %s5604_s24 }
 0x22c   : > { %8733 = vst [vmem:[#allocation87_spill] sm:$0xff] %v6406_v41  ;;  %8734 = vst [vmem:[#allocation88_spill] sm:$0xff] %v6408_v15  ;;  %5353 = vset.pattern.permute.xlu1 %v5619_v32 }
 0x22f   : > { %2826 = vrot.lane.b32.xlu0 %v6194_v4, %s5606_s25  ;;  %v6414_v36 = vpop.permute.xlu0 %1487  ;;  %v6416_v46 = vpop.permute.xlu1 %1485  ;;  %2727 = vrot.lane.b32.xlu1 %v6036_v16, %s5604_s24 }
 0x230   : > { %8735 = vst [vmem:[#allocation89_spill] sm:$0xff] %v6414_v36  ;;  %8736 = vst [vmem:[#allocation90_spill] sm:$0xff] %v6416_v46 }
 0x233   : > { %2830 = vrot.lane.b32.xlu0 %v6226_v17, %s5606_s25  ;;  %v6422_v41 = vpop.permute.xlu0 %1581  ;;  %v6424_v62 = vpop.permute.xlu1 %1489  ;;  %5349 = vrot.lane.b32.xlu1 %v8739_v6, %s5604_s24 }
 0x234   : > { %8737 = vst [vmem:[#allocation91_spill] sm:$0xff] %v6422_v41  ;;  %8738 = vst [vmem:[#allocation92_spill] sm:$0xff] %v6424_v62  ;;  %v5621_v62 = vmov 18  }
 0x237   : > { %3045 = vperm.xlu0 %5361, %v5844_v19   ;;  %v6429_v32 = vpop.permute.xlu0 %1765  ;;  %v6431_v36 = vpop.permute.xlu1 %1579  ;;  %2737 = vrot.lane.b32.xlu1 %v6188_v2, %s5604_s24 }
 0x238   : > { %8740 = vst [vmem:[#allocation93_spill] sm:$0xff] %v6429_v32  ;;  %8741 = vst [vmem:[#allocation94_spill] sm:$0xff] %v6431_v36 }
 0x23b   : > { %2907 = vrot.lane.b32.xlu0 %v6044_v20, %s5608_s10  ;;  %v6437_v46 = vpop.permute.xlu0 %1930  ;;  %v6439_v41 = vpop.permute.xlu1 %1583  ;;  %2950 = vperm.xlu1 %5353, %v5895_v44  }
 0x23c   : > { %8742 = vst [vmem:[#allocation95_spill] sm:$0xff] %v6437_v46  ;;  %8743 = vst [vmem:[#allocation96_spill] sm:$0xff] %v6439_v41  ;;  %5368 = vset.pattern.permute.xlu0 %v5621_v62 }
 0x23f   : > { %2911 = vrot.lane.b32.xlu0 %v6070_v27, %s5608_s10  ;;  %v6444_v32 = vpop.permute.xlu0 %1934  ;;  %v6446_v36 = vpop.permute.xlu1 %1763  ;;  %2723 = vrot.lane.b32.xlu1 %v6026_v11, %s5604_s24 }
 0x240   : > { %8744 = vst [vmem:[#allocation97_spill] sm:$0xff] %v6444_v32  ;;  %8745 = vst [vmem:[#allocation98_spill] sm:$0xff] %v6446_v36  ;;  %5360 = vset.pattern.permute.xlu1 %v5620_v13  ;;  %v1441_v13 = vlaneseq }
 0x243   : > { %2917 = vrot.lane.b32.xlu0 %v6194_v4, %s5608_s10  ;;  %v6452_v46 = vpop.permute.xlu0 %2022  ;;  %v6454_v41 = vpop.permute.xlu1 %1767  ;;  %2733 = vrot.lane.b32.xlu1 %v6176_v53, %s5604_s24 }
 0x244   : > { %8746 = vst [vmem:[#allocation99_spill] sm:$0xff] %v6452_v46  ;;  %8747 = vst [vmem:[#allocation100_spill] sm:$0xff] %v6454_v41  ;;  %v6473_v41 = vshrl.u32 %v1441_v13, 7 }
 0x247   : > { %2921 = vrot.lane.b32.xlu0 %v6226_v17, %s5608_s10  ;;  %v6460_v32 = vpop.permute.xlu0 %2026  ;;  %v6462_v36 = vpop.permute.xlu1 %1928  ;;  %2818 = vrot.lane.b32.xlu1 %v6036_v16, %s5606_s25 }
 0x248   : > { %8748 = vst [vmem:[#allocation101_spill] sm:$0xff] %v6460_v32  ;;  %8749 = vst [vmem:[#allocation102_spill] sm:$0xff] %v6462_v36 }
 0x24b   : > { %3136 = vperm.xlu0 %5368, %v5844_v19   ;;  %v6467_v47 = vpop.permute.xlu0 %2114  ;;  %v6469_v46 = vpop.permute.xlu1 %1932  ;;  %5356 = vrot.lane.b32.xlu1 %v8739_v6, %s5606_s25  ;;  %v8490_v19 = vmov 19  }
 0x24c   : > { %8750 = vst [vmem:[#allocation103_spill] sm:$0xff] %v6467_v47  ;;  %8751 = vst [vmem:[#allocation104_spill] sm:$0xff] %v6469_v46  ;;  %v6485_v47 = vsub.s32 0, %v6473_v41  ;;  %v5245_v46 = vunpack.i.l.bf16 %v6016_v60 }
 0x24e   : > { %8754 = vst [vmem:[#allocation107_spill] sm:$0xff] %v6485_v47  ;;  %v1496_v63 = vsel %vm1491_vm1, %v5245_v46, %v8757_v0  ;;  %v1548_v40 = vrot.slane %v6493_v8, %v6485_v47  ;;  %v8761_v46 = vunpack.i.h.bf16 %v6098_v33 }
 0x24f   : > { %2998 = vrot.lane.b32.xlu0 %v6044_v20, %s5610_s12  ;;  %v6477_v32 = vpop.permute.xlu0 %2118  ;;  %v6479_v36 = vpop.permute.xlu1 %2020  ;;  %2828 = vrot.lane.b32.xlu1 %v6188_v2, %s5606_s25 }
 0x250   : > { %8752 = vst [vmem:[#allocation105_spill] sm:$0xff] %v6477_v32  ;;  %8753 = vst [vmem:[#allocation106_spill] sm:$0xff] %v6479_v36  ;;  %5375 = vset.pattern.permute.xlu0 %v8490_v19  ;;  %v5240_v36 = vunpack.i.l.bf16 %v6008_v56  ;;  %v5251_v19 = vunpack.i.l.bf16 %v6086_v31  ;;  %v1444_v32 = vrot.slane %v6489_v52, %v6485_v47  ;;  %v1590_v60 = vsel %vm1585_vm2, %v5256_v14, %v8761_v46 }
 0x251   : > { %v1606_v33 = vmul.f32 %v1590_v60, %v1548_v40  ;;  %v8763_v14 = vunpack.i.h.bf16 %v6014_v59 }
 0x252   : > { %v1586_v15 = vsel %vm1585_vm2, %v5251_v19, %v8759_v28  ;;  %v1512_v19 = vmul.f32 %v1496_v63, %v1444_v32  ;;  %v8765_v63 = vunpack.i.h.bf16 %v6018_v61 }
 0x253   : > { %3002 = vrot.lane.b32.xlu0 %v6070_v27, %s5610_s12  ;;  %v6499_v9 = vpop.permute.xlu0 %2206  ;;  %v6501_v13 = vpop.permute.xlu1 %2024  ;;  %3041 = vperm.xlu1 %5360, %v5895_v44   ;;  %v6519_v44 = vld [vmem:[#allocation6 + $0x2] ss:$8 sm:$0xf]  ;;  %v1602_v22 = vmul.f32 %v1586_v15, %v1548_v40  ;;  %v1678_v46 = vsel %vm1677_vm3, %v5264_v12, %v8763_v14  ;;  %v5281_v40 = vunpack.i.l.bf16 %v6126_v39 }
 0x254   : > { %8755 = vst [vmem:[#allocation108_spill] sm:$0xff] %v6499_v9  ;;  %8756 = vst [vmem:[#allocation109_spill] sm:$0xff] %v6501_v13  ;;  %v8758_v9 = vunpack.i.h.bf16 %v6008_v56 }
 0x255   : > { %v1618_v14 = vmul.f32 %v6106_v35, %v1602_v22 }
 0x256   : > { %v1492_v13 = vsel %vm1491_vm1, %v5240_v36, %v8758_v9  ;;  %v5269_v36 = vunpack.i.l.bf16 %v6018_v61  ;;  %v6541_v9 = vld [vmem:[#allocation6 + $0x3] ss:$8 sm:$0xf]  ;;  %v1819_v61 = vld [vmem:[#allocation6 + $0x4] ss:$8 sm:$0xf] }
 0x257   : > { %3008 = vrot.lane.b32.xlu0 %v6194_v4, %s5610_s12  ;;  %v6525_v0 = vpop.permute.xlu0 %2210  ;;  %2814 = vrot.lane.b32.xlu1 %v6026_v11, %s5606_s25  ;;  %v6534_v28 = vpop.permute.xlu1 %2112  ;;  %v1508_v1 = vmul.f32 %v1492_v13, %v1444_v32  ;;  %v1732_v3 = vrot.slane %v6541_v9, %v6485_v47 }
 0x258   : > { %8760 = vst [vmem:[#allocation110_spill] sm:$0xff] %v6525_v0  ;;  %8762 = vst [vmem:[#allocation111_spill] sm:$0xff] %v6534_v28  ;;  %5367 = vset.pattern.permute.xlu1 %v5621_v62  ;;  %v1640_v0 = vrot.slane %v6519_v44, %v6485_v47  ;;  %v1682_v15 = vsel %vm1677_vm3, %v5269_v36, %v8765_v63  ;;  %v1530_v36 = vmul.f32 %v6010_v57, %v1512_v19 }
 0x259   : > { %v1526_v32 = vmul.f32 %v6078_v29, %v1508_v1  ;;  %v1622_v63 = vmul.f32 %v6012_v58, %v1606_v33  ;;  %v8768_v1 = vunpack.i.h.bf16 %v6126_v39 }
 0x25a   : > { %v1694_v13 = vmul.f32 %v1678_v46, %v1640_v0  ;;  %v1698_v60 = vmul.f32 %v1682_v15, %v1640_v0 }
 0x25b   : > { %3012 = vrot.lane.b32.xlu0 %v6226_v17, %s5610_s12  ;;  %v6547_v62 = vpop.permute.xlu0 %2298  ;;  %2824 = vrot.lane.b32.xlu1 %v6176_v53, %s5606_s25  ;;  %v6556_v12 = vpop.permute.xlu1 %2116  ;;  %v1774_v22 = vsel %vm1769_vm4, %v5281_v40, %v8768_v1  ;;  %v1626_v0 = vadd.f32 %v1618_v14, %v1526_v32  ;;  %v1630_v15 = vadd.f32 %v1622_v63, %v1530_v36  ;;  %v8511_v1 = vmov 20  }
 0x25c   : > { %8764 = vst [vmem:[#allocation112_spill] sm:$0xff] %v6547_v62  ;;  %8766 = vst [vmem:[#allocation113_spill] sm:$0xff] %v6556_v12  ;;  %v8767_v62 = vunpack.i.h.bf16 %v6038_v18  ;;  %v6567_v12 = vld [vmem:[#allocation3 + $0x8] sm:$0xff]  ;;  %v1710_v46 = vmul.f32 %v6020_v7, %v1694_v13  ;;  %v1714_v57 = vmul.f32 %v6118_v37, %v1698_v60  ;;  %v1790_v58 = vmul.f32 %v1774_v22, %v1732_v3 }
 0x25d   : > { %v6595_v60 = vsub.s32 3, %v6473_v41  ;;  %v6602_v22 = vsub.s32 2, %v6473_v41 }
 0x25e   : > { %v1770_v28 = vsel %vm1769_vm4, %v5276_v48, %v8767_v62  ;;  %v1824_v62 = vrot.slane %v1819_v61, %v6485_v47  ;;  %v1718_v32 = vadd.f32 %v1710_v46, %v1626_v0  ;;  %v1722_v14 = vadd.f32 %v1714_v57, %v1630_v15  ;;  %v2626_v46 = vld [vmem:[#allocation6 + $0x25] ss:$8 sm:$0xf] }
 0x25f   : > { %3227 = vperm.xlu0 %5375, %v6567_v12   ;;  %2909 = vrot.lane.b32.xlu1 %v6036_v16, %s5608_s10  ;;  %v6575_v19 = vpop.permute.xlu1 %2204  ;;  %v6577_v33 = vpop.permute.xlu0 %2302  ;;  %v1786_v48 = vmul.f32 %v1770_v28, %v1732_v3  ;;  %v1806_v36 = vmul.f32 %v6050_v21, %v1790_v58  ;;  %v6592_v3 = vsub.s32 1, %v6473_v41  ;;  %8773 = vst [vmem:[#allocation118_spill] sm:$0xff] %v6595_v60  ;;  %8775 = vst [vmem:[#allocation120_spill] sm:$0xff] %v6602_v22 }
 0x260   : > { %8769 = vst [vmem:[#allocation114_spill] sm:$0xff] %v6575_v19  ;;  %8770 = vst [vmem:[#allocation115_spill] sm:$0xff] %v6577_v33  ;;  %v1841_v13 = vmul.f32 0.0, %v1824_v62  ;;  %v1832_v41 = vrot.slane %v1819_v61, %v6602_v22  ;;  %v6615_v33 = vld [vmem:[#allocation3] sm:$0xff]  ;;  %v6687_v43 = vrot.slane %v6493_v8, %v6595_v60 }
 0x261   : > { %v1802_v28 = vmul.f32 %v6138_v42, %v1786_v48  ;;  %8772 = vst [vmem:[#allocation117_spill] sm:$0xff] %v6592_v3  ;;  %v1814_v48 = vadd.f32 %v1806_v36, %v1722_v14  ;;  %v1828_v15 = vrot.slane %v1819_v61, %v6592_v3  ;;  %v2631_v14 = vrot.slane %v2626_v46, %v6485_v47 }
 0x262   : > { %v1857_v0 = vmul.f32 %v6056_v23, %v1841_v13  ;;  %v1861_v62 = vmul.f32 %v6146_v45, %v1841_v13  ;;  %v2635_v13 = vrot.slane %v2626_v46, %v6592_v3  ;;  %v6657_v36 = vrot.slane %v6489_v52, %v6602_v22  ;;  %8790 = vst [vmem:[#allocation134_spill] sm:$0xff] %v6687_v43 }
 0x263   : > { %3089 = vrot.lane.b32.xlu0 %v6044_v20, %s5596_s20  ;;  %5363 = vrot.lane.b32.xlu1 %v8739_v6, %s5608_s10  ;;  %v6586_v40 = vpop.permute.xlu1 %2208  ;;  %v6597_v63 = vpop.permute.xlu0 %2389  ;;  %v1810_v58 = vadd.f32 %v1802_v28, %v1718_v32  ;;  %v1846_v39 = vmul.f32 %v1828_v15, %v6176_v53 }
 0x264   : > { %8771 = vst [vmem:[#allocation116_spill] sm:$0xff] %v6586_v40  ;;  %5382 = vset.pattern.permute.xlu0 %v8511_v1  ;;  %8774 = vst [vmem:[#allocation119_spill] sm:$0xff] %v6597_v63  ;;  %v1836_v1 = vrot.slane %v1819_v61, %v6595_v60  ;;  %v2643_v61 = vrot.slane %v2626_v46, %v6595_v60  ;;  %v1842_v40 = vmul.f32 %v1828_v15, %v6026_v11 }
 0x265   : > { %v6625_v63 = vadd.f32 %v1857_v0, %v1810_v58  ;;  %v6632_v21 = vadd.f32 %v1861_v62, %v1814_v48  ;;  %v6646_v48 = vrot.slane %v6519_v44, %v6592_v3  ;;  %v6650_v62 = vrot.slane %v6489_v52, %v6592_v3  ;;  %8784 = vst [vmem:[#allocation128_spill] sm:$0xff] %v6657_v36 }
 0x266   : > { %v1844_v19 = vmul.f32 %v1836_v1, %v6036_v16  ;;  %v8783_v0 = vmov 19  }
 0x267   : > { %3093 = vrot.lane.b32.xlu0 %v6070_v27, %s5596_s20  ;;  %2919 = vrot.lane.b32.xlu1 %v6188_v2, %s5608_s10  ;;  %v6606_v57 = vpop.permute.xlu1 %2296  ;;  %v6620_v28 = vpop.permute.xlu0 %2393  ;;  %8779 = vst [vmem:[#allocation124_spill] sm:$0xff] %v6632_v21  ;;  %8780 = vst [vmem:[#allocation125_spill] sm:$0xff] %v6646_v48  ;;  %v6669_v21 = vrot.slane %v6493_v8, %v6602_v22 }
 0x268   : > { %8776 = vst [vmem:[#allocation121_spill] sm:$0xff] %v6606_v57  ;;  %8778 = vst [vmem:[#allocation123_spill] sm:$0xff] %v6620_v28  ;;  %v2639_v57 = vrot.slane %v2626_v46, %v6602_v22  ;;  %v1843_v28 = vmul.f32 %v1832_v41, %v6044_v20  ;;  %v1848_v46 = vmul.f32 %v1836_v1, %v6188_v2 }
 0x269   : > { %8781 = vst [vmem:[#allocation126_spill] sm:$0xff] %v6650_v62  ;;  %v6661_v1 = vrot.slane %v6489_v52, %v6595_v60  ;;  %8786 = vst [vmem:[#allocation130_spill] sm:$0xff] %v6669_v21  ;;  %v6676_v37 = vmul.f32 %v6056_v23, %v1844_v19  ;;  %v6695_v19 = vrot.slane %v6541_v9, %v6602_v22 }
 0x26a   : > { %v6683_v51 = vmul.f32 %v6056_v23, %v1843_v28  ;;  %v6700_v15 = vmul.f32 %v6146_v45, %v1848_v46  ;;  %v1884_v28 = vld [vmem:[#allocation6 + $0x5] ss:$8 sm:$0xf]  ;;  %v6719_v46 = vmul.f32 %v2631_v14, %v6176_v53 }
 0x26b   : > { %3099 = vrot.lane.b32.xlu0 %v6194_v4, %s5596_s20  ;;  %3132 = vperm.xlu1 %5367, %v6615_v33   ;;  %v6618_v32 = vpop.permute.xlu1 %2300  ;;  %8787 = vst [vmem:[#allocation131_spill] sm:$0xff] %v6676_v37  ;;  %v6679_v52 = vpop.permute.xlu0 %2480  ;;  %v6716_v37 = vmul.f32 %v2631_v14, %v6026_v11 }
 0x26c   : > { %8777 = vst [vmem:[#allocation122_spill] sm:$0xff] %v6618_v32  ;;  %v6665_v32 = vrot.slane %v6493_v8, %v6592_v3  ;;  %8788 = vst [vmem:[#allocation132_spill] sm:$0xff] %v6679_v52  ;;  %v6706_v8 = vmul.f32 %v2639_v57, %v6036_v16  ;;  %v6713_v52 = vmul.f32 %v2643_v61, %v6070_v27 }
 0x26d   : > { %8789 = vst [vmem:[#allocation133_spill] sm:$0xff] %v6683_v51  ;;  %8792 = vst [vmem:[#allocation136_spill] sm:$0xff] %v6700_v15  ;;  %v1986_v15 = vld [vmem:[#allocation6 + $0x6] ss:$8 sm:$0xf] }
 0x26e   : > { %8785 = vst [vmem:[#allocation129_spill] sm:$0xff] %v6665_v32  ;;  %8794 = vst [vmem:[#allocation138_spill] sm:$0xff] %v6706_v8  ;;  %v2078_v8 = vld [vmem:[#allocation6 + $0x7] ss:$8 sm:$0xf] }
 0x26f   : > { %3103 = vrot.lane.b32.xlu0 %v6226_v17, %s5596_s20  ;;  %2905 = vrot.lane.b32.xlu1 %v6026_v11, %s5608_s10  ;;  %v6652_v58 = vpop.permute.xlu1 %2387  ;;  %8796 = vst [vmem:[#allocation140_spill] sm:$0xff] %v6713_v52  ;;  %8797 = vst [vmem:[#allocation141_spill] sm:$0xff] %v6716_v37  ;;  %v6732_v52 = vmul.f32 %v2635_v13, %v6194_v4  ;;  %v6735_v37 = vmul.f32 %v2639_v57, %v6188_v2  ;;  %v6760_v14 = vpop.permute.xlu0 %2484 }
 0x270   : > { %8782 = vst [vmem:[#allocation127_spill] sm:$0xff] %v6652_v58  ;;  %5374 = vset.pattern.permute.xlu1 %v8783_v0  ;;  %v1847_v58 = vmul.f32 %v1832_v41, %v6194_v4  ;;  %v6673_v0 = vmul.f32 %v6056_v23, %v1842_v40  ;;  %v6691_v40 = vrot.slane %v6541_v9, %v6592_v3  ;;  %8798 = vst [vmem:[#allocation142_spill] sm:$0xff] %v6719_v46 }
 0x271   : > { %v6703_v23 = vmul.f32 %v2635_v13, %v6044_v20  ;;  %v6710_v41 = vrot.slane %v6541_v9, %v6595_v60  ;;  %8802 = vst [vmem:[#allocation146_spill] sm:$0xff] %v6732_v52  ;;  %8803 = vst [vmem:[#allocation147_spill] sm:$0xff] %v6735_v37  ;;  %v6749_v57 = vrot.slane %v1884_v28, %v6485_v47 }
 0x272   : > { %8791 = vst [vmem:[#allocation135_spill] sm:$0xff] %v6691_v40  ;;  %v6729_v9 = vmul.f32 %v6146_v45, %v1847_v58  ;;  %v6752_v13 = vrot.slane %v1884_v28, %v6592_v3  ;;  %v6758_v58 = vrot.slane %v1884_v28, %v6595_v60  ;;  %8810 = vst [vmem:[#allocation153_spill] sm:$0xff] %v6760_v14 }
 0x273   : > { %3318 = vperm.xlu0 %5382, %v6567_v12   ;;  %2915 = vrot.lane.b32.xlu1 %v6176_v53, %s5608_s10  ;;  %8793 = vst [vmem:[#allocation137_spill] sm:$0xff] %v6703_v23  ;;  %8795 = vst [vmem:[#allocation139_spill] sm:$0xff] %v6710_v41  ;;  %v6722_v23 = vmul.f32 %v6146_v45, %v1846_v39  ;;  %v6724_v51 = vpop.permute.xlu1 %2391  ;;  %v8804_v39 = vunpack.i.h.bf16 %v6086_v31  ;;  %v6746_v45 = vmul.f32 %v2643_v61, %v6226_v17 }
 0x274   : > { %8800 = vst [vmem:[#allocation144_spill] sm:$0xff] %v6724_v51  ;;  %8801 = vst [vmem:[#allocation145_spill] sm:$0xff] %v6729_v9  ;;  %v8529_v51 = vmov 21   ;;  %v6755_v31 = vrot.slane %v1884_v28, %v6602_v22  ;;  %v6770_v37 = vrot.slane %v1986_v15, %v6592_v3  ;;  %v6773_v52 = vrot.slane %v1986_v15, %v6602_v22  ;;  %v2262_v28 = vld [vmem:[#allocation6 + $0x21] ss:$8 sm:$0xf] }
 0x275   : > { %8799 = vst [vmem:[#allocation143_spill] sm:$0xff] %v6722_v23  ;;  %v1587_v46 = vsel %vm1585_vm2, %v8804_v39, %v6258_v50  ;;  %8805 = vst [vmem:[#allocation148_spill] sm:$0xff] %v6746_v45  ;;  %v2170_v39 = vld [vmem:[#allocation6 + $0x20] ss:$8 sm:$0xf]  ;;  %v6767_v45 = vrot.slane %v1986_v15, %v6485_v47  ;;  %v6777_v14 = vrot.slane %v1986_v15, %v6595_v60 }
 0x276   : > { %8806 = vst [vmem:[#allocation149_spill] sm:$0xff] %v6749_v57  ;;  %8807 = vst [vmem:[#allocation150_spill] sm:$0xff] %v6752_v13  ;;  %v1603_v9 = vmul.f32 %v1587_v46, %v6665_v32  ;;  %v6788_v23 = vrot.slane %v2078_v8, %v6602_v22  ;;  %v6791_v5 = vrot.slane %v2078_v8, %v6595_v60  ;;  %v2353_v32 = vld [vmem:[#allocation6 + $0x22] ss:$8 sm:$0xf] }
 0x277   : > { %3180 = vrot.lane.b32.xlu0 %v6044_v20, %s5600_s17  ;;  %3000 = vrot.lane.b32.xlu1 %v6036_v16, %s5610_s12  ;;  %8808 = vst [vmem:[#allocation151_spill] sm:$0xff] %v6755_v31  ;;  %8809 = vst [vmem:[#allocation152_spill] sm:$0xff] %v6758_v58  ;;  %v6794_v46 = vrot.slane %v2170_v39, %v6485_v47  ;;  %v6797_v15 = vrot.slane %v2170_v39, %v6592_v3 }
 0x278   : > { %5389 = vset.pattern.permute.xlu0 %v8529_v51  ;;  %v8811_v51 = vunpack.i.h.bf16 %v6008_v56  ;;  %8812 = vst [vmem:[#allocation154_spill] sm:$0xff] %v6767_v45  ;;  %8813 = vst [vmem:[#allocation155_spill] sm:$0xff] %v6770_v37  ;;  %v6780_v56 = vrot.slane %v2078_v8, %v6485_v47  ;;  %v6803_v38 = vrot.slane %v2170_v39, %v6602_v22 }
 0x279   : > { %8814 = vst [vmem:[#allocation156_spill] sm:$0xff] %v6773_v52  ;;  %8815 = vst [vmem:[#allocation157_spill] sm:$0xff] %v6777_v14 }
 0x27a   : > { %v1493_v61 = vsel %vm1491_vm1, %v8811_v51, %v6242_v26  ;;  %8816 = vst [vmem:[#allocation158_spill] sm:$0xff] %v6780_v56  ;;  %v6783_v51 = vrot.slane %v2078_v8, %v6592_v3  ;;  %8818 = vst [vmem:[#allocation160_spill] sm:$0xff] %v6788_v23  ;;  %v6806_v23 = vrot.slane %v2170_v39, %v6595_v60  ;;  %v2444_v39 = vld [vmem:[#allocation6 + $0x23] ss:$8 sm:$0xf] }
 0x27b   : > { %3184 = vrot.lane.b32.xlu0 %v6070_v27, %s5600_s17  ;;  %8819 = vst [vmem:[#allocation161_spill] sm:$0xff] %v6791_v5  ;;  %8820 = vst [vmem:[#allocation162_spill] sm:$0xff] %v6794_v46  ;;  %5370 = vrot.lane.b32.xlu1 %v8739_v6, %s5610_s12  ;;  %v1509_v14 = vmul.f32 %v1493_v61, %v6650_v62  ;;  %v6809_v8 = vrot.slane %v2262_v28, %v6485_v47  ;;  %v6811_v5 = vpop.permute.xlu1 %2478 }
 0x27c   : > { %8817 = vst [vmem:[#allocation159_spill] sm:$0xff] %v6783_v51  ;;  %8821 = vst [vmem:[#allocation163_spill] sm:$0xff] %v6797_v15  ;;  %v8826_v15 = vunpack.i.h.bf16 %v6014_v59  ;;  %v6818_v6 = vrot.slane %v2262_v28, %v6592_v3  ;;  %v6821_v61 = vrot.slane %v2262_v28, %v6602_v22  ;;  %v6824_v62 = vrot.slane %v2262_v28, %v6595_v60 }
 0x27d   : > { %8822 = vst [vmem:[#allocation164_spill] sm:$0xff] %v6803_v38  ;;  %8823 = vst [vmem:[#allocation165_spill] sm:$0xff] %v6806_v23  ;;  %v1619_v23 = vmul.f32 %v6106_v35, %v1603_v9  ;;  %v8830_v59 = vunpack.i.h.bf16 %v6038_v18  ;;  %v6837_v38 = vpop.permute.xlu0 %2571  ;;  %v1494_v9 = vsel %vm1491_vm1, %v6242_v26, %v6256_v49  ;;  %v6848_v18 = vrot.slane %v2353_v32, %v6592_v3 }
 0x27e   : > { %8824 = vst [vmem:[#allocation166_spill] sm:$0xff] %v6809_v8  ;;  %8825 = vst [vmem:[#allocation167_spill] sm:$0xff] %v6811_v5  ;;  %v1679_v46 = vsel %vm1677_vm3, %v8826_v15, %v6240_v24  ;;  %v1588_v5 = vsel %vm1585_vm2, %v6258_v50, %v6264_v54  ;;  %v1589_v50 = vsel %vm1585_vm2, %v6264_v54, %v6266_v55  ;;  %v2535_v54 = vld [vmem:[#allocation6 + $0x24] ss:$8 sm:$0xf] }
 0x27f   : > { %8827 = vst [vmem:[#allocation168_spill] sm:$0xff] %v6818_v6  ;;  %8828 = vst [vmem:[#allocation169_spill] sm:$0xff] %v6821_v61  ;;  %v1771_v15 = vsel %vm1769_vm4, %v8830_v59, %v6274_v10  ;;  %v6835_v6 = vrot.slane %v2353_v32, %v6485_v47  ;;  %3190 = vrot.lane.b32.xlu0 %v6194_v4, %s5600_s17  ;;  %v6851_v28 = vrot.slane %v2353_v32, %v6602_v22 }
 0x280   : > { %8829 = vst [vmem:[#allocation170_spill] sm:$0xff] %v6824_v62  ;;  %8832 = vst [vmem:[#allocation172_spill] sm:$0xff] %v6837_v38  ;;  %3010 = vrot.lane.b32.xlu1 %v6188_v2, %s5610_s12  ;;  %v1695_v59 = vmul.f32 %v1679_v46, %v6646_v48  ;;  %v1527_v38 = vmul.f32 %v6078_v29, %v1509_v14  ;;  %v6858_v26 = vrot.slane %v2353_v32, %v6595_v60  ;;  %v8838_v46 = vld [vmem:[#allocation51_spill] sm:$0xff] }
 0x281   : > { %8831 = vst [vmem:[#allocation171_spill] sm:$0xff] %v6835_v6  ;;  %8833 = vst [vmem:[#allocation173_spill] sm:$0xff] %v6848_v18  ;;  %v6861_v62 = vrot.slane %v2444_v39, %v6485_v47  ;;  %v1604_v55 = vmul.f32 %v1588_v5, %v6669_v21  ;;  %v1787_v61 = vmul.f32 %v1771_v15, %v6691_v40  ;;  %v8847_v21 = vld [vmem:[#allocation53_spill] sm:$0xff] }
 0x282   : > { %8834 = vst [vmem:[#allocation174_spill] sm:$0xff] %v6851_v28  ;;  %8835 = vst [vmem:[#allocation175_spill] sm:$0xff] %v6858_v26  ;;  %v6866_v28 = vrot.slane %v2444_v39, %v6592_v3  ;;  %v6869_v18 = vrot.slane %v2444_v39, %v6602_v22  ;;  %v1495_v32 = vsel %vm1491_vm1, %v6256_v49, %v8838_v46 }
 0x283   : > { %8836 = vst [vmem:[#allocation176_spill] sm:$0xff] %v6861_v62  ;;  %v1510_v14 = vmul.f32 %v1494_v9, %v6657_v36  ;;  %v1627_v48 = vadd.f32 %v1619_v23, %v1527_v38  ;;  %v1605_v26 = vmul.f32 %v1589_v50, %v6687_v43  ;;  %v6876_v62 = vpop.permute.xlu1 %2482  ;;  %3194 = vrot.lane.b32.xlu0 %v6226_v17, %s5600_s17  ;;  %v8843_v23 = vld [vmem:[#allocation52_spill] sm:$0xff]  ;;  %v8845_v50 = vunpack.i.l.bf16 %v6062_v25 }
 0x284   : > { %8837 = vst [vmem:[#allocation177_spill] sm:$0xff] %v6866_v28  ;;  %8839 = vst [vmem:[#allocation51_spill] sm:$0xff] %v6876_v62  ;;  %v6881_v5 = vrot.slane %v2444_v39, %v6595_v60  ;;  %v6884_v15 = vrot.slane %v2535_v54, %v6485_v47  ;;  %v6887_v40 = vrot.slane %v2535_v54, %v6592_v3  ;;  %3223 = vperm.xlu1 %5374, %v6615_v33   ;;  %v8844_v39 = vld [vmem:[#allocation56_spill] sm:$0xff]  ;;  %v6906_v47 = vpop.permute.xlu0 %2575 }
 0x285   : > { %v6891_v49 = vrot.slane %v6519_v44, %v6602_v22  ;;  %v1711_v38 = vmul.f32 %v6020_v7, %v1695_v59  ;;  %v1772_v9 = vsel %vm1769_vm4, %v6274_v10, %v8843_v23  ;;  %v1937_v46 = vsel %vm1936_vm5, %v8845_v50, %v8844_v39  ;;  %8846 = vst [vmem:[#allocation52_spill] sm:$0xff] %v6906_v47 }
 0x286   : > { %8840 = vst [vmem:[#allocation178_spill] sm:$0xff] %v6881_v5  ;;  %8841 = vst [vmem:[#allocation179_spill] sm:$0xff] %v6884_v15  ;;  %v6904_v62 = vrot.slane %v6519_v44, %v6595_v60  ;;  %v1511_v3 = vmul.f32 %v1495_v32, %v6661_v1  ;;  %v1620_v43 = vmul.f32 %v6106_v35, %v1604_v55  ;;  %v8848_v5 = vld [vmem:[#allocation54_spill] sm:$0xff] }
 0x287   : > { %8842 = vst [vmem:[#allocation180_spill] sm:$0xff] %v6887_v40  ;;  %v1803_v59 = vmul.f32 %v6138_v42, %v1787_v61  ;;  %v1938_v10 = vsel %vm1936_vm5, %v8844_v39, %v8847_v21  ;;  %v1528_v25 = vmul.f32 %v6078_v29, %v1510_v14  ;;  %v1621_v50 = vmul.f32 %v6106_v35, %v1605_v26  ;;  %v8849_v61 = vld [vmem:[#allocation88_spill] sm:$0xff]  ;;  %v8850_v39 = vld [vmem:[#allocation50_spill] sm:$0xff] }
 0x288   : > { %v1719_v36 = vadd.f32 %v1711_v38, %v1627_v48  ;;  %v1773_v44 = vsel %vm1769_vm4, %v8843_v23, %v8848_v5  ;;  %3409 = vperm.xlu0 %5389, %v6567_v12   ;;  %v1788_v32 = vmul.f32 %v1772_v9, %v6695_v19  ;;  %v1953_v55 = vmul.f32 %v1937_v46, %v6749_v57  ;;  %v6937_v5 = vpop.permute.xlu1 %2569  ;;  %v6939_v38 = vpop.permute.xlu0 %2606  ;;  %v8856_v57 = vld [vmem:[#allocation57_spill] sm:$0xff] }
 0x289   : > { %v1680_v47 = vsel %vm1677_vm3, %v6240_v24, %v8849_v61  ;;  %v1681_v14 = vsel %vm1677_vm3, %v8849_v61, %v8850_v39  ;;  %2996 = vrot.lane.b32.xlu1 %v6026_v11, %s5610_s12  ;;  %v1954_v35 = vmul.f32 %v1938_v10, %v6752_v13  ;;  %v6932_v48 = vrot.slane %v2535_v54, %v6602_v22  ;;  %v8854_v39 = vld [vmem:[#allocation60_spill] sm:$0xff] }
 0x28a   : > { %v6935_v26 = vrot.slane %v2535_v54, %v6595_v60  ;;  %8851 = vst [vmem:[#allocation56_spill] sm:$0xff] %v6937_v5  ;;  %8852 = vst [vmem:[#allocation53_spill] sm:$0xff] %v6939_v38  ;;  %v8853_v24 = vmov 20   ;;  %v1529_v23 = vmul.f32 %v6078_v29, %v1511_v3  ;;  %v1628_v9 = vadd.f32 %v1620_v43, %v1528_v25  ;;  %v8857_v43 = vld [vmem:[#allocation23_spill] sm:$0xff] }
 0x28b   : > { %5381 = vset.pattern.permute.xlu1 %v8853_v24  ;;  %v1811_v46 = vadd.f32 %v1803_v59, %v1719_v36  ;;  %v1789_v61 = vmul.f32 %v1773_v44, %v6710_v41  ;;  %v8855_v10 = vunpack.i.l.bf16 %v6084_v30  ;;  %v2030_v54 = vsel %vm2028_vm6, %v8854_v39, %v8856_v57 }
 0x28c   : > { %v1696_v5 = vmul.f32 %v1680_v47, %v6891_v49  ;;  %v1697_v38 = vmul.f32 %v1681_v14, %v6904_v62  ;;  %3271 = vrot.lane.b32.xlu0 %v6044_v20, %s5598_s23  ;;  %v1629_v25 = vadd.f32 %v1621_v50, %v1529_v23  ;;  %v1804_v29 = vmul.f32 %v6138_v42, %v1788_v32  ;;  %v8858_v47 = vld [vmem:[#allocation58_spill] sm:$0xff]  ;;  %v8859_v14 = vld [vmem:[#allocation55_spill] sm:$0xff]  ;;  %v8860_v32 = vld [vmem:[#allocation64_spill] sm:$0xff] }
 0x28d   : > { %v2029_v13 = vsel %vm2028_vm6, %v8855_v10, %v8854_v39  ;;  %v1969_v3 = vmul.f32 %v8857_v43, %v1953_v55  ;;  %3006 = vrot.lane.b32.xlu1 %v6176_v53, %s5610_s12  ;;  %v8569_v36 = vmov 22   ;;  %v1970_v59 = vmul.f32 %v8857_v43, %v1954_v35  ;;  %v6971_v23 = vpop.permute.xlu0 %2768 }
 0x28e   : > { %5396 = vset.pattern.permute.xlu0 %v8569_v36  ;;  %v1939_v44 = vsel %vm1936_vm5, %v8847_v21, %v8858_v47  ;;  %v1940_v50 = vsel %vm1936_vm5, %v8858_v47, %v8859_v14  ;;  %v8861_v55 = vunpack.i.l.bf16 %v6104_v34  ;;  %8862 = vst [vmem:[#allocation54_spill] sm:$0xff] %v6971_v23  ;;  %v1805_v39 = vmul.f32 %v6138_v42, %v1789_v61  ;;  %v8863_v36 = vld [vmem:[#allocation61_spill] sm:$0xff]  ;;  %v8864_v47 = vld [vmem:[#allocation62_spill] sm:$0xff]  ;;  %v6985_v34 = vpop.permute.xlu1 %2573 }
 0x28f   : > { %v2045_v10 = vmul.f32 %v2029_v13, %v6767_v45  ;;  %v2046_v35 = vmul.f32 %v2030_v54, %v6770_v37  ;;  %v2122_v21 = vsel %vm2120_vm7, %v8860_v32, %v8863_v36  ;;  %v1866_v41 = vadd.f32 %v6673_v0, %v1811_v46  ;;  %8865 = vst [vmem:[#allocation88_spill] sm:$0xff] %v6985_v34  ;;  %v8867_v46 = vld [vmem:[#allocation24_spill] sm:$0xff]  ;;  %v8883_v37 = vld [vmem:[#allocation163_spill] sm:$0xff] }
 0x290   : > { %v2121_v24 = vsel %vm2120_vm7, %v8861_v55, %v8860_v32  ;;  %v2031_v14 = vsel %vm2028_vm6, %v8856_v57, %v8864_v47  ;;  %v1712_v55 = vmul.f32 %v6020_v7, %v1696_v5  ;;  %v1713_v23 = vmul.f32 %v6020_v7, %v1697_v38  ;;  %3275 = vrot.lane.b32.xlu0 %v6070_v27, %s5598_s23  ;;  %v8866_v5 = vld [vmem:[#allocation59_spill] sm:$0xff]  ;;  %v8868_v32 = vld [vmem:[#allocation66_spill] sm:$0xff] }
 0x291   : > { %v1955_v42 = vmul.f32 %v1939_v44, %v6755_v31  ;;  %v1956_v13 = vmul.f32 %v1940_v50, %v6758_v58  ;;  %v2137_v61 = vmul.f32 %v2121_v24, %v6780_v56  ;;  %3091 = vrot.lane.b32.xlu1 %v6036_v16, %s5596_s20  ;;  %v1977_v0 = vadd.f32 %v1969_v3, %v6625_v63  ;;  %v8870_v63 = vld [vmem:[#allocation68_spill] sm:$0xff]  ;;  %v8877_v58 = vld [vmem:[#allocation63_spill] sm:$0xff] }
 0x292   : > { %v1978_v57 = vadd.f32 %v1970_v59, %v1866_v41  ;;  %v2032_v7 = vsel %vm2028_vm6, %v8864_v47, %v8866_v5  ;;  %v2138_v38 = vmul.f32 %v2122_v21, %v6783_v51  ;;  %v2061_v54 = vmul.f32 %v8867_v46, %v2045_v10  ;;  %v7005_v34 = vpop.permute.xlu0 %2863  ;;  %v8871_v41 = vld [vmem:[#allocation29_spill] sm:$0xff] }
 0x293   : > { %v2062_v44 = vmul.f32 %v8867_v46, %v2046_v35  ;;  %v2047_v50 = vmul.f32 %v2031_v14, %v6773_v52  ;;  %v2123_v24 = vsel %vm2120_vm7, %v8863_v36, %v8868_v32  ;;  %8869 = vst [vmem:[#allocation50_spill] sm:$0xff] %v7005_v34  ;;  %v8872_v3 = vunpack.i.l.bf16 %v8871_v41  ;;  %v8873_v47 = vld [vmem:[#allocation65_spill] sm:$0xff]  ;;  %v8875_v52 = vld [vmem:[#allocation27_spill] sm:$0xff] }
 0x294   : > { %v2214_v21 = vsel %vm2212_vm8, %v8870_v63, %v8873_v47  ;;  %v1720_v10 = vadd.f32 %v1712_v55, %v1628_v9  ;;  %v1721_v5 = vadd.f32 %v1713_v23, %v1629_v25  ;;  %3281 = vrot.lane.b32.xlu0 %v6194_v4, %s5598_s23  ;;  %v1971_v35 = vmul.f32 %v8857_v43, %v1955_v42  ;;  %v8874_v14 = vld [vmem:[#allocation157_spill] sm:$0xff]  ;;  %v8878_v25 = vld [vmem:[#allocation160_spill] sm:$0xff] }
 0x295   : > { %v2213_v59 = vsel %vm2212_vm8, %v8872_v3, %v8870_v63  ;;  %v1972_v36 = vmul.f32 %v8857_v43, %v1956_v13  ;;  %v2048_v34 = vmul.f32 %v2032_v7, %v8874_v14  ;;  %v2153_v51 = vmul.f32 %v8875_v52, %v2137_v61  ;;  %v8879_v55 = vld [vmem:[#allocation72_spill] sm:$0xff]  ;;  %v7031_v13 = vpop.permute.xlu1 %1673  ;;  %v8882_v14 = vld [vmem:[#allocation162_spill] sm:$0xff] }
 0x296   : > { %v8876_v56 = vmov 0.0   ;;  %v2154_v3 = vmul.f32 %v8875_v52, %v2138_v38  ;;  %v2124_v9 = vsel %vm2120_vm7, %v8868_v32, %v8877_v58  ;;  %v2139_v23 = vmul.f32 %v2123_v24, %v8878_v25  ;;  %v8880_v63 = vld [vmem:[#allocation32_spill] sm:$0xff]  ;;  %v7035_v38 = vpop.permute.xlu0 %2729  ;;  %v8885_v58 = vld [vmem:[#allocation70_spill] sm:$0xff] }
 0x297   : > { %5377 = vrot.lane.b32.xlu1 %v8876_v56, %s5596_s20  ;;  %v8881_v42 = vunpack.i.l.bf16 %v8880_v63  ;;  %v2069_v7 = vadd.f32 %v2061_v54, %v1977_v0  ;;  %v2070_v61 = vadd.f32 %v2062_v44, %v1978_v57  ;;  %v2229_v41 = vmul.f32 %v2213_v59, %v8882_v14  ;;  %8884 = vst [vmem:[#allocation60_spill] sm:$0xff] %v7035_v38  ;;  %v8886_v57 = vld [vmem:[#allocation161_spill] sm:$0xff]  ;;  %v8893_v38 = vld [vmem:[#allocation35_spill] sm:$0xff] }
 0x298   : > { %v2230_v31 = vmul.f32 %v2214_v21, %v8883_v37  ;;  %v7038_v45 = vmul.f32 %v8867_v46, %v2047_v50  ;;  %v2215_v32 = vsel %vm2212_vm8, %v8873_v47, %v8885_v58  ;;  %v1812_v24 = vadd.f32 %v1804_v29, %v1720_v10  ;;  %3285 = vrot.lane.b32.xlu0 %v6226_v17, %s5598_s23  ;;  %v8887_v44 = vld [vmem:[#allocation69_spill] sm:$0xff]  ;;  %v8890_v10 = vld [vmem:[#allocation31_spill] sm:$0xff]  ;;  %v8902_v37 = vld [vmem:[#allocation74_spill] sm:$0xff] }
 0x299   : > { %v2304_v43 = vsel %vm1491_vm1, %v8881_v42, %v8879_v55  ;;  %v1813_v25 = vadd.f32 %v1805_v39, %v1721_v5  ;;  %v2064_v0 = vmul.f32 %v8867_v46, %v2048_v34  ;;  %v2140_v54 = vmul.f32 %v2124_v9, %v8886_v57  ;;  %v8888_v39 = vld [vmem:[#allocation67_spill] sm:$0xff]  ;;  %v7059_v46 = vpop.permute.xlu1 %2657 }
 0x29a   : > { %v2305_v59 = vsel %vm1491_vm1, %v8879_v55, %v8887_v44  ;;  %v2320_v50 = vmul.f32 %v2304_v43, %v6809_v8  ;;  %v2161_v21 = vadd.f32 %v2153_v51, %v2069_v7  ;;  %v2162_v47 = vadd.f32 %v2154_v3, %v2070_v61  ;;  %8889 = vst [vmem:[#allocation57_spill] sm:$0xff] %v7059_v46  ;;  %v8891_v55 = vld [vmem:[#allocation164_spill] sm:$0xff]  ;;  %v7068_v3 = vpop.permute.xlu0 %2735  ;;  %v8897_v61 = vld [vmem:[#allocation73_spill] sm:$0xff] }
 0x29b   : > { %3101 = vrot.lane.b32.xlu1 %v6188_v2, %s5596_s20  ;;  %v7054_v29 = vmul.f32 %v8875_v52, %v2139_v23  ;;  %v2216_v34 = vsel %vm2212_vm8, %v8885_v58, %v8888_v39  ;;  %v2245_v5 = vmul.f32 %v8890_v10, %v2229_v41  ;;  %v2246_v9 = vmul.f32 %v8890_v10, %v2230_v31  ;;  %v8892_v43 = vld [vmem:[#allocation76_spill] sm:$0xff]  ;;  %v8898_v39 = vld [vmem:[#allocation133_spill] sm:$0xff]  ;;  %v8899_v41 = vld [vmem:[#allocation131_spill] sm:$0xff] }
 0x29c   : > { %v2231_v42 = vmul.f32 %v2215_v32, %v8891_v55  ;;  %v8894_v8 = vunpack.i.l.bf16 %v8893_v38  ;;  %8895 = vst [vmem:[#allocation23_spill] sm:$0xff] %v7068_v3  ;;  %v8896_v23 = vld [vmem:[#allocation168_spill] sm:$0xff]  ;;  %v2396_v58 = vsel %vm1585_vm2, %v8892_v43, %v8897_v61  ;;  %v1867_v46 = vadd.f32 %v8898_v39, %v1812_v24  ;;  %3464 = vperm.xlu0 %5396, %v6567_v12   ;;  %v8900_v32 = vld [vmem:[#allocation165_spill] sm:$0xff]  ;;  %v8903_v3 = vld [vmem:[#allocation71_spill] sm:$0xff] }
 0x29d   : > { %v2321_v7 = vmul.f32 %v2305_v59, %v8896_v23  ;;  %v1868_v57 = vadd.f32 %v8899_v41, %v1813_v25  ;;  %v2156_v31 = vmul.f32 %v8875_v52, %v2140_v54  ;;  %v2232_v55 = vmul.f32 %v2216_v34, %v8900_v32  ;;  %v8901_v38 = vld [vmem:[#allocation33_spill] sm:$0xff]  ;;  %v7092_v54 = vpop.permute.xlu1 %2661 }
 0x29e   : > { %v2395_v51 = vsel %vm1585_vm2, %v8894_v8, %v8892_v43  ;;  %v2336_v8 = vmul.f32 %v8901_v38, %v2320_v50  ;;  %v2306_v59 = vsel %vm1491_vm1, %v8887_v44, %v8902_v37  ;;  %v2307_v24 = vsel %vm1491_vm1, %v8902_v37, %v8903_v3  ;;  %v8904_v43 = vld [vmem:[#allocation80_spill] sm:$0xff]  ;;  %v8905_v39 = vld [vmem:[#allocation41_spill] sm:$0xff]  ;;  %8907 = vst [vmem:[#allocation58_spill] sm:$0xff] %v7092_v54  ;;  %v7098_v14 = vpop.permute.xlu0 %2739 }
 0x29f   : > { %3314 = vperm.xlu1 %5381, %v6615_v33   ;;  %v2411_v25 = vmul.f32 %v2395_v51, %v6835_v6  ;;  %v8906_v41 = vunpack.i.l.bf16 %v8905_v39  ;;  %v2253_v50 = vadd.f32 %v2245_v5, %v2161_v21  ;;  %v2254_v34 = vadd.f32 %v2246_v9, %v2162_v47  ;;  %v8908_v44 = vld [vmem:[#allocation173_spill] sm:$0xff]  ;;  %8909 = vst [vmem:[#allocation55_spill] sm:$0xff] %v7098_v14  ;;  %v8918_v14 = vld [vmem:[#allocation84_spill] sm:$0xff] }
 0x2a0   : > { %v7095_v32 = vmul.f32 %v8890_v10, %v2231_v42  ;;  %v2412_v23 = vmul.f32 %v2396_v58, %v8908_v44  ;;  %v2337_v37 = vmul.f32 %v8901_v38, %v2321_v7  ;;  %v8910_v3 = vld [vmem:[#allocation77_spill] sm:$0xff]  ;;  %v1979_v6 = vadd.f32 %v1971_v35, %v1867_v46  ;;  %3362 = vrot.lane.b32.xlu0 %v6044_v20, %s5601_s22  ;;  %v8913_v42 = vld [vmem:[#allocation170_spill] sm:$0xff]  ;;  %v8914_v58 = vld [vmem:[#allocation176_spill] sm:$0xff] }
 0x2a1   : > { %v2486_v52 = vsel %vm1677_vm3, %v8906_v41, %v8904_v43  ;;  %v2487_v51 = vsel %vm1677_vm3, %v8904_v43, %v8910_v3  ;;  %v1980_v39 = vadd.f32 %v1972_v36, %v1868_v57  ;;  %v8911_v21 = vld [vmem:[#allocation45_spill] sm:$0xff]  ;;  %v2323_v41 = vmul.f32 %v2307_v24, %v8913_v42  ;;  %v8916_v43 = vld [vmem:[#allocation78_spill] sm:$0xff] }
 0x2a2   : > { %v5339_v47 = vunpack.i.l.bf16 %v8911_v21  ;;  %v8912_v5 = vld [vmem:[#allocation169_spill] sm:$0xff]  ;;  %v2502_v54 = vmul.f32 %v2486_v52, %v8914_v58  ;;  %v8591_v7 = vmov 23   ;;  %v2248_v35 = vmul.f32 %v8890_v10, %v2232_v55  ;;  %v7126_v55 = vpop.permute.xlu1 %2772  ;;  %v8932_v42 = vld [vmem:[#allocation86_spill] sm:$0xff] }
 0x2a3   : > { %v2322_v9 = vmul.f32 %v2306_v59, %v8912_v5  ;;  %3087 = vrot.lane.b32.xlu1 %v6026_v11, %s5596_s20  ;;  %5403 = vset.pattern.permute.xlu0 %v8591_v7  ;;  %v2344_v36 = vadd.f32 %v2336_v8, %v2253_v50  ;;  %v8915_v57 = vld [vmem:[#allocation37_spill] sm:$0xff]  ;;  %v2397_v20 = vsel %vm1585_vm2, %v8897_v61, %v8916_v43  ;;  %v8917_v59 = vmov 21   ;;  %v7128_v8 = vpop.permute.xlu0 %2954  ;;  %v8922_v50 = vld [vmem:[#allocation75_spill] sm:$0xff] }
 0x2a4   : > { %v2427_v46 = vmul.f32 %v8915_v57, %v2411_v25  ;;  %5388 = vset.pattern.permute.xlu1 %v8917_v59  ;;  %v2428_v24 = vmul.f32 %v8915_v57, %v2412_v23  ;;  %v2503_v52 = vmul.f32 %v2487_v51, %v6866_v28  ;;  %v2577_v21 = vsel %vm1769_vm4, %v5339_v47, %v8918_v14  ;;  %v8919_v58 = vld [vmem:[#allocation81_spill] sm:$0xff] }
 0x2a5   : > { %v2578_v10 = vsel %vm1769_vm4, %v8918_v14, %v8919_v58  ;;  %8920 = vst [vmem:[#allocation64_spill] sm:$0xff] %v7126_v55  ;;  %8921 = vst [vmem:[#allocation61_spill] sm:$0xff] %v7128_v8  ;;  %v2345_v25 = vadd.f32 %v2337_v37, %v2254_v34  ;;  %v2398_v61 = vsel %vm1585_vm2, %v8916_v43, %v8922_v50  ;;  %3366 = vrot.lane.b32.xlu0 %v6070_v27, %s5601_s22  ;;  %v8923_v14 = vld [vmem:[#allocation174_spill] sm:$0xff]  ;;  %v8924_v55 = vld [vmem:[#allocation43_spill] sm:$0xff] }
 0x2a6   : > { %v2071_v23 = vadd.f32 %v7038_v45, %v1979_v6  ;;  %v2072_v59 = vadd.f32 %v2064_v0, %v1980_v39  ;;  %v2338_v51 = vmul.f32 %v8901_v38, %v2322_v9  ;;  %v2339_v47 = vmul.f32 %v8901_v38, %v2323_v41  ;;  %v8925_v34 = vld [vmem:[#allocation82_spill] sm:$0xff]  ;;  %v8926_v6 = vld [vmem:[#allocation79_spill] sm:$0xff]  ;;  %v8929_v50 = vld [vmem:[#allocation85_spill] sm:$0xff] }
 0x2a7   : > { %v2413_v7 = vmul.f32 %v2397_v20, %v8923_v14  ;;  %v2518_v28 = vmul.f32 %v8924_v55, %v2502_v54  ;;  %3097 = vrot.lane.b32.xlu1 %v6176_v53, %s5596_s20  ;;  %v2488_v37 = vsel %vm1677_vm3, %v8910_v3, %v8925_v34  ;;  %v2489_v45 = vsel %vm1677_vm3, %v8925_v34, %v8926_v6  ;;  %v8927_v20 = vld [vmem:[#allocation175_spill] sm:$0xff]  ;;  %v7152_v43 = vpop.permute.xlu0 %2816  ;;  %v8930_v8 = vld [vmem:[#allocation17_spill] sm:$0xff] }
 0x2a8   : > { %v2593_v0 = vmul.f32 %v2577_v21, %v6884_v15  ;;  %v2594_v39 = vmul.f32 %v2578_v10, %v6887_v40  ;;  %v2435_v38 = vadd.f32 %v2427_v46, %v2344_v36  ;;  %v2436_v9 = vadd.f32 %v2428_v24, %v2345_v25  ;;  %8928 = vst [vmem:[#allocation62_spill] sm:$0xff] %v7152_v43  ;;  %v7162_v36 = vpop.permute.xlu1 %2859  ;;  %v8940_v43 = vld [vmem:[#allocation83_spill] sm:$0xff]  ;;  %v8945_v40 = vld [vmem:[#allocation89_spill] sm:$0xff] }
 0x2a9   : > { %v2414_v41 = vmul.f32 %v2398_v61, %v8927_v20  ;;  %v2519_v54 = vmul.f32 %v8924_v55, %v2503_v52  ;;  %v8931_v14 = vunpack.i.h.bf16 %v8930_v8  ;;  %v2579_v34 = vsel %vm1769_vm4, %v8919_v58, %v8932_v42  ;;  %8933 = vst [vmem:[#allocation59_spill] sm:$0xff] %v7162_v36  ;;  %3372 = vrot.lane.b32.xlu0 %v6194_v4, %s5601_s22  ;;  %v8934_v52 = vld [vmem:[#allocation178_spill] sm:$0xff]  ;;  %v8935_v61 = vld [vmem:[#allocation48_spill] sm:$0xff]  ;;  %v8939_v36 = vld [vmem:[#allocation125_spill] sm:$0xff] }
 0x2aa   : > { %v2163_v21 = vadd.f32 %v7054_v29, %v2071_v23  ;;  %v2164_v10 = vadd.f32 %v2156_v31, %v2072_v59  ;;  %v2429_v46 = vmul.f32 %v8915_v57, %v2413_v7  ;;  %v2504_v24 = vmul.f32 %v2488_v37, %v6869_v18  ;;  %v8936_v31 = vld [vmem:[#allocation94_spill] sm:$0xff]  ;;  %v8937_v23 = vld [vmem:[#allocation25_spill] sm:$0xff] }
 0x2ab   : > { %v1683_v3 = vsel %vm1677_vm3, %v8931_v14, %v8929_v50  ;;  %v2505_v8 = vmul.f32 %v2489_v45, %v8934_v52  ;;  %3182 = vrot.lane.b32.xlu1 %v6036_v16, %s5600_s17  ;;  %v2526_v25 = vadd.f32 %v2518_v28, %v2435_v38  ;;  %v2609_v58 = vmul.f32 %v8935_v61, %v2593_v0  ;;  %v7182_v15 = vpop.permute.xlu0 %2820  ;;  %v8942_v28 = vld [vmem:[#allocation90_spill] sm:$0xff]  ;;  %v8943_v0 = vld [vmem:[#allocation16_spill] sm:$0xff] }
 0x2ac   : > { %v2610_v29 = vmul.f32 %v8935_v61, %v2594_v39  ;;  %v8938_v59 = vunpack.i.h.bf16 %v8937_v23  ;;  %v2527_v6 = vadd.f32 %v2519_v54, %v2436_v9  ;;  %v1699_v7 = vmul.f32 %v1683_v3, %v8939_v36  ;;  %8941 = vst [vmem:[#allocation24_spill] sm:$0xff] %v7182_v15  ;;  %v7191_v54 = vpop.permute.xlu1 %2725  ;;  %v8946_v36 = vld [vmem:[#allocation129_spill] sm:$0xff]  ;;  %v8965_v15 = vld [vmem:[#allocation14_spill] sm:$0xff] }
 0x2ad   : > { %v2580_v37 = vsel %vm1769_vm4, %v8932_v42, %v8940_v43  ;;  %v2595_v45 = vmul.f32 %v2579_v34, %v6932_v48  ;;  %v8944_v38 = vunpack.i.h.bf16 %v8943_v0  ;;  %v1498_v23 = vsel %vm1491_vm1, %v8942_v28, %v8945_v40  ;;  %3376 = vrot.lane.b32.xlu0 %v6226_v17, %s5601_s22  ;;  %v8949_v0 = vld [vmem:[#allocation91_spill] sm:$0xff] }
 0x2ae   : > { %v1591_v14 = vsel %vm1585_vm2, %v8938_v59, %v8936_v31  ;;  %v2256_v9 = vadd.f32 %v2248_v35, %v2164_v10  ;;  %v2255_v42 = vadd.f32 %v7095_v32, %v2163_v21  ;;  %v2430_v43 = vmul.f32 %v8915_v57, %v2414_v41  ;;  %v8950_v57 = vld [vmem:[#allocation126_spill] sm:$0xff]  ;;  %v8951_v21 = vld [vmem:[#allocation128_spill] sm:$0xff] }
 0x2af   : > { %v1497_v39 = vsel %vm1491_vm1, %v8944_v38, %v8942_v28  ;;  %v2520_v3 = vmul.f32 %v8924_v55, %v2504_v24  ;;  %v2521_v34 = vmul.f32 %v8924_v55, %v2505_v8  ;;  %v1607_v59 = vmul.f32 %v1591_v14, %v8946_v36  ;;  %5384 = vrot.lane.b32.xlu1 %v8876_v56, %s5600_s17  ;;  %v8952_v55 = vld [vmem:[#allocation96_spill] sm:$0xff]  ;;  %v8953_v14 = vld [vmem:[#allocation98_spill] sm:$0xff] }
 0x2b0   : > { %v7202_v28 = vadd.f32 %v2609_v58, %v2526_v25  ;;  %v7204_v35 = vadd.f32 %v2610_v29, %v2527_v6  ;;  %v2596_v10 = vmul.f32 %v2580_v37, %v6935_v26  ;;  %v1592_v32 = vsel %vm1585_vm2, %v8936_v31, %v8949_v0  ;;  %v8954_v38 = vld [vmem:[#allocation30_spill] sm:$0xff]  ;;  %v7219_v29 = vpop.permute.xlu0 %2826  ;;  %v8957_v37 = vld [vmem:[#allocation28_spill] sm:$0xff] }
 0x2b1   : > { %v1513_v41 = vmul.f32 %v1497_v39, %v8950_v57  ;;  %v1514_v24 = vmul.f32 %v1498_v23, %v8951_v21  ;;  %v1593_v8 = vsel %vm1585_vm2, %v8949_v0, %v8952_v55  ;;  %v8955_v25 = vunpack.i.h.bf16 %v8954_v38  ;;  %8956 = vst [vmem:[#allocation65_spill] sm:$0xff] %v7219_v29  ;;  %v2691_v6 = vld [vmem:[#allocation6 + $0x26] ss:$8 sm:$0xf]  ;;  %v7225_v23 = vpop.permute.xlu1 %2727  ;;  %3575 = vperm.xlu0 %5403, %v6567_v12  }
 0x2b2   : > { %8947 = vst [vmem:[#allocation66_spill] sm:$0xff] %v7202_v28  ;;  %8948 = vst [vmem:[#allocation68_spill] sm:$0xff] %v7204_v35  ;;  %v1715_v36 = vmul.f32 %v8957_v37, %v1699_v7  ;;  %v7223_v31 = vmul.f32 %v8935_v61, %v2595_v45  ;;  %v2347_v39 = vadd.f32 %v2339_v47, %v2256_v9  ;;  %v8958_v0 = vld [vmem:[#allocation92_spill] sm:$0xff]  ;;  %v8959_v55 = vld [vmem:[#allocation130_spill] sm:$0xff] }
 0x2b3   : > { %v1775_v58 = vsel %vm1769_vm4, %v8955_v25, %v8953_v14  ;;  %v2346_v57 = vadd.f32 %v2338_v51, %v2255_v42  ;;  %v1499_v21 = vsel %vm1491_vm1, %v8945_v40, %v8958_v0  ;;  %v1608_v38 = vmul.f32 %v1592_v32, %v8959_v55  ;;  %v8960_v25 = vld [vmem:[#allocation15_spill] sm:$0xff]  ;;  %3192 = vrot.lane.b32.xlu1 %v6188_v2, %s5600_s17  ;;  %v8961_v45 = vld [vmem:[#allocation134_spill] sm:$0xff]  ;;  %v8963_v42 = vld [vmem:[#allocation117_spill] sm:$0xff] }
 0x2b4   : > { %v1623_v28 = vmul.f32 %v8960_v25, %v1607_v59  ;;  %v2612_v7 = vmul.f32 %v8935_v61, %v2596_v10  ;;  %v1609_v47 = vmul.f32 %v1593_v8, %v8961_v45  ;;  %v8962_v51 = vld [vmem:[#allocation135_spill] sm:$0xff]  ;;  %v7239_v29 = vrot.slane %v2691_v6, %v8963_v42  ;;  %v8966_v0 = vld [vmem:[#allocation93_spill] sm:$0xff]  ;;  %v7249_v55 = vpop.permute.xlu0 %2830 }
 0x2b5   : > { %v1791_v9 = vmul.f32 %v1775_v58, %v8962_v51  ;;  %v1531_v35 = vmul.f32 %v8965_v15, %v1513_v41  ;;  %v1532_v40 = vmul.f32 %v8965_v15, %v1514_v24  ;;  %v1776_v59 = vsel %vm1769_vm4, %v8953_v14, %v8966_v0  ;;  %8967 = vst [vmem:[#allocation63_spill] sm:$0xff] %v7249_v55  ;;  %v7255_v45 = vpop.permute.xlu1 %5349  ;;  %v8968_v24 = vld [vmem:[#allocation21_spill] sm:$0xff] }
 0x2b6   : > { %8964 = vst [vmem:[#allocation27_spill] sm:$0xff] %v7239_v29  ;;  %v7247_v32 = vrot.slane %v2691_v6, %v6602_v22  ;;  %v1515_v61 = vmul.f32 %v1499_v21, %v6661_v1  ;;  %v2438_v10 = vadd.f32 %v2430_v43, %v2347_v39  ;;  %v2437_v8 = vadd.f32 %v2429_v46, %v2346_v57  ;;  %v8969_v43 = vld [vmem:[#allocation20_spill] sm:$0xff]  ;;  %v8970_v57 = vld [vmem:[#allocation87_spill] sm:$0xff] }
 0x2b7   : > { %v7253_v58 = vrot.slane %v2691_v6, %v6595_v60  ;;  %v8603_v41 = vmov 24   ;;  %v5291_v51 = vunpack.i.h.bf16 %v8968_v24  ;;  %v1624_v14 = vmul.f32 %v8960_v25, %v1608_v38  ;;  %3405 = vperm.xlu1 %5388, %v6615_v33   ;;  %v8971_v38 = vld [vmem:[#allocation100_spill] sm:$0xff]  ;;  %v8973_v24 = vld [vmem:[#allocation95_spill] sm:$0xff] }
 0x2b8   : > { %5404 = vset.pattern.permute.xlu0 %v8603_v41  ;;  %v1631_v29 = vadd.f32 %v1623_v28, %v1531_v35  ;;  %v1684_v55 = vsel %vm1677_vm3, %v8929_v50, %v7031_v13  ;;  %v1625_v1 = vmul.f32 %v8960_v25, %v1609_v47  ;;  %v1792_v46 = vmul.f32 %v1776_v59, %v6695_v19  ;;  %v8972_v35 = vld [vmem:[#allocation102_spill] sm:$0xff]  ;;  %v7279_v25 = vpop.permute.xlu0 %3045 }
 0x2b9   : > { %3662 = vperm.xlu0 %5404, %v6615_v33   ;;  %v1807_v39 = vmul.f32 %v8969_v43, %v1791_v9  ;;  %v1685_v21 = vsel %vm1677_vm3, %v7031_v13, %v8970_v57  ;;  %v1777_v28 = vsel %vm1769_vm4, %v8966_v0, %v8971_v38  ;;  %v1941_v50 = vsel %vm1936_vm5, %v5291_v51, %v8972_v35  ;;  %v7283_v13 = vpop.permute.xlu1 %2737 }
 0x2ba   : > { %v1942_v41 = vsel %vm1936_vm5, %v8972_v35, %v8973_v24  ;;  %8974 = vst [vmem:[#allocation72_spill] sm:$0xff] %v7279_v25  ;;  %v1533_v19 = vmul.f32 %v8965_v15, %v1515_v61  ;;  %v1700_v47 = vmul.f32 %v1684_v55, %v6891_v49  ;;  %v2529_v9 = vadd.f32 %v2521_v34, %v2438_v10  ;;  %v8975_v35 = vld [vmem:[#allocation139_spill] sm:$0xff]  ;;  %v8976_v61 = vld [vmem:[#allocation149_spill] sm:$0xff]  ;;  %v8977_v34 = vld [vmem:[#allocation150_spill] sm:$0xff] }
 0x2bb   : > { %v2528_v59 = vadd.f32 %v2520_v3, %v2437_v8  ;;  %v5298_v57 = vunpack.i.h.bf16 %v6084_v30  ;;  %v1632_v0 = vadd.f32 %v1624_v14, %v1532_v40  ;;  %v1723_v38 = vadd.f32 %v1715_v36, %v1631_v29  ;;  %3178 = vrot.lane.b32.xlu1 %v6026_v11, %s5600_s17  ;;  %v8978_v55 = vld [vmem:[#allocation107_spill] sm:$0xff]  ;;  %v8982_v14 = vld [vmem:[#allocation106_spill] sm:$0xff] }
 0x2bc   : > { %v1701_v51 = vmul.f32 %v1685_v21, %v6904_v62  ;;  %v1793_v15 = vmul.f32 %v1777_v28, %v8975_v35  ;;  %v1957_v49 = vmul.f32 %v1941_v50, %v8976_v61  ;;  %v1958_v3 = vmul.f32 %v1942_v41, %v8977_v34  ;;  %v7299_v40 = vpop.permute.xlu0 %2907  ;;  %v8986_v35 = vld [vmem:[#allocation99_spill] sm:$0xff]  ;;  %v8988_v61 = vld [vmem:[#allocation97_spill] sm:$0xff] }
 0x2bd   : > { %3530 = vrot.lane.b32.xlu0 %v6070_v27, %s5604_s24  ;;  %v7295_v10 = vrot.slane %v2691_v6, %v8978_v55  ;;  %v8604_v30 = vmov 25   ;;  %v1633_v29 = vadd.f32 %v1625_v1, %v1533_v19  ;;  %v1808_v62 = vmul.f32 %v8969_v43, %v1792_v46  ;;  %8980 = vst [vmem:[#allocation70_spill] sm:$0xff] %v7299_v40  ;;  %v7310_v50 = vpop.permute.xlu1 %2950  ;;  %v7312_v1 = vld [vmem:[#allocation6 + $0x27] ss:$8 sm:$0xf] }
 0x2be   : > { %5417 = vset.pattern.permute.xlu0 %v8604_v30  ;;  %v1815_v36 = vadd.f32 %v1807_v39, %v1723_v38  ;;  %v8981_v8 = vmov 22   ;;  %v2033_v21 = vsel %vm2028_vm6, %v5298_v57, %v8982_v14  ;;  %v1716_v28 = vmul.f32 %v8957_v37, %v1700_v47  ;;  %8983 = vst [vmem:[#allocation69_spill] sm:$0xff] %v7310_v50  ;;  %v8984_v46 = vld [vmem:[#allocation26_spill] sm:$0xff]  ;;  %v8985_v19 = vld [vmem:[#allocation104_spill] sm:$0xff]  ;;  %v8989_v34 = vld [vmem:[#allocation143_spill] sm:$0xff] }
 0x2bf   : > { %8979 = vst [vmem:[#allocation32_spill] sm:$0xff] %v7295_v10  ;;  %5395 = vset.pattern.permute.xlu1 %v8981_v8  ;;  %v7305_v41 = vadd.f32 %v2612_v7, %v2529_v9  ;;  %v7308_v6 = vadd.f32 %v7223_v31, %v2528_v59  ;;  %v5305_v39 = vunpack.i.h.bf16 %v8984_v46  ;;  %v1943_v38 = vsel %vm1936_vm5, %v8973_v24, %v8985_v19  ;;  %v8987_v47 = vld [vmem:[#allocation34_spill] sm:$0xff]  ;;  %v8993_v30 = vld [vmem:[#allocation151_spill] sm:$0xff] }
 0x2c0   : > { %v2034_v57 = vsel %vm2028_vm6, %v8982_v14, %v8986_v35  ;;  %v1717_v7 = vmul.f32 %v8957_v37, %v1701_v51  ;;  %3188 = vrot.lane.b32.xlu1 %v6176_v53, %s5600_s17  ;;  %v1809_v31 = vmul.f32 %v8969_v43, %v1793_v15  ;;  %v1973_v9 = vmul.f32 %v8987_v47, %v1957_v49  ;;  %v8990_v14 = vld [vmem:[#allocation154_spill] sm:$0xff]  ;;  %v7334_v51 = vpop.permute.xlu0 %2911  ;;  %v8994_v15 = vld [vmem:[#allocation155_spill] sm:$0xff]  ;;  %s326_s17 = sand.u32 1, %s5578_s28  }
 0x2c1   : > { %3538 = vrot.lane.b32.xlu0 %v6188_v2, %s5604_s24  ;;  %v1974_v59 = vmul.f32 %v8987_v47, %v1958_v3  ;;  %v1944_v24 = vsel %vm1936_vm5, %v8985_v19, %v8988_v61  ;;  %v1870_v8 = vadd.f32 %v8989_v34, %v1815_v36  ;;  %v2049_v37 = vmul.f32 %v2033_v21, %v8990_v14  ;;  %v8995_v25 = vld [vmem:[#allocation111_spill] sm:$0xff]  ;;  %v7344_v10 = vpop.permute.xlu1 %2723  ;;  %v8997_v19 = vld [vmem:[#allocation29_spill] sm:$0xff]  ;;  %v8998_v61 = vld [vmem:[#allocation152_spill] sm:$0xff]  ;;  %s4904_s18 = scalar_lea.sflag [#allocation5], %s326_s17 }
 0x2c2   : > { %8991 = vst [vmem:[#allocation67_spill] sm:$0xff] %v7334_v51  ;;  %v7338_v46 = vrot.slane %v7312_v1, %v8963_v42  ;;  %v1959_v43 = vmul.f32 %v1943_v38, %v8993_v30  ;;  %v2050_v49 = vmul.f32 %v2034_v57, %v8994_v15  ;;  %v2125_v3 = vsel %vm2120_vm7, %v5305_v39, %v8995_v25  ;;  %v8999_v34 = vld [vmem:[#allocation103_spill] sm:$0xff]  ;;  %v9000_v30 = vld [vmem:[#allocation124_spill] sm:$0xff] }
 0x2c3   : > { %v1724_v50 = vadd.f32 %v1716_v28, %v1632_v0  ;;  %8996 = vst [vmem:[#allocation76_spill] sm:$0xff] %v7344_v10  ;;  %v5312_v36 = vunpack.i.h.bf16 %v8997_v19  ;;  %v1960_v21 = vmul.f32 %v1944_v24, %v8998_v61  ;;  %v2126_v14 = vsel %vm2120_vm7, %v8995_v25, %v8999_v34  ;;  %v9003_v57 = vld [vmem:[#allocation36_spill] sm:$0xff]  ;;  %v9005_v24 = vld [vmem:[#allocation101_spill] sm:$0xff] }
 0x2c4   : > { %8992 = vst [vmem:[#allocation31_spill] sm:$0xff] %v7338_v46  ;;  %v1725_v51 = vadd.f32 %v1717_v7, %v1633_v29  ;;  %3273 = vrot.lane.b32.xlu1 %v6036_v16, %s5598_s23  ;;  %v1981_v39 = vadd.f32 %v1973_v9, %v9000_v30  ;;  %v1982_v0 = vadd.f32 %v1974_v59, %v1870_v8  ;;  %v9004_v29 = vld [vmem:[#allocation109_spill] sm:$0xff]  ;;  %v9006_v9 = vld [vmem:[#allocation158_spill] sm:$0xff]  ;;  %v7372_v8 = vpop.permute.xlu0 %2917  ;;  %v9008_v30 = vld [vmem:[#allocation159_spill] sm:$0xff] }
 0x2c5   : > { %5412 = vrot.lane.b32.xlu0 %v8876_v56, %s5604_s24  ;;  %v7358_v28 = vrot.slane %v7312_v1, %v6602_v22  ;;  %v7362_v38 = vrot.slane %v7312_v1, %v6595_v60  ;;  %v2065_v25 = vmul.f32 %v9003_v57, %v2049_v37  ;;  %v2035_v7 = vsel %vm2028_vm6, %v8986_v35, %v9004_v29  ;;  %v7377_v37 = vpop.permute.xlu1 %2733 }
 0x2c6   : > { %v2036_v15 = vsel %vm2028_vm6, %v9004_v29, %v9005_v24  ;;  %v2141_v59 = vmul.f32 %v2125_v3, %v9006_v9  ;;  %9007 = vst [vmem:[#allocation131_spill] sm:$0xff] %v7372_v8  ;;  %v1975_v19 = vmul.f32 %v8987_v47, %v1959_v43  ;;  %v2066_v61 = vmul.f32 %v9003_v57, %v2050_v49  ;;  %v9010_v3 = vld [vmem:[#allocation156_spill] sm:$0xff]  ;;  %v9011_v24 = vld [vmem:[#allocation157_spill] sm:$0xff] }
 0x2c7   : > { %9001 = vst [vmem:[#allocation73_spill] sm:$0xff] %v7358_v28  ;;  %9002 = vst [vmem:[#allocation133_spill] sm:$0xff] %v7362_v38  ;;  %v2142_v40 = vmul.f32 %v2126_v14, %v9008_v30  ;;  %v1816_v38 = vadd.f32 %v1808_v62, %v1724_v50  ;;  %v1976_v28 = vmul.f32 %v8987_v47, %v1960_v21  ;;  %v9012_v43 = vld [vmem:[#allocation113_spill] sm:$0xff]  ;;  %v9013_v14 = vld [vmem:[#allocation114_spill] sm:$0xff] }
 0x2c8   : > { %9009 = vst [vmem:[#allocation33_spill] sm:$0xff] %v7377_v37  ;;  %v1817_v35 = vadd.f32 %v1809_v31, %v1725_v51  ;;  %5391 = vrot.lane.b32.xlu1 %v8876_v56, %s5598_s23  ;;  %v2051_v29 = vmul.f32 %v2035_v7, %v9010_v3  ;;  %v2052_v9 = vmul.f32 %v2036_v15, %v9011_v24  ;;  %v9014_v30 = vld [vmem:[#allocation38_spill] sm:$0xff]  ;;  %v9015_v31 = vld [vmem:[#allocation108_spill] sm:$0xff]  ;;  %v7394_v21 = vpop.permute.xlu0 %2921  ;;  %v9017_v15 = vld [vmem:[#allocation105_spill] sm:$0xff] }
 0x2c9   : > { %3757 = vperm.xlu0 %5417, %v6567_v12   ;;  %v2127_v49 = vsel %vm2120_vm7, %v8999_v34, %v9012_v43  ;;  %v2217_v62 = vsel %vm2212_vm8, %v5312_v36, %v9013_v14  ;;  %v2073_v50 = vadd.f32 %v2065_v25, %v1981_v39  ;;  %v2157_v47 = vmul.f32 %v9014_v30, %v2141_v59  ;;  %v9018_v34 = vld [vmem:[#allocation145_spill] sm:$0xff]  ;;  %v7401_v8 = vpop.permute.xlu1 %2818  ;;  %v9019_v39 = vld [vmem:[#allocation160_spill] sm:$0xff]  ;;  %v9020_v59 = vld [vmem:[#allocation162_spill] sm:$0xff] }
 0x2ca   : > { %v2218_v51 = vsel %vm2212_vm8, %v9013_v14, %v9015_v31  ;;  %9016 = vst [vmem:[#allocation74_spill] sm:$0xff] %v7394_v21  ;;  %v2074_v12 = vadd.f32 %v2066_v61, %v1982_v0  ;;  %v2158_v7 = vmul.f32 %v9014_v30, %v2142_v40  ;;  %v2128_v3 = vsel %vm2120_vm7, %v9012_v43, %v9017_v15  ;;  %v9021_v14 = vld [vmem:[#allocation136_spill] sm:$0xff]  ;;  %v9045_v21 = vld [vmem:[#allocation171_spill] sm:$0xff] }
 0x2cb   : > { %v1871_v24 = vadd.f32 %v9018_v34, %v1816_v38  ;;  %v5319_v36 = vunpack.i.h.bf16 %v8880_v63  ;;  %v2143_v25 = vmul.f32 %v2127_v49, %v9019_v39  ;;  %v2233_v37 = vmul.f32 %v2217_v62, %v9020_v59  ;;  %v9022_v38 = vld [vmem:[#allocation163_spill] sm:$0xff]  ;;  %v9024_v49 = vld [vmem:[#allocation161_spill] sm:$0xff]  ;;  %v9025_v15 = vld [vmem:[#allocation116_spill] sm:$0xff] }
 0x2cc   : > { %v1872_v46 = vadd.f32 %v9021_v14, %v1817_v35  ;;  %3283 = vrot.lane.b32.xlu1 %v6188_v2, %s5598_s23  ;;  %v2067_v40 = vmul.f32 %v9003_v57, %v2051_v29  ;;  %v2068_v0 = vmul.f32 %v9003_v57, %v2052_v9  ;;  %v2234_v61 = vmul.f32 %v2218_v51, %v9022_v38  ;;  %v9026_v39 = vld [vmem:[#allocation121_spill] sm:$0xff]  ;;  %v7425_v57 = vpop.permute.xlu0 %3136  ;;  %v9028_v51 = vld [vmem:[#allocation112_spill] sm:$0xff] }
 0x2cd   : > { %3619 = vrot.lane.b32.xlu0 %v6036_v16, %s5606_s25  ;;  %v8614_v43 = vmov 26   ;;  %v7417_v63 = vrot.slane %v7312_v1, %v8978_v55  ;;  %v2165_v35 = vadd.f32 %v2157_v47, %v2073_v50  ;;  %v2144_v62 = vmul.f32 %v2128_v3, %v9024_v49  ;;  %9027 = vst [vmem:[#allocation80_spill] sm:$0xff] %v7425_v57  ;;  %v7430_v1 = vpop.permute.xlu1 %5356  ;;  %v7432_v50 = vld [vmem:[#allocation6 + $0x40] ss:$8 sm:$0xf] }
 0x2ce   : > { %5428 = vset.pattern.permute.xlu0 %v8614_v43  ;;  %v2219_v34 = vsel %vm2212_vm8, %v9015_v31, %v9025_v15  ;;  %v2308_v29 = vsel %vm1491_vm1, %v5319_v36, %v9026_v39  ;;  %v2166_v9 = vadd.f32 %v2158_v7, %v2074_v12  ;;  %v2309_v59 = vsel %vm1491_vm1, %v9026_v39, %v9028_v51  ;;  %v9029_v47 = vld [vmem:[#allocation35_spill] sm:$0xff]  ;;  %v9030_v31 = vld [vmem:[#allocation42_spill] sm:$0xff]  ;;  %v9034_v57 = vld [vmem:[#allocation168_spill] sm:$0xff] }
 0x2cf   : > { %9023 = vst [vmem:[#allocation71_spill] sm:$0xff] %v7417_v63  ;;  %v1983_v14 = vadd.f32 %v1975_v19, %v1871_v24  ;;  %v5326_v3 = vunpack.i.h.bf16 %v9029_v47  ;;  %v2159_v38 = vmul.f32 %v9014_v30, %v2143_v25  ;;  %v2249_v49 = vmul.f32 %v9030_v31, %v2233_v37  ;;  %v9031_v7 = vld [vmem:[#allocation110_spill] sm:$0xff]  ;;  %v9032_v24 = vld [vmem:[#allocation164_spill] sm:$0xff]  ;;  %v9038_v63 = vld [vmem:[#allocation119_spill] sm:$0xff] }
 0x2d0   : > { %v1984_v43 = vadd.f32 %v1976_v28, %v1872_v46  ;;  %3460 = vperm.xlu1 %5395, %v6615_v33   ;;  %v2250_v12 = vmul.f32 %v9030_v31, %v2234_v61  ;;  %v2220_v19 = vsel %vm2212_vm8, %v9025_v15, %v9031_v7  ;;  %v2235_v36 = vmul.f32 %v2219_v34, %v9032_v24  ;;  %v9033_v39 = vld [vmem:[#allocation166_spill] sm:$0xff]  ;;  %v9035_v46 = vld [vmem:[#allocation127_spill] sm:$0xff]  ;;  %v7450_v28 = vpop.permute.xlu0 %2998 }
 0x2d1   : > { %5419 = vrot.lane.b32.xlu0 %v8876_v56, %s5606_s25  ;;  %v2324_v47 = vmul.f32 %v2308_v29, %v9033_v39  ;;  %v2160_v25 = vmul.f32 %v9014_v30, %v2144_v62  ;;  %v2325_v37 = vmul.f32 %v2309_v59, %v9034_v57  ;;  %v2399_v33 = vsel %vm1585_vm2, %v5326_v3, %v9035_v46  ;;  %v7459_v7 = vpop.permute.xlu1 %2828  ;;  %v9042_v29 = vld [vmem:[#allocation41_spill] sm:$0xff] }
 0x2d2   : > { %9036 = vst [vmem:[#allocation173_spill] sm:$0xff] %v7450_v28  ;;  %v7454_v61 = vrot.slane %v7432_v50, %v8963_v42  ;;  %v2400_v15 = vsel %vm1585_vm2, %v9035_v46, %v9038_v63  ;;  %v2075_v34 = vadd.f32 %v2067_v40, %v1983_v14  ;;  %9039 = vst [vmem:[#allocation169_spill] sm:$0xff] %v7459_v7  ;;  %v5333_v57 = vunpack.i.h.bf16 %v9042_v29  ;;  %v9043_v3 = vld [vmem:[#allocation165_spill] sm:$0xff]  ;;  %v9044_v46 = vld [vmem:[#allocation44_spill] sm:$0xff] }
 0x2d3   : > { %v7463_v30 = vrot.slane %v7432_v50, %v6602_v22  ;;  %v7467_v62 = vrot.slane %v7432_v50, %v6595_v60  ;;  %v2257_v59 = vadd.f32 %v2249_v49, %v2165_v35  ;;  %v2236_v24 = vmul.f32 %v2220_v19, %v9043_v3  ;;  %v9047_v49 = vld [vmem:[#allocation122_spill] sm:$0xff] }
 0x2d4   : > { %9037 = vst [vmem:[#allocation77_spill] sm:$0xff] %v7454_v61  ;;  %v2076_v39 = vadd.f32 %v2068_v0, %v1984_v43  ;;  %3269 = vrot.lane.b32.xlu1 %v6026_v11, %s5598_s23  ;;  %v2258_v40 = vadd.f32 %v2250_v12, %v2166_v9  ;;  %v2251_v14 = vmul.f32 %v9030_v31, %v2235_v36  ;;  %v9048_v43 = vld [vmem:[#allocation115_spill] sm:$0xff]  ;;  %v7487_v12 = vpop.permute.xlu0 %3002  ;;  %v9050_v36 = vld [vmem:[#allocation144_spill] sm:$0xff]  ;;  %v9059_v61 = vld [vmem:[#allocation177_spill] sm:$0xff] }
 0x2d5   : > { %9040 = vst [vmem:[#allocation37_spill] sm:$0xff] %v7463_v30  ;;  %9041 = vst [vmem:[#allocation78_spill] sm:$0xff] %v7467_v62  ;;  %3631 = vrot.lane.b32.xlu0 %v6226_v17, %s5606_s25  ;;  %v2340_v28 = vmul.f32 %v9044_v46, %v2324_v47  ;;  %v2415_v30 = vmul.f32 %v2399_v33, %v9045_v21  ;;  %v9046_v62 = vmov 23   ;;  %v2341_v35 = vmul.f32 %v9044_v46, %v2325_v37  ;;  %v9051_v47 = vld [vmem:[#allocation123_spill] sm:$0xff]  ;;  %v7497_v29 = vpop.permute.xlu1 %3041 }
 0x2d6   : > { %5402 = vset.pattern.permute.xlu1 %v9046_v62  ;;  %v2310_v0 = vsel %vm1491_vm1, %v9028_v51, %v9047_v49  ;;  %v2311_v19 = vsel %vm1491_vm1, %v9047_v49, %v9048_v43  ;;  %v2416_v9 = vmul.f32 %v2400_v15, %v8908_v44  ;;  %9049 = vst [vmem:[#allocation84_spill] sm:$0xff] %v7487_v12  ;;  %v9052_v33 = vld [vmem:[#allocation167_spill] sm:$0xff]  ;;  %9053 = vst [vmem:[#allocation81_spill] sm:$0xff] %v7497_v29  ;;  %v9054_v49 = vld [vmem:[#allocation132_spill] sm:$0xff] }
 0x2d7   : > { %v2401_v21 = vsel %vm1585_vm2, %v9038_v63, %v9050_v36  ;;  %v2402_v37 = vsel %vm1585_vm2, %v9050_v36, %v9051_v47  ;;  %v2490_v62 = vsel %vm1677_vm3, %v5333_v57, %v9052_v33  ;;  %v2167_v51 = vadd.f32 %v2159_v38, %v2075_v34  ;;  %v7505_v63 = vld [vmem:[#allocation3] sm:$0xff]  ;;  %v9055_v57 = vld [vmem:[#allocation170_spill] sm:$0xff] }
 0x2d8   : > { %v2252_v3 = vmul.f32 %v9030_v31, %v2236_v24  ;;  %v2491_v44 = vsel %vm1677_vm3, %v9052_v33, %v9054_v49  ;;  %v2168_v15 = vadd.f32 %v2160_v25, %v2076_v39  ;;  %3279 = vrot.lane.b32.xlu1 %v6176_v53, %s5598_s23  ;;  %v2326_v43 = vmul.f32 %v2310_v0, %v8912_v5  ;;  %v9056_v34 = vld [vmem:[#allocation46_spill] sm:$0xff]  ;;  %v9058_v25 = vld [vmem:[#allocation176_spill] sm:$0xff]  ;;  %v7515_v17 = vpop.permute.xlu0 %3008  ;;  %v9060_v0 = vld [vmem:[#allocation45_spill] sm:$0xff] }
 0x2d9   : > { %3844 = vperm.xlu0 %5428, %v7505_v63   ;;  %v2327_v38 = vmul.f32 %v2311_v19, %v9055_v57  ;;  %v2431_v36 = vmul.f32 %v9056_v34, %v2415_v30  ;;  %v2432_v31 = vmul.f32 %v9056_v34, %v2416_v9  ;;  %v9057_v24 = vld [vmem:[#allocation174_spill] sm:$0xff]  ;;  %v2418_v33 = vmul.f32 %v2402_v37, %v8927_v20  ;;  %v7518_v5 = vpop.permute.xlu1 %2814  ;;  %v9061_v30 = vld [vmem:[#allocation51_spill] sm:$0xff] }
 0x2da   : > { %v2417_v47 = vmul.f32 %v2401_v21, %v9057_v24  ;;  %v2506_v39 = vmul.f32 %v2490_v62, %v9058_v25  ;;  %v2348_v29 = vadd.f32 %v2340_v28, %v2257_v59  ;;  %v2349_v12 = vadd.f32 %v2341_v35, %v2258_v40  ;;  %v9062_v40 = vld [vmem:[#allocation153_spill] sm:$0xff]  ;;  %v9067_v24 = vld [vmem:[#allocation180_spill] sm:$0xff] }
 0x2db   : > { %v2507_v7 = vmul.f32 %v2491_v44, %v9059_v61  ;;  %v2259_v10 = vadd.f32 %v2251_v14, %v2167_v51  ;;  %v5340_v19 = vunpack.i.h.bf16 %v9060_v0  ;;  %v2492_v9 = vsel %vm1677_vm3, %v9054_v49, %v9061_v30  ;;  %v7543_v44 = vld [vmem:[#allocation6 + $0x41] ss:$8 sm:$0xf] }
 0x2dc   : > { %v2260_v21 = vadd.f32 %v2252_v3, %v2168_v15  ;;  %3364 = vrot.lane.b32.xlu1 %v6036_v16, %s5601_s22  ;;  %v7530_v20 = vrot.slane %v7432_v50, %v8978_v55  ;;  %v2342_v28 = vmul.f32 %v9044_v46, %v2326_v43  ;;  %v2343_v61 = vmul.f32 %v9044_v46, %v2327_v38  ;;  %v9064_v3 = vld [vmem:[#allocation49_spill] sm:$0xff]  ;;  %v7541_v50 = vpop.permute.xlu0 %3012  ;;  %v9065_v15 = vld [vmem:[#allocation172_spill] sm:$0xff] }
 0x2dd   : > { %3627 = vrot.lane.b32.xlu0 %v6194_v4, %s5606_s25  ;;  %v2439_v59 = vadd.f32 %v2431_v36, %v2348_v29  ;;  %v2493_v14 = vsel %vm1677_vm3, %v9061_v30, %v9062_v40  ;;  %v9063_v35 = vmov 0   ;;  %v2440_v37 = vadd.f32 %v2432_v31, %v2349_v12  ;;  %v9066_v43 = vld [vmem:[#allocation56_spill] sm:$0xff]  ;;  %v7550_v12 = vpop.permute.xlu1 %2824 }
 0x2de   : > { %5451 = vset.pattern.permute.xlu0 %v9063_v35  ;;  %v2433_v62 = vmul.f32 %v9056_v34, %v2417_v47  ;;  %v2434_v51 = vmul.f32 %v9056_v34, %v2418_v33  ;;  %v2522_v49 = vmul.f32 %v9064_v3, %v2506_v39  ;;  %v2523_v46 = vmul.f32 %v9064_v3, %v2507_v7  ;;  %v9068_v33 = vld [vmem:[#allocation88_spill] sm:$0xff] }
 0x2df   : > { %v2508_v29 = vmul.f32 %v2492_v9, %v6869_v18  ;;  %v2582_v57 = vsel %vm1769_vm4, %v9066_v43, %v9065_v15  ;;  %v2350_v38 = vadd.f32 %v2342_v28, %v2259_v10  ;;  %v2509_v36 = vmul.f32 %v2493_v14, %v8934_v52  ;;  %v9069_v39 = vld [vmem:[#allocation52_spill] sm:$0xff] }
 0x2e0   : > { %v2581_v34 = vsel %vm1769_vm4, %v5340_v19, %v9066_v43  ;;  %v2351_v31 = vadd.f32 %v2343_v61, %v2260_v21  ;;  %5398 = vrot.lane.b32.xlu1 %v8876_v56, %s5601_s22  ;;  %v7561_v18 = vrot.slane %v7543_v44, %v8963_v42  ;;  %v7565_v10 = vrot.slane %v7543_v44, %v6602_v22  ;;  %v7580_v19 = vpop.permute.xlu0 %3227  ;;  %v9071_v21 = vld [vmem:[#allocation179_spill] sm:$0xff] }
 0x2e1   : > { %3712 = vrot.lane.b32.xlu0 %v6070_v27, %s5608_s10  ;;  %v7569_v52 = vrot.slane %v7543_v44, %v6595_v60  ;;  %v7571_v7 = vadd.f32 %v2522_v49, %v2439_v59  ;;  %v2598_v47 = vmul.f32 %v2582_v57, %v9067_v24  ;;  %v2583_v25 = vsel %vm1769_vm4, %v9065_v15, %v9068_v33  ;;  %v7584_v59 = vpop.permute.xlu1 %2909  ;;  %v9072_v49 = vld [vmem:[#allocation53_spill] sm:$0xff]  ;;  %v9075_v57 = vld [vmem:[#allocation138_spill] sm:$0xff]  ;;  %v9077_v24 = vld [vmem:[#allocation60_spill] sm:$0xff] }
 0x2e2   : > { %v2584_v0 = vsel %vm1769_vm4, %v9068_v33, %v9069_v39  ;;  %9070 = vst [vmem:[#allocation75_spill] sm:$0xff] %v7580_v19  ;;  %v2531_v30 = vadd.f32 %v2523_v46, %v2440_v37  ;;  %v2524_v9 = vmul.f32 %v9064_v3, %v2508_v29  ;;  %v2597_v28 = vmul.f32 %v2581_v34, %v9071_v21  ;;  %v9073_v29 = vld [vmem:[#allocation137_spill] sm:$0xff] }
 0x2e3   : > { %v2441_v61 = vadd.f32 %v2433_v62, %v2350_v38  ;;  %v2525_v40 = vmul.f32 %v9064_v3, %v2509_v36  ;;  %v2442_v14 = vadd.f32 %v2434_v51, %v2351_v31  ;;  %v2614_v43 = vmul.f32 %v9072_v49, %v2598_v47  ;;  %v9074_v3 = vld [vmem:[#allocation57_spill] sm:$0xff]  ;;  %v9076_v36 = vld [vmem:[#allocation140_spill] sm:$0xff] }
 0x2e4   : > { %v5352_v15 = vunpack.i.h.bf16 %v7255_v45  ;;  %3374 = vrot.lane.b32.xlu1 %v6188_v2, %s5601_s22  ;;  %v2599_v37 = vmul.f32 %v2583_v25, %v6932_v48  ;;  %v2600_v46 = vmul.f32 %v2584_v0, %v6935_v26  ;;  %v7596_v62 = vmul.f32 %v9072_v49, %v2597_v28  ;;  %v7610_v26 = vpop.permute.xlu0 %3089 }
 0x2e5   : > { %3720 = vrot.lane.b32.xlu0 %v6188_v2, %s5608_s10  ;;  %v2665_v51 = vmul.f32 %v9074_v3, %v9073_v29  ;;  %v2666_v38 = vmul.f32 %v9074_v3, %v9075_v57  ;;  %v2667_v34 = vmul.f32 %v9074_v3, %v9076_v36  ;;  %v2744_v31 = vsel %vm1936_vm5, %v7191_v54, %v7225_v23  ;;  %v7615_v0 = vpop.permute.xlu1 %5363  ;;  %v9079_v29 = vld [vmem:[#allocation55_spill] sm:$0xff] }
 0x2e6   : > { %v2745_v48 = vsel %vm1936_vm5, %v7225_v23, %v9077_v24  ;;  %9078 = vst [vmem:[#allocation43_spill] sm:$0xff] %v7610_v26  ;;  %v2532_v47 = vadd.f32 %v2524_v9, %v2441_v61  ;;  %v2615_v33 = vmul.f32 %v9072_v49, %v2599_v37  ;;  %v2616_v25 = vmul.f32 %v9072_v49, %v2600_v46  ;;  %v9080_v23 = vld [vmem:[#allocation141_spill] sm:$0xff]  ;;  %v9081_v61 = vld [vmem:[#allocation68_spill] sm:$0xff]  ;;  %v9082_v37 = vld [vmem:[#allocation27_spill] sm:$0xff] }
 0x2e7   : > { %v5351_v39 = vunpack.i.l.bf16 %v7255_v45  ;;  %v2533_v21 = vadd.f32 %v2525_v40, %v2442_v14  ;;  %v2622_v28 = vadd.f32 %v2614_v43, %v2531_v30  ;;  %v2750_v57 = vsel %vm1936_vm5, %v9079_v29, %v5352_v15  ;;  %v9083_v40 = vld [vmem:[#allocation146_spill] sm:$0xff] }
 0x2e8   : > { %3571 = vperm.xlu1 %5402, %v7505_v63   ;;  %v7624_v9 = vmul.f32 %v9074_v3, %v9080_v23  ;;  %v2673_v49 = vadd.f32 %v2665_v51, %v9081_v61  ;;  %v2760_v45 = vmul.f32 %v2744_v31, %v9082_v37  ;;  %v2761_v46 = vmul.f32 %v2745_v48, %v7247_v32  ;;  %v9084_v14 = vld [vmem:[#allocation58_spill] sm:$0xff]  ;;  %v7635_v36 = vpop.permute.xlu0 %3093  ;;  %v9092_v61 = vld [vmem:[#allocation24_spill] sm:$0xff] }
 0x2e9   : > { %5436 = vrot.lane.b32.xlu0 %v8876_v56, %s5608_s10  ;;  %v7630_v30 = vadd.f32 %v2667_v34, %v7305_v41  ;;  %v2669_v43 = vmul.f32 %v9084_v14, %v9083_v40  ;;  %v2674_v15 = vadd.f32 %v2666_v38, %v7308_v6  ;;  %9085 = vst [vmem:[#allocation82_spill] sm:$0xff] %v7635_v36  ;;  %v5358_v31 = vunpack.i.l.bf16 %v7430_v1  ;;  %v7641_v23 = vpop.permute.xlu1 %2919  ;;  %v9086_v41 = vld [vmem:[#allocation23_spill] sm:$0xff] }
 0x2ea   : > { %v2623_v19 = vadd.f32 %v2615_v33, %v2532_v47  ;;  %v2766_v3 = vmul.f32 %v2750_v57, %v7253_v58  ;;  %v2746_v51 = vsel %vm1936_vm5, %v9077_v24, %v5351_v39  ;;  %v2624_v48 = vadd.f32 %v2616_v25, %v2533_v21  ;;  %v9087_v38 = vld [vmem:[#allocation147_spill] sm:$0xff]  ;;  %v9088_v47 = vld [vmem:[#allocation148_spill] sm:$0xff]  ;;  %v9089_v25 = vld [vmem:[#allocation54_spill] sm:$0xff] }
 0x2eb   : > { %v2748_v34 = vsel %vm1936_vm5, %v9086_v41, %v7283_v13  ;;  %v2749_v6 = vsel %vm1936_vm5, %v7283_v13, %v9079_v29  ;;  %v2670_v24 = vmul.f32 %v9084_v14, %v9087_v38  ;;  %v2671_v33 = vmul.f32 %v9084_v14, %v9088_v47  ;;  %v9091_v29 = vld [vmem:[#allocation62_spill] sm:$0xff]  ;;  %v9094_v47 = vld [vmem:[#allocation64_spill] sm:$0xff] }
 0x2ec   : > { %3360 = vrot.lane.b32.xlu1 %v6026_v11, %s5601_s22  ;;  %v2776_v39 = vmul.f32 %v9089_v25, %v2760_v45  ;;  %v2777_v21 = vmul.f32 %v9089_v25, %v2761_v46  ;;  %v9090_v57 = vmov 24   ;;  %v2762_v13 = vmul.f32 %v2746_v51, %v7253_v58  ;;  %v7668_v35 = vpop.permute.xlu0 %3099 }
 0x2ed   : > { %3718 = vrot.lane.b32.xlu0 %v6194_v4, %s5608_s10  ;;  %5405 = vset.pattern.permute.xlu1 %v9090_v57  ;;  %v2835_v11 = vsel %vm2028_vm6, %v9091_v29, %v7401_v8  ;;  %v2836_v40 = vsel %vm2028_vm6, %v7401_v8, %v9092_v61  ;;  %v5359_v38 = vunpack.i.h.bf16 %v7430_v1  ;;  %9093 = vst [vmem:[#allocation79_spill] sm:$0xff] %v7668_v35  ;;  %v7675_v51 = vpop.permute.xlu1 %3132  ;;  %v9096_v1 = vld [vmem:[#allocation76_spill] sm:$0xff]  ;;  %v9109_v35 = vld [vmem:[#allocation65_spill] sm:$0xff]  ;;  %v9113_v4 = vld [vmem:[#allocation74_spill] sm:$0xff] }
 0x2ee   : > { %v2782_v45 = vmul.f32 %v9094_v47, %v2766_v3  ;;  %v2764_v46 = vmul.f32 %v2748_v34, %v9082_v37  ;;  %v2765_v57 = vmul.f32 %v2749_v6, %v7247_v32  ;;  %v2837_v58 = vsel %vm2028_vm6, %v9092_v61, %v5358_v31  ;;  %9095 = vst [vmem:[#allocation175_spill] sm:$0xff] %v7675_v51  ;;  %v9097_v32 = vld [vmem:[#allocation31_spill] sm:$0xff]  ;;  %v9098_v34 = vld [vmem:[#allocation73_spill] sm:$0xff] }
 0x2ef   : > { %v2679_v60 = vadd.f32 %v2671_v33, %v2624_v48  ;;  %v2677_v36 = vadd.f32 %v2669_v43, %v2622_v28  ;;  %v2678_v26 = vadd.f32 %v2670_v24, %v2623_v19  ;;  %v2784_v8 = vadd.f32 %v2776_v39, %v2673_v49  ;;  %v9099_v28 = vld [vmem:[#allocation63_spill] sm:$0xff]  ;;  %v9100_v43 = vld [vmem:[#allocation133_spill] sm:$0xff] }
 0x2f0   : > { %3370 = vrot.lane.b32.xlu1 %v6176_v53, %s5601_s22  ;;  %v2743_v37 = vsel %vm1936_vm5, %v9096_v1, %v7191_v54  ;;  %v2851_v3 = vmul.f32 %v2835_v11, %v9097_v32  ;;  %v2852_v31 = vmul.f32 %v2836_v40, %v9098_v34  ;;  %v2785_v6 = vadd.f32 %v2777_v21, %v2674_v15  ;;  %v7690_v24 = vpop.permute.xlu0 %3103  ;;  %v9102_v54 = vld [vmem:[#allocation70_spill] sm:$0xff]  ;;  %v9103_v15 = vld [vmem:[#allocation32_spill] sm:$0xff]  ;;  %v9110_v51 = vld [vmem:[#allocation77_spill] sm:$0xff]  ;;  %s5007_s22 = sshll.u32 %s326_s17, 5 }
 0x2f1   : > { %3803 = vrot.lane.b32.xlu0 %v6070_v27, %s5610_s12  ;;  %v2778_v48 = vmul.f32 %v9089_v25, %v2762_v13  ;;  %v2841_v19 = vsel %vm2028_vm6, %v9099_v28, %v5359_v38  ;;  %v2853_v53 = vmul.f32 %v2837_v58, %v9100_v43  ;;  %9101 = vst [vmem:[#allocation85_spill] sm:$0xff] %v7690_v24  ;;  %v7697_v61 = vpop.permute.xlu1 %2905  ;;  %v9104_v13 = vld [vmem:[#allocation33_spill] sm:$0xff]  ;;  %v9105_v38 = vld [vmem:[#allocation67_spill] sm:$0xff] }
 0x2f2   : > { %v2790_v33 = vadd.f32 %v2782_v45, %v2679_v60  ;;  %v2780_v49 = vmul.f32 %v9094_v47, %v2764_v46  ;;  %v2781_v39 = vmul.f32 %v9094_v47, %v2765_v57  ;;  %v2926_v11 = vsel %vm2120_vm7, %v9102_v54, %v7584_v59  ;;  %v7707_v46 = vld [vmem:[#allocation3 + $0x8] sm:$0xff]  ;;  %v9107_v57 = vld [vmem:[#allocation59_spill] sm:$0xff] }
 0x2f3   : > { %v2759_v21 = vmul.f32 %v2743_v37, %v9103_v15  ;;  %v2747_v40 = vsel %vm1936_vm5, %v9104_v13, %v9086_v41  ;;  %v2927_v60 = vsel %vm2120_vm7, %v7584_v59, %v9105_v38  ;;  %v5366_v45 = vunpack.i.h.bf16 %v7615_v0  ;;  %9106 = vst [vmem:[#allocation17_spill] sm:$0xff] %v7707_v46  ;;  %v9108_v59 = vld [vmem:[#allocation169_spill] sm:$0xff] }
 0x2f4   : > { %3666 = vperm.xlu1 %5405, %v7707_v46   ;;  %v2867_v58 = vmul.f32 %v9107_v57, %v2851_v3  ;;  %v2868_v1 = vmul.f32 %v9107_v57, %v2852_v31  ;;  %v2857_v37 = vmul.f32 %v2841_v19, %v9100_v43  ;;  %v5365_v41 = vunpack.i.l.bf16 %v7615_v0  ;;  %v7724_v22 = vpop.permute.xlu0 %3318  ;;  %v9112_v43 = vld [vmem:[#allocation37_spill] sm:$0xff] }
 0x2f5   : > { %3811 = vrot.lane.b32.xlu0 %v6188_v2, %s5610_s12  ;;  %v2869_v13 = vmul.f32 %v9107_v57, %v2853_v53  ;;  %v2839_v24 = vsel %vm2028_vm6, %v9109_v35, %v9108_v59  ;;  %v2840_v46 = vsel %vm2028_vm6, %v9108_v59, %v9099_v28  ;;  %v2942_v2 = vmul.f32 %v2926_v11, %v9110_v51  ;;  %v7728_v42 = vpop.permute.xlu1 %2915  ;;  %v9115_v11 = vld [vmem:[#allocation50_spill] sm:$0xff] }
 0x2f6   : > { %9111 = vst [vmem:[#allocation86_spill] sm:$0xff] %v7724_v22  ;;  %v2786_v3 = vadd.f32 %v2778_v48, %v7630_v30  ;;  %v2788_v31 = vadd.f32 %v2780_v49, %v2677_v36  ;;  %v2789_v19 = vadd.f32 %v2781_v39, %v2678_v26  ;;  %v2943_v0 = vmul.f32 %v2927_v60, %v9112_v43  ;;  %v3868_v49 = vld [vmem:[%s8430_s4 + $0x8] sm:$0xff] }
 0x2f7   : > { %v7731_v53 = vmul.f32 %v9089_v25, %v2759_v21  ;;  %v7734_v27 = vmul.f32 %v2747_v40, %v9103_v15  ;;  %v2932_v28 = vsel %vm2120_vm7, %v9113_v4, %v5366_v45  ;;  %v2875_v26 = vadd.f32 %v2867_v58, %v2784_v8  ;;  %v9116_v40 = vld [vmem:[#allocation69_spill] sm:$0xff] }
 0x2f8   : > { %3528 = vrot.lane.b32.xlu1 %v6036_v16, %s5604_s24  ;;  %v2855_v30 = vmul.f32 %v2839_v24, %v9097_v32  ;;  %v2856_v36 = vmul.f32 %v2840_v46, %v9098_v34  ;;  %v2928_v25 = vsel %vm2120_vm7, %v9105_v38, %v5365_v41  ;;  %v9114_v48 = vmov 25   ;;  %v7752_v8 = vpop.permute.xlu0 %3180  ;;  %v9118_v34 = vld [vmem:[#allocation78_spill] sm:$0xff]  ;;  %v9119_v38 = vld [vmem:[#allocation131_spill] sm:$0xff]  ;;  %v9123_v22 = vld [vmem:[#allocation61_spill] sm:$0xff] }
 0x2f9   : > { %5446 = vrot.lane.b32.xlu0 %v8876_v56, %s5610_s12  ;;  %5416 = vset.pattern.permute.xlu1 %v9114_v48  ;;  %v2876_v39 = vadd.f32 %v2868_v1, %v2785_v6  ;;  %v2873_v15 = vmul.f32 %v9115_v11, %v2857_v37  ;;  %v2877_v21 = vadd.f32 %v2869_v13, %v2786_v3  ;;  %v3001_v6 = vpop.permute.xlu1 %3000  ;;  %v9120_v1 = vld [vmem:[#allocation173_spill] sm:$0xff]  ;;  %v9121_v37 = vld [vmem:[#allocation84_spill] sm:$0xff] }
 0x2fa   : > { %v2958_v60 = vmul.f32 %v9116_v40, %v2942_v2  ;;  %9117 = vst [vmem:[#allocation178_spill] sm:$0xff] %v7752_v8  ;;  %v2959_v32 = vmul.f32 %v9116_v40, %v2943_v0  ;;  %v2948_v24 = vmul.f32 %v2932_v28, %v9118_v34  ;;  %v2930_v45 = vsel %vm2120_vm7, %v9119_v38, %v7641_v23 }
 0x2fb   : > { %v2931_v46 = vsel %vm2120_vm7, %v7641_v23, %v9113_v4  ;;  %v2944_v58 = vmul.f32 %v2928_v25, %v9118_v34  ;;  %v3017_v2 = vsel %vm2212_vm8, %v9120_v1, %v3001_v6  ;;  %v3018_v41 = vsel %vm2212_vm8, %v3001_v6, %v9121_v37  ;;  %v3904_v23 = vld [vmem:[%s8433_s7] sm:$0xff]  ;;  %v9122_v34 = vld [vmem:[#allocation81_spill] sm:$0xff] }
 0x2fc   : > { %5407 = vrot.lane.b32.xlu1 %v8876_v56, %s5604_s24  ;;  %v2871_v13 = vmul.f32 %v9115_v11, %v2855_v30  ;;  %v2872_v59 = vmul.f32 %v9115_v11, %v2856_v36  ;;  %v3033_v3 = vmul.f32 %v3017_v2, %v7561_v18  ;;  %v3034_v4 = vmul.f32 %v3018_v41, %v7565_v10  ;;  %v7781_v30 = vpop.permute.xlu0 %3184 }
 0x2fd   : > { %3876 = vperm.xlu0 %5451, %v3868_v49   ;;  %v2881_v0 = vadd.f32 %v2873_v15, %v2790_v33  ;;  %v2834_v28 = vsel %vm2028_vm6, %v7518_v5, %v9091_v29  ;;  %v2946_v25 = vmul.f32 %v2930_v45, %v9110_v51  ;;  %v2947_v48 = vmul.f32 %v2931_v46, %v9112_v43  ;;  %v5371_v41 = vpop.permute.xlu1 %5370  ;;  %v9124_v5 = vld [vmem:[#allocation47_spill] sm:$0xff] }
 0x2fe   : > { %v2966_v36 = vadd.f32 %v2958_v60, %v2875_v26  ;;  %v2967_v49 = vadd.f32 %v2959_v32, %v2876_v39  ;;  %v3049_v6 = vmul.f32 %v9122_v34, %v3033_v3  ;;  %v3050_v2 = vmul.f32 %v9122_v34, %v3034_v4  ;;  %v9125_v46 = vld [vmem:[#allocation71_spill] sm:$0xff] }
 0x2ff   : > { %v2964_v8 = vmul.f32 %v9123_v22, %v2948_v24  ;;  %v2960_v33 = vmul.f32 %v9116_v40, %v2944_v58  ;;  %v5373_v15 = vunpack.i.h.bf16 %v5371_v41  ;;  %v5372_v16 = vunpack.i.l.bf16 %v5371_v41  ;;  %v9129_v41 = vld [vmem:[#allocation19_spill] sm:$0xff] }
 0x300   : > { %3540 = vrot.lane.b32.xlu1 %v9124_v5, %s5604_s24  ;;  %v2879_v29 = vadd.f32 %v2871_v13, %v2788_v31  ;;  %v2880_v51 = vadd.f32 %v2872_v59, %v2789_v19  ;;  %v7789_v43 = vadd.f32 %v3049_v6, %v2966_v36  ;;  %v7791_v26 = vadd.f32 %v3050_v2, %v2967_v49  ;;  %v7799_v45 = vpop.permute.xlu0 %3190 }
 0x301   : > { %3907 = vperm.xlu0 %5451, %v3904_v23   ;;  %v2962_v39 = vmul.f32 %v9123_v22, %v2946_v25  ;;  %v2963_v60 = vmul.f32 %v9123_v22, %v2947_v48  ;;  %v3023_v32 = vsel %vm2212_vm8, %v7541_v50, %v5373_v15  ;;  %v3019_v24 = vsel %vm2212_vm8, %v9121_v37, %v5372_v16  ;;  %v3011_v59 = vpop.permute.xlu1 %3010  ;;  %v9126_v37 = vld [vmem:[#allocation72_spill] sm:$0xff] }
 0x302   : > { %v2850_v58 = vmul.f32 %v2834_v28, %v9125_v46  ;;  %v2925_v31 = vsel %vm2120_vm7, %v7697_v61, %v9102_v54  ;;  %v3039_v19 = vmul.f32 %v3023_v32, %v7569_v52  ;;  %v3035_v13 = vmul.f32 %v3019_v24, %v7569_v52 }
 0x303   : > { %v2968_v3 = vadd.f32 %v2960_v33, %v2877_v21  ;;  %v2972_v4 = vadd.f32 %v2964_v8, %v2881_v0  ;;  %v3021_v23 = vsel %vm2212_vm8, %v7515_v17, %v3011_v59  ;;  %v3022_v16 = vsel %vm2212_vm8, %v3011_v59, %v7541_v50  ;;  %v9132_v59 = vld [vmem:[#allocation22_spill] sm:$0xff] }
 0x304   : > { %3753 = vperm.xlu1 %5416, %v7505_v63   ;;  %v3055_v28 = vmul.f32 %v9126_v37, %v3039_v19  ;;  %v3051_v25 = vmul.f32 %v9122_v34, %v3035_v13  ;;  %v3037_v54 = vmul.f32 %v3021_v23, %v7561_v18  ;;  %v3038_v61 = vmul.f32 %v3022_v16, %v7565_v10  ;;  %v7820_v48 = vpop.permute.xlu0 %3194  ;;  %v9127_v10 = vld [vmem:[#allocation142_spill] sm:$0xff] }
 0x305   : > { %v2838_v52 = vsel %vm2028_vm6, %v7550_v12, %v9109_v35  ;;  %v2970_v21 = vadd.f32 %v2962_v39, %v2879_v29  ;;  %v2971_v8 = vadd.f32 %v2963_v60, %v2880_v51  ;;  %v2941_v0 = vmul.f32 %v2925_v31, %v7530_v20  ;;  %v7828_v49 = vpop.permute.xlu1 %3223  ;;  %v9128_v35 = vld [vmem:[#allocation66_spill] sm:$0xff] }
 0x306   : > { %v7822_v50 = vadd.f32 %v3051_v25, %v2968_v3  ;;  %v7824_v63 = vadd.f32 %v3055_v28, %v2972_v4  ;;  %v3053_v36 = vmul.f32 %v9126_v37, %v3037_v54  ;;  %v3054_v18 = vmul.f32 %v9126_v37, %v3038_v61  ;;  %v9133_v3 = vld [vmem:[#allocation117_spill] sm:$0xff]  ;;  %v9134_v28 = vld [vmem:[#allocation120_spill] sm:$0xff] }
 0x307   : > { %v2668_v6 = vmul.f32 %v9084_v14, %v9127_v10  ;;  %v2672_v12 = vadd.f32 %v7624_v9, %v9128_v35  ;;  %v2929_v2 = vsel %vm2120_vm7, %v7728_v42, %v9119_v38  ;;  %v2979_v33 = vrot.slane %v7543_v44, %v8978_v55  ;;  %v9138_v35 = vld [vmem:[#allocation175_spill] sm:$0xff] }
 0x308   : > { %3526 = vrot.lane.b32.xlu1 %v9129_v41, %s5604_s24  ;;  %v2866_v15 = vmul.f32 %v9107_v57, %v2850_v58  ;;  %v2854_v29 = vmul.f32 %v2838_v52, %v9125_v46  ;;  %v7843_v51 = vadd.f32 %v3053_v36, %v2970_v21  ;;  %v7845_v14 = vadd.f32 %v3054_v18, %v2971_v8  ;;  %v7850_v42 = vpop.permute.xlu0 %3409  ;;  %v9131_v46 = vld [vmem:[#allocation40_spill] sm:$0xff]  ;;  %v9135_v52 = vld [vmem:[#allocation43_spill] sm:$0xff] }
 0x309   : > { %v9130_v39 = vmov 26   ;;  %v2621_v9 = vadd.f32 %v7596_v62, %v7571_v7  ;;  %v2783_v38 = vadd.f32 %v7731_v53, %v2672_v12  ;;  %v2779_v44 = vmul.f32 %v9094_v47, %v7734_v27  ;;  %v2997_v32 = vpop.permute.xlu1 %2996  ;;  %v3065_v53 = vld [vmem:[#allocation6 + $0x42] ss:$8 sm:$0xf] }
 0x30a   : > { %5429 = vset.pattern.permute.xlu1 %v9130_v39  ;;  %v2957_v57 = vmul.f32 %v9116_v40, %v2941_v0  ;;  %v2945_v60 = vmul.f32 %v2929_v2, %v7530_v20  ;;  %v3016_v24 = vsel %vm2212_vm8, %v2997_v32, %v9120_v1  ;;  %v2870_v62 = vmul.f32 %v9115_v11, %v2854_v29  ;;  %v9137_v0 = vld [vmem:[#allocation39_spill] sm:$0xff] }
 0x30b   : > { %v2676_v58 = vadd.f32 %v2668_v6, %v2621_v9  ;;  %v2874_v7 = vadd.f32 %v2866_v15, %v2783_v38  ;;  %v3032_v31 = vmul.f32 %v3016_v24, %v2979_v33  ;;  %v3074_v4 = vrot.slane %v3065_v53, %v9133_v3 }
 0x30c   : > { %3536 = vrot.lane.b32.xlu1 %v9131_v46, %s5604_s24  ;;  %v7862_v19 = vpop.permute.xlu0 %3271  ;;  %v2961_v40 = vmul.f32 %v9123_v22, %v2945_v60  ;;  %v3078_v25 = vrot.slane %v3065_v53, %v9134_v28  ;;  %s328_s24 = scalar_lea.vmem [#allocation8], %s5007_s22 }
 0x30d   : > { %v2787_v27 = vadd.f32 %v2779_v44, %v2676_v58  ;;  %v2965_v47 = vadd.f32 %v2957_v57, %v2874_v7  ;;  %v3048_v20 = vmul.f32 %v9122_v34, %v3032_v31  ;;  %v3007_v13 = vpop.permute.xlu1 %3006  ;;  %v9140_v44 = vld [vmem:[#allocation85_spill] sm:$0xff] }
 0x30e   : > { %v3020_v1 = vsel %vm2212_vm8, %v3007_v13, %v7515_v17  ;;  %v9136_v17 = vld [vmem:[#allocation82_spill] sm:$0xff] }
 0x30f   : > { %v2878_v11 = vadd.f32 %v2870_v62, %v2787_v27  ;;  %v3056_v23 = vadd.f32 %v3048_v20, %v2965_v47  ;;  %v3036_v16 = vmul.f32 %v3020_v1, %v2979_v33  ;;  %v9141_v62 = vld [vmem:[#allocation79_spill] sm:$0xff] }
 0x310   : > { %3621 = vrot.lane.b32.xlu1 %v9132_v59, %s5606_s25  ;;  %v7872_v54 = vpop.permute.xlu0 %3275 }
 0x311   : > { %v2969_v61 = vadd.f32 %v2961_v40, %v2878_v11  ;;  %v3052_v22 = vmul.f32 %v9126_v37, %v3036_v16  ;;  %v3092_v34 = vpop.permute.xlu1 %3091  ;;  %v9139_v37 = vld [vmem:[#allocation118_spill] sm:$0xff] }
 0x312   : > { %v3108_v21 = vsel %vm1491_vm1, %v9135_v52, %v3092_v34  ;;  %v3109_v8 = vsel %vm1491_vm1, %v3092_v34, %v9136_v17  ;;  %v3082_v33 = vrot.slane %v3065_v53, %v9139_v37 }
 0x313   : > { %v3060_v36 = vadd.f32 %v3052_v22, %v2969_v61  ;;  %v3124_v18 = vmul.f32 %v3108_v21, %v3074_v4  ;;  %v3125_v10 = vmul.f32 %v3109_v8, %v3078_v25 }
 0x314   : > { %3629 = vrot.lane.b32.xlu1 %v9137_v0, %s5606_s25  ;;  %v7881_v6 = vpop.permute.xlu0 %3281 }
 0x315   : > { %v3140_v12 = vmul.f32 %v9138_v35, %v3124_v18  ;;  %v3141_v2 = vmul.f32 %v9138_v35, %v3125_v10  ;;  %v5378_v15 = vpop.permute.xlu1 %5377  ;;  %v9145_v18 = vld [vmem:[#allocation18_spill] sm:$0xff] }
 0x316   : > { %v5380_v29 = vunpack.i.h.bf16 %v5378_v15  ;;  %v5379_v39 = vunpack.i.l.bf16 %v5378_v15 }
 0x317   : > { %v3148_v9 = vadd.f32 %v3140_v12, %v7789_v43  ;;  %v3149_v38 = vadd.f32 %v3141_v2, %v7791_v26  ;;  %v9142_v43 = vld [vmem:[#allocation17_spill] sm:$0xff]  ;;  %v9143_v26 = vld [vmem:[#allocation80_spill] sm:$0xff] }
 0x318   : > { %5424 = vrot.lane.b32.xlu1 %v8876_v56, %s5606_s25  ;;  %v3114_v57 = vsel %vm1491_vm1, %v9140_v44, %v5380_v29  ;;  %v3110_v60 = vsel %vm1491_vm1, %v9136_v17, %v5379_v39  ;;  %v7894_v32 = vpop.permute.xlu0 %3285  ;;  %v9144_v17 = vmov 0   ;;  %v3156_v12 = vld [vmem:[#allocation6 + $0x43] ss:$8 sm:$0xf] }
 0x319   : > { %v3130_v24 = vmul.f32 %v3114_v57, %v3082_v33  ;;  %v3126_v58 = vmul.f32 %v3110_v60, %v3082_v33  ;;  %v3102_v7 = vpop.permute.xlu1 %3101  ;;  %v3169_v29 = vrot.slane %v3156_v12, %v9134_v28  ;;  %v9146_v57 = vld [vmem:[#allocation178_spill] sm:$0xff] }
 0x31a   : > { %v3112_v31 = vsel %vm1491_vm1, %v9141_v62, %v3102_v7  ;;  %v3113_v27 = vsel %vm1491_vm1, %v3102_v7, %v9140_v44 }
 0x31b   : > { %v3146_v47 = vmul.f32 %v9143_v26, %v3130_v24  ;;  %v3142_v40 = vmul.f32 %v9138_v35, %v3126_v58  ;;  %v3128_v20 = vmul.f32 %v3112_v31, %v3074_v4  ;;  %v3129_v13 = vmul.f32 %v3113_v27, %v3078_v25 }
 0x31c   : > { %3848 = vperm.xlu1 %5429, %v9142_v43   ;;  %v7903_v1 = vpop.permute.xlu0 %3464  ;;  %v3070_v25 = vrot.slane %v3065_v53, %v8978_v55  ;;  %v3173_v27 = vrot.slane %v3156_v12, %v9139_v37 }
 0x31d   : > { %v3150_v11 = vadd.f32 %v3142_v40, %v7822_v50  ;;  %v3154_v16 = vadd.f32 %v3146_v47, %v7824_v63  ;;  %v3144_v61 = vmul.f32 %v9143_v26, %v3128_v20  ;;  %v3145_v22 = vmul.f32 %v9143_v26, %v3129_v13 }
 0x31e   : > { %v7909_v34 = vpop.permute.xlu1 %3314 }
 0x31f   : > { %v3152_v21 = vadd.f32 %v3144_v61, %v7843_v51  ;;  %v3153_v4 = vadd.f32 %v3145_v22, %v7845_v14 }
 0x320   : > { %3617 = vrot.lane.b32.xlu1 %v9129_v41, %s5606_s25  ;;  %v7917_v50 = vpop.permute.xlu0 %3362  ;;  %s5016_s25 = sshll.u32 %s5697_s9, 9 }
 0x321   : > { %5450 = vset.pattern.permute.xlu1 %v9144_v17  ;;  %s8384_s13 = scalar_lea.hbm %s8434_s8, %s5016_s25 }
 0x322   : > { %v3088_v63 = vpop.permute.xlu1 %3087 }
 0x323   : > { %v3107_v8 = vsel %vm1491_vm1, %v3088_v63, %v9135_v52  ;;  %v3165_v52 = vrot.slane %v3156_v12, %v9133_v3 }
 0x324   : > { %3710 = vrot.lane.b32.xlu1 %v9145_v18, %s5608_s10  ;;  %v3123_v10 = vmul.f32 %v3107_v8, %v3070_v25  ;;  %v7924_v51 = vpop.permute.xlu0 %3366 }
 0x326   : > { %v3139_v2 = vmul.f32 %v9138_v35, %v3123_v10  ;;  %v3098_v14 = vpop.permute.xlu1 %3097 }
 0x327   : > { %v3111_v53 = vsel %vm1491_vm1, %v3098_v14, %v9141_v62 }
 0x328   : > { %5431 = vrot.lane.b32.xlu1 %v8876_v56, %s5608_s10  ;;  %v3147_v33 = vadd.f32 %v3139_v2, %v3056_v23  ;;  %v3127_v15 = vmul.f32 %v3111_v53, %v3070_v25  ;;  %v7939_v58 = vpop.permute.xlu0 %3372 }
 0x32a   : > { %v3143_v39 = vmul.f32 %v9143_v26, %v3127_v15  ;;  %v3183_v44 = vpop.permute.xlu1 %3182 }
 0x32b   : > { %v3199_v35 = vsel %vm1585_vm2, %v9146_v57, %v3183_v44  ;;  %v3200_v60 = vsel %vm1585_vm2, %v3183_v44, %v7781_v30 }
 0x32c   : > { %3722 = vrot.lane.b32.xlu1 %v9124_v5, %s5608_s10  ;;  %v3151_v24 = vadd.f32 %v3143_v39, %v3060_v36  ;;  %v3215_v23 = vmul.f32 %v3199_v35, %v3165_v52  ;;  %v3216_v7 = vmul.f32 %v3200_v60, %v3169_v29  ;;  %v7950_v61 = vpop.permute.xlu0 %3376 }
 0x32e   : > { %v3231_v62 = vmul.f32 %v7828_v49, %v3215_v23  ;;  %v3232_v31 = vmul.f32 %v7828_v49, %v3216_v7  ;;  %v5385_v43 = vpop.permute.xlu1 %5384  ;;  %v3161_v23 = vrot.slane %v3156_v12, %v8978_v55 }
 0x32f   : > { %v5387_v26 = vunpack.i.h.bf16 %v5385_v43  ;;  %v5386_v47 = vunpack.i.l.bf16 %v5385_v43 }
 0x330   : > { %3708 = vrot.lane.b32.xlu1 %v9129_v41, %s5608_s10  ;;  %v3239_v40 = vadd.f32 %v3231_v62, %v3148_v9  ;;  %v3240_v20 = vadd.f32 %v3232_v31, %v3149_v38  ;;  %v9147_v9 = vld [vmem:[#allocation75_spill] sm:$0xff]  ;;  %v7966_v60 = vpop.permute.xlu0 %3575  ;;  %s4918_s10 = sshll.u32 %s328_s24, 4  ;;  %s8386_s10 = int_to_ptr.vmem [resolvable:$true] %s4918_s10 }
 0x331   : > { %v3205_v36 = vsel %vm1585_vm2, %v7820_v48, %v5387_v26  ;;  %v3201_v13 = vsel %vm1585_vm2, %v7781_v30, %v5386_v47  ;;  %s5516_s9 = scalar_lea.vmem %s8386_s10, 512 }
 0x332   : > { %v3221_v22 = vmul.f32 %v3205_v36, %v3173_v27  ;;  %v3217_v25 = vmul.f32 %v3201_v13, %v3173_v27  ;;  %v3193_v17 = vpop.permute.xlu1 %3192  ;;  %p5517_p12 = scmp.ne.s32.totalorder %s8386_s10, %s5516_s9 }
 0x333   : > { %v3203_v63 = vsel %vm1585_vm2, %v7799_v45, %v3193_v17  ;;  %v3204_v8 = vsel %vm1585_vm2, %v3193_v17, %v7820_v48 }
 0x334   : > { %3801 = vrot.lane.b32.xlu1 %v9145_v18, %s5610_s12  ;;  %v3237_v38 = vmul.f32 %v9147_v9, %v3221_v22  ;;  %v3233_v10 = vmul.f32 %v7828_v49, %v3217_v25  ;;  %v3219_v2 = vmul.f32 %v3203_v63, %v3165_v52  ;;  %v3220_v30 = vmul.f32 %v3204_v8, %v3169_v29  ;;  %v3867_v52 = vld [vmem:[%s8430_s4] sm:$0xff]  ;;  %p5518_p2 = pnand %p5517_p12, %p9149_p1 }
 0x335   : > { %v3247_v29 = vld [vmem:[#allocation6 + $0x44] ss:$8 sm:$0xf] }
 0x336   : > { %v3241_v14 = vadd.f32 %v3233_v10, %v3150_v11  ;;  %v3245_v53 = vadd.f32 %v3237_v38, %v3154_v16  ;;  %v3235_v15 = vmul.f32 %v9147_v9, %v3219_v2  ;;  %v3236_v39 = vmul.f32 %v9147_v9, %v3220_v30  ;;  %v7962_v44 = vpop.permute.xlu1 %3405  ;;  %p5519_p3 = pneg %p5518_p2 }
 0x337   : > { %v3256_v27 = vrot.slane %v3247_v29, %v9133_v3  ;;  %v3260_v43 = vrot.slane %v3247_v29, %v9134_v28  ;;  %v3264_v63 = vrot.slane %v3247_v29, %v9139_v37 }
 0x338   : > { %5441 = vrot.lane.b32.xlu1 %v8876_v56, %s5610_s12  ;;  %v3243_v48 = vadd.f32 %v3235_v15, %v3152_v21  ;;  %v3244_v35 = vadd.f32 %v3236_v39, %v3153_v4  ;;  %v7976_v62 = vpop.permute.xlu0 %3662 }
 0x33a   : > { %v3179_v7 = vpop.permute.xlu1 %3178 }
 0x33b   : > { %v3198_v11 = vsel %vm1585_vm2, %v3179_v7, %v9146_v57 }
 0x33c   : > { %3813 = vrot.lane.b32.xlu1 %v9124_v5, %s5610_s12  ;;  %v3214_v16 = vmul.f32 %v3198_v11, %v3161_v23 }
 0x33e   : > { %v3230_v21 = vmul.f32 %v7828_v49, %v3214_v16  ;;  %v3189_v4 = vpop.permute.xlu1 %3188 }
 0x33f   : > { %v3202_v12 = vsel %vm1585_vm2, %v3189_v4, %v7799_v45  ;;  %v7990_v45 = vpop.permute.xlu0 %3530 }
 0x340   : > { %3871 = vperm.xlu1 %5450, %v3867_v52   ;;  %v3238_v31 = vadd.f32 %v3230_v21, %v3147_v33  ;;  %v3218_v57 = vmul.f32 %v3202_v12, %v3161_v23  ;;  %v9148_v52 = vld [vmem:[#allocation86_spill] sm:$0xff] }
 0x342   : > { %v3234_v26 = vmul.f32 %v9147_v9, %v3218_v57  ;;  %v3274_v47 = vpop.permute.xlu1 %3273 }
 0x343   : > { %v3290_v36 = vsel %vm1677_vm3, %v7862_v19, %v3274_v47  ;;  %v3291_v49 = vsel %vm1677_vm3, %v3274_v47, %v7872_v54  ;;  %v8001_v15 = vpop.permute.xlu0 %3538 }
 0x344   : > { %3799 = vrot.lane.b32.xlu1 %v9129_v41, %s5610_s12  ;;  %v3242_v33 = vadd.f32 %v3234_v26, %v3151_v24  ;;  %v3306_v13 = vmul.f32 %v3290_v36, %v3256_v27  ;;  %v3307_v22 = vmul.f32 %v3291_v49, %v3260_v43 }
 0x346   : > { %v3322_v25 = vmul.f32 %v7909_v34, %v3306_v13  ;;  %v3323_v17 = vmul.f32 %v7909_v34, %v3307_v22  ;;  %v5392_v8 = vpop.permute.xlu1 %5391  ;;  %v3252_v13 = vrot.slane %v3247_v29, %v8978_v55  ;;  %v8026_v22 = vld [vmem:[#allocation6 + $0x46] ss:$8 sm:$0xf] }
 0x347   : > { %v5394_v9 = vunpack.i.h.bf16 %v5392_v8  ;;  %v5393_v38 = vunpack.i.l.bf16 %v5392_v8  ;;  %v8017_v36 = vpop.permute.xlu0 %5412 }
 0x348   : > { %3809 = vrot.lane.b32.xlu1 %v9131_v46, %s5610_s12  ;;  %v3330_v10 = vadd.f32 %v3322_v25, %v3239_v40  ;;  %v3331_v2 = vadd.f32 %v3323_v17, %v3240_v20 }
 0x349   : > { %v3296_v30 = vsel %vm1677_vm3, %v7894_v32, %v5394_v9  ;;  %v3292_v24 = vsel %vm1677_vm3, %v7872_v54, %v5393_v38  ;;  %v3442_v38 = vrot.slane %v8026_v22, %v9134_v28 }
 0x34a   : > { %v3312_v39 = vmul.f32 %v3296_v30, %v3264_v63  ;;  %v3308_v23 = vmul.f32 %v3292_v24, %v3264_v63  ;;  %v3284_v7 = vpop.permute.xlu1 %3283 }
 0x34b   : > { %v3294_v11 = vsel %vm1677_vm3, %v7881_v6, %v3284_v7  ;;  %v3295_v16 = vsel %vm1677_vm3, %v3284_v7, %v7894_v32  ;;  %v8028_v25 = vpop.permute.xlu0 %3757 }
 0x34c   : > { %v3328_v40 = vmul.f32 %v9148_v52, %v3312_v39  ;;  %v3324_v20 = vmul.f32 %v7909_v34, %v3308_v23  ;;  %v3310_v21 = vmul.f32 %v3294_v11, %v3256_v27  ;;  %v3311_v4 = vmul.f32 %v3295_v16, %v3260_v43  ;;  %v3338_v43 = vld [vmem:[#allocation6 + $0x45] ss:$8 sm:$0xf] }
 0x34d   : > { %v3347_v29 = vrot.slane %v3338_v43, %v9133_v3  ;;  %v3351_v9 = vrot.slane %v3338_v43, %v9134_v28  ;;  %v3446_v11 = vrot.slane %v8026_v22, %v9139_v37 }
 0x34e   : > { %v8009_v12 = vadd.f32 %v3324_v20, %v3241_v14  ;;  %v8011_v54 = vadd.f32 %v3328_v40, %v3245_v53  ;;  %v3326_v57 = vmul.f32 %v9148_v52, %v3310_v21  ;;  %v3327_v26 = vmul.f32 %v9148_v52, %v3311_v4 }
 0x34f   : > { %v8015_v47 = vpop.permute.xlu1 %3460  ;;  %v3355_v21 = vrot.slane %v3338_v43, %v9139_v37 }
 0x350   : > { %v8019_v49 = vadd.f32 %v3326_v57, %v3243_v48  ;;  %v8021_v32 = vadd.f32 %v3327_v26, %v3244_v35 }
 0x353   : > { %v3270_v27 = vpop.permute.xlu1 %3269 }
 0x354   : > { %v3289_v14 = vsel %vm1677_vm3, %v3270_v27, %v7862_v19  ;;  %v3438_v19 = vrot.slane %v8026_v22, %v9133_v3 }
 0x355   : > { %v3305_v53 = vmul.f32 %v3289_v14, %v3252_v13 }
 0x356   : > { %v3452_v16 = vmul.f32 %v3438_v19, %v9145_v18 }
 0x357   : > { %v3321_v17 = vmul.f32 %v7909_v34, %v3305_v53  ;;  %v3280_v63 = vpop.permute.xlu1 %3279  ;;  %v3454_v53 = vmul.f32 0.0, %v3446_v11  ;;  %v3456_v11 = vmul.f32 %v3438_v19, %v9137_v0 }
 0x358   : > { %v3293_v48 = vsel %vm1677_vm3, %v3280_v63, %v7881_v6 }
 0x359   : > { %v8033_v35 = vadd.f32 %v3321_v17, %v3238_v31  ;;  %v3309_v8 = vmul.f32 %v3293_v48, %v3252_v13  ;;  %v8046_v31 = vpop.permute.xlu0 %3619 }
 0x35b   : > { %v3325_v30 = vmul.f32 %v9148_v52, %v3309_v8  ;;  %v3365_v34 = vpop.permute.xlu1 %3364  ;;  %v3453_v52 = vmul.f32 %v3442_v38, %v9132_v59 }
 0x35c   : > { %v3381_v24 = vsel %vm1769_vm4, %v7917_v50, %v3365_v34  ;;  %v3382_v6 = vsel %vm1769_vm4, %v3365_v34, %v7924_v51 }
 0x35d   : > { %v8048_v39 = vadd.f32 %v3325_v30, %v3242_v33  ;;  %v3397_v23 = vmul.f32 %v3381_v24, %v3347_v29  ;;  %v3398_v7 = vmul.f32 %v3382_v6, %v3351_v9  ;;  %v3468_v33 = vmul.f32 %v8015_v47, %v3452_v16  ;;  %v8063_v17 = vpop.permute.xlu0 %5419 }
 0x35e   : > { %v3469_v13 = vmul.f32 %v8015_v47, %v3453_v52  ;;  %v3474_v24 = vmul.f32 %v7903_v1, %v3454_v53  ;;  %v3457_v16 = vmul.f32 %v3442_v38, %v9124_v5  ;;  %v3470_v52 = vmul.f32 %v8015_v47, %v3454_v53 }
 0x35f   : > { %v3413_v40 = vmul.f32 %v7962_v44, %v3397_v23  ;;  %v3414_v20 = vmul.f32 %v7962_v44, %v3398_v7  ;;  %v5399_v4 = vpop.permute.xlu1 %5398  ;;  %v3434_v38 = vrot.slane %v8026_v22, %v8978_v55 }
 0x360   : > { %v5401_v57 = vunpack.i.h.bf16 %v5399_v4  ;;  %v5400_v26 = vunpack.i.l.bf16 %v5399_v4 }
 0x361   : > { %v3421_v27 = vadd.f32 %v3413_v40, %v3330_v10  ;;  %v3422_v14 = vadd.f32 %v3414_v20, %v3331_v2  ;;  %v8084_v0 = vpop.permute.xlu0 %3631 }
 0x362   : > { %v3387_v18 = vsel %vm1769_vm4, %v7950_v61, %v5401_v57  ;;  %v3383_v59 = vsel %vm1769_vm4, %v7924_v51, %v5400_v26  ;;  %v3472_v57 = vmul.f32 %v7903_v1, %v3456_v11 }
 0x363   : > { %v8065_v63 = vadd.f32 %v3469_v13, %v3422_v14  ;;  %v3403_v48 = vmul.f32 %v3387_v18, %v3355_v21  ;;  %v3399_v8 = vmul.f32 %v3383_v59, %v3355_v21  ;;  %v3375_v30 = vpop.permute.xlu1 %3374  ;;  %v3476_v34 = vadd.f32 %v3468_v33, %v3421_v27 }
 0x364   : > { %v3385_v10 = vsel %vm1769_vm4, %v7939_v58, %v3375_v30  ;;  %v3386_v2 = vsel %vm1769_vm4, %v3375_v30, %v7950_v61  ;;  %v3451_v14 = vmul.f32 %v3434_v38, %v9129_v41 }
 0x365   : > { %v3419_v6 = vmul.f32 %v7850_v42, %v3403_v48  ;;  %v3415_v51 = vmul.f32 %v7962_v44, %v3399_v8  ;;  %v3401_v23 = vmul.f32 %v3385_v10, %v3347_v29  ;;  %v3402_v7 = vmul.f32 %v3386_v2, %v3351_v9  ;;  %v8099_v53 = vpop.permute.xlu0 %3844 }
 0x366   : > { %v3473_v29 = vmul.f32 %v7903_v1, %v3457_v16  ;;  %v3343_v9 = vrot.slane %v3338_v43, %v8978_v55  ;;  %v3467_v22 = vmul.f32 %v8015_v47, %v3451_v14  ;;  %v3455_v8 = vmul.f32 %v3434_v38, %v9131_v46 }
 0x367   : > { %v3423_v40 = vadd.f32 %v3415_v51, %v8009_v12  ;;  %v3427_v20 = vadd.f32 %v3419_v6, %v8011_v54  ;;  %v3417_v21 = vmul.f32 %v7850_v42, %v3401_v23  ;;  %v3418_v61 = vmul.f32 %v7850_v42, %v3402_v7  ;;  %v3572_v4 = vpop.permute.xlu1 %3571 }
 0x368   : > { %v3471_v10 = vmul.f32 %v7903_v1, %v3455_v8  ;;  %v8145_v8 = vld [vmem:[#allocation6 + $0x61] ss:$8 sm:$0xf] }
 0x369   : > { %v8086_v5 = vadd.f32 %v3474_v24, %v3427_v20  ;;  %v3425_v19 = vadd.f32 %v3417_v21, %v8019_v49  ;;  %v3426_v12 = vadd.f32 %v3418_v61, %v8021_v32  ;;  %v3478_v54 = vadd.f32 %v3470_v52, %v3423_v40  ;;  %v3494_v24 = vld [vmem:[#allocation6 + $0x47] ss:$8 sm:$0xf] }
 0x36a   : > { %v3507_v7 = vrot.slane %v3494_v24, %v9134_v28  ;;  %v3511_v1 = vrot.slane %v3494_v24, %v9139_v37 }
 0x36b   : > { %v3361_v26 = vpop.permute.xlu1 %3360  ;;  %v8092_v33 = vadd.f32 %v3472_v57, %v3425_v19  ;;  %v8094_v13 = vadd.f32 %v3473_v29, %v3426_v12 }
 0x36c   : > { %v3380_v43 = vsel %vm1769_vm4, %v3361_v26, %v7917_v50 }
 0x36d   : > { %v3396_v27 = vmul.f32 %v3380_v43, %v3343_v9 }
 0x36f   : > { %v3412_v49 = vmul.f32 %v7962_v44, %v3396_v27  ;;  %v3371_v32 = vpop.permute.xlu1 %3370  ;;  %v3628_v44 = vpop.permute.xlu0 %3627 }
 0x370   : > { %v3384_v18 = vsel %vm1769_vm4, %v3371_v32, %v7939_v58  ;;  %v3503_v58 = vrot.slane %v3494_v24, %v9133_v3 }
 0x371   : > { %v3420_v59 = vadd.f32 %v3412_v49, %v8033_v35  ;;  %v3400_v48 = vmul.f32 %v3384_v18, %v3343_v9  ;;  %v5415_v18 = vunpack.i.h.bf16 %v8017_v36 }
 0x373   : > { %v3416_v50 = vmul.f32 %v7850_v42, %v3400_v48  ;;  %v8108_v30 = vpop.permute.xlu1 %3666  ;;  %v3475_v41 = vadd.f32 %v3467_v22, %v3420_v59  ;;  %v8115_v46 = vpop.permute.xlu0 %3712 }
 0x375   : > { %v3424_v2 = vadd.f32 %v3416_v50, %v8048_v39 }
 0x377   : > { %v3529_v6 = vpop.permute.xlu1 %3528  ;;  %v3479_v47 = vadd.f32 %v3471_v10, %v3424_v2  ;;  %v8124_v57 = vpop.permute.xlu0 %3720  ;;  %v3595_v10 = vld [vmem:[#allocation6 + $0x60] ss:$8 sm:$0xf] }
 0x378   : > { %v3547_v35 = vsel %vm1936_vm5, %v3529_v6, %v7990_v45 }
 0x379   : > { %v3563_v51 = vmul.f32 %v3547_v35, %v3503_v58 }
 0x37b   : > { %v3579_v42 = vmul.f32 %v3572_v4, %v3563_v51  ;;  %v5408_v23 = vpop.permute.xlu1 %5407  ;;  %v8134_v26 = vpop.permute.xlu0 %5436 }
 0x37c   : > { %v5410_v11 = vunpack.i.h.bf16 %v5408_v23  ;;  %v5409_v16 = vunpack.i.l.bf16 %v5408_v23 }
 0x37d   : > { %v8119_v52 = vadd.f32 %v3579_v42, %v3476_v34  ;;  %v3499_v34 = vrot.slane %v3494_v24, %v8978_v55  ;;  %v8163_v42 = vrot.slane %v3595_v10, %v9133_v3 }
 0x37e   : > { %v3548_v39 = vsel %vm1936_vm5, %v7990_v45, %v5409_v16  ;;  %v3549_v40 = vsel %vm1936_vm5, %v5409_v16, %v5410_v11 }
 0x37f   : > { %v3565_v20 = vmul.f32 %v3549_v40, %v3511_v1  ;;  %v3541_v21 = vpop.permute.xlu1 %3540  ;;  %v3564_v61 = vmul.f32 %v3548_v39, %v3507_v7  ;;  %v3719_v22 = vpop.permute.xlu0 %3718 }
 0x380   : > { %v3551_v32 = vsel %vm1936_vm5, %v8001_v15, %v3541_v21 }
 0x381   : > { %v3581_v29 = vmul.f32 %v3572_v4, %v3565_v20  ;;  %v3580_v9 = vmul.f32 %v3572_v4, %v3564_v61  ;;  %v3567_v50 = vmul.f32 %v3551_v32, %v3503_v58  ;;  %v3612_v61 = vrot.slane %v3595_v10, %v9139_v37 }
 0x383   : > { %v8126_v19 = vadd.f32 %v3581_v29, %v3478_v54  ;;  %v8128_v12 = vpop.permute.xlu1 %3753  ;;  %v8131_v38 = vadd.f32 %v3580_v9, %v8065_v63  ;;  %v5414_v63 = vunpack.i.l.bf16 %v8017_v36  ;;  %v3600_v36 = vrot.slane %v3595_v10, %v8978_v55  ;;  %v8159_v58 = vpop.permute.xlu0 %3803 }
 0x384   : > { %v3583_v51 = vmul.f32 %v7966_v60, %v3567_v50 }
 0x385   : > { %v3553_v2 = vsel %vm1936_vm5, %v5414_v63, %v5415_v18  ;;  %v3552_v35 = vsel %vm1936_vm5, %v3541_v21, %v5414_v63 }
 0x386   : > { %v3569_v11 = vmul.f32 %v3553_v2, %v3511_v1  ;;  %v3568_v40 = vmul.f32 %v3552_v35, %v3507_v7  ;;  %v3591_v29 = vadd.f32 %v3583_v51, %v8092_v33  ;;  %v3703_v35 = vrot.slane %v8145_v8, %v9139_v37 }
 0x387   : > { %v3527_v45 = vpop.permute.xlu1 %3526 }
 0x388   : > { %v3546_v43 = vsel %vm1936_vm5, %v3527_v45, %v3529_v6  ;;  %v3608_v45 = vrot.slane %v3595_v10, %v9134_v28  ;;  %v5438_v10 = vunpack.i.l.bf16 %v8134_v26 }
 0x389   : > { %v3562_v27 = vmul.f32 %v3546_v43, %v3499_v34 }
 0x38b   : > { %v3578_v14 = vmul.f32 %v3572_v4, %v3562_v27  ;;  %v3537_v49 = vpop.permute.xlu1 %3536 }
 0x38c   : > { %v3550_v54 = vsel %vm1936_vm5, %v3537_v49, %v8001_v15  ;;  %v8153_v15 = vrot.slane %v8145_v8, %v8978_v55  ;;  %v3584_v49 = vmul.f32 %v7966_v60, %v3568_v40 }
 0x38d   : > { %v8143_v59 = vadd.f32 %v3578_v14, %v3475_v41  ;;  %v3566_v48 = vmul.f32 %v3550_v54, %v3499_v34  ;;  %v3732_v41 = vsel %vm2120_vm7, %v3719_v22, %v8124_v57  ;;  %v8177_v14 = vpop.permute.xlu0 %3811 }
 0x38e   : > { %v3748_v39 = vmul.f32 %v3732_v41, %v8153_v15 }
 0x38f   : > { %v3582_v4 = vmul.f32 %v7966_v60, %v3566_v48  ;;  %v8148_v24 = vpop.permute.xlu1 %3621 }
 0x390   : > { %v3764_v7 = vmul.f32 %v8028_v25, %v3748_v39 }
 0x391   : > { %v3590_v6 = vadd.f32 %v3582_v4, %v3479_v47  ;;  %v5439_v4 = vunpack.i.h.bf16 %v8134_v26  ;;  %v8192_v2 = vpop.permute.xlu0 %5446  ;;  %v8202_v26 = vld [vmem:[#allocation6 + $0x62] ss:$8 sm:$0xf] }
 0x392   : > { %v8208_v39 = vrot.slane %v8202_v26, %v9139_v37 }
 0x393   : > { %v3630_v23 = vpop.permute.xlu1 %3629 }
 0x394   : > { %v3641_v16 = vsel %vm2028_vm6, %v3628_v44, %v3630_v23  ;;  %v3642_v47 = vsel %vm2028_vm6, %v3630_v23, %v8084_v0  ;;  %v3585_v44 = vmul.f32 %v7966_v60, %v3569_v11  ;;  %v3592_v60 = vadd.f32 %v3584_v49, %v8094_v13 }
 0x395   : > { %v3657_v20 = vmul.f32 %v3641_v16, %v3600_v36  ;;  %v3658_v21 = vmul.f32 %v3642_v47, %v8163_v42  ;;  %v3735_v16 = vsel %vm2120_vm7, %v5438_v10, %v5439_v4  ;;  %v5449_v13 = vunpack.i.h.bf16 %v8192_v2 }
 0x396   : > { %v5448_v47 = vunpack.i.l.bf16 %v8192_v2  ;;  %v3638_v49 = vsel %vm2028_vm6, %v8046_v31, %v8148_v24 }
 0x397   : > { %v3673_v9 = vmul.f32 %v8108_v30, %v3657_v20  ;;  %v3674_v34 = vmul.f32 %v8108_v30, %v3658_v21  ;;  %v5425_v1 = vpop.permute.xlu1 %5424  ;;  %v5422_v20 = vunpack.i.h.bf16 %v8063_v17  ;;  %v5421_v21 = vunpack.i.l.bf16 %v8063_v17 }
 0x398   : > { %v5427_v43 = vunpack.i.h.bf16 %v5425_v1  ;;  %v5426_v27 = vunpack.i.l.bf16 %v5425_v1  ;;  %v3826_v40 = vsel %vm2212_vm8, %v5448_v47, %v5449_v13 }
 0x399   : > { %v3681_v32 = vadd.f32 %v3673_v9, %v3590_v6  ;;  %v8180_v54 = vadd.f32 %v3674_v34, %v3591_v29  ;;  %v3593_v6 = vadd.f32 %v3585_v44, %v8086_v5  ;;  %v3751_v5 = vmul.f32 %v3735_v16, %v3703_v35 }
 0x39a   : > { %v3643_v33 = vsel %vm2028_vm6, %v8084_v0, %v5426_v27  ;;  %v3644_v18 = vsel %vm2028_vm6, %v5426_v27, %v5427_v43  ;;  %v3842_v9 = vmul.f32 %v3826_v40, %v8208_v39  ;;  %v3640_v37 = vsel %vm2028_vm6, %v5421_v21, %v5422_v20 }
 0x39b   : > { %v3659_v63 = vmul.f32 %v3643_v33, %v3608_v45  ;;  %v3660_v22 = vmul.f32 %v3644_v18, %v3612_v61  ;;  %v8185_v48 = vpop.permute.xlu1 %3848  ;;  %v8187_v50 = vadd.f32 %v3764_v7, %v3681_v32  ;;  %v3767_v29 = vmul.f32 %v8028_v25, %v3751_v5 }
 0x39c   : > { %v3858_v43 = vmul.f32 %v8185_v48, %v3842_v9  ;;  %v3639_v17 = vsel %vm2028_vm6, %v8148_v24, %v5421_v21  ;;  %v3654_v24 = vmul.f32 %v3638_v49, %v8163_v42 }
 0x39d   : > { %v3675_v0 = vmul.f32 %v8108_v30, %v3659_v63  ;;  %v3676_v41 = vmul.f32 %v8108_v30, %v3660_v22  ;;  %v3656_v63 = vmul.f32 %v3640_v37, %v3612_v61  ;;  %v8226_v22 = vpop.permute.xlu0 %3876 }
 0x39f   : > { %v3684_v51 = vadd.f32 %v3676_v41, %v3593_v6  ;;  %v3618_v23 = vpop.permute.xlu1 %3617  ;;  %v8199_v11 = vadd.f32 %v3675_v0, %v3592_v60  ;;  %v3695_v60 = vrot.slane %v8145_v8, %v9133_v3  ;;  %v3655_v0 = vmul.f32 %v3639_v17, %v3608_v45 }
 0x3a0   : > { %v3637_v1 = vsel %vm2028_vm6, %v3618_v23, %v8046_v31  ;;  %v3903_v31 = vld [vmem:[%s8432_s6] sm:$0xff]  ;;  %v3672_v13 = vmul.f32 %v7976_v62, %v3656_v63  ;;  %v3786_v45 = vrot.slane %v8202_v26, %v9133_v3 }
 0x3a1   : > { %v3775_v44 = vadd.f32 %v3767_v29, %v3684_v51  ;;  %v3653_v27 = vmul.f32 %v3637_v1, %v3600_v36  ;;  %v3699_v36 = vrot.slane %v8145_v8, %v9134_v28  ;;  %v3911_v5 = vsel %vm1585_vm2, %v3903_v31, 0 }
 0x3a2   : > { %v3671_v3 = vmul.f32 %v7976_v62, %v3655_v0 }
 0x3a3   : > { %v3711_v30 = vpop.permute.xlu1 %3710  ;;  %v3866_v32 = vadd.f32 %v3858_v43, %v3775_v44  ;;  %v3669_v4 = vmul.f32 %v7976_v62, %v3653_v27  ;;  %v3790_v27 = vrot.slane %v8202_v26, %v9134_v28 }
 0x3a4   : > { %v3729_v61 = vsel %vm2120_vm7, %v3711_v30, %v8115_v46 }
 0x3a5   : > { %v3886_v51 = vadd.f32 %v8226_v22, %v3866_v32  ;;  %v3745_v40 = vmul.f32 %v3729_v61, %v3695_v60 }
 0x3a7   : > { %v5432_v34 = vpop.permute.xlu1 %5431  ;;  %v3761_v37 = vmul.f32 %v8128_v12, %v3745_v40 }
 0x3a8   : > { %v5434_v33 = vunpack.i.h.bf16 %v5432_v34  ;;  %v5433_v18 = vunpack.i.l.bf16 %v5432_v34  ;;  %v3894_v34 = vmax.f32 %v3886_v51, 0.0 }
 0x3aa   : > { %v3730_v23 = vsel %vm2120_vm7, %v8115_v46, %v5433_v18  ;;  %v3731_v8 = vsel %vm2120_vm7, %v5433_v18, %v5434_v33  ;;  %v3679_v18 = vadd.f32 %v3671_v3, %v8131_v38  ;;  %v8273_v63 = vmin.f32 %v3894_v34, 6.0 }
 0x3ab   : > { %v3723_v7 = vpop.permute.xlu1 %3722  ;;  %v3747_v29 = vmul.f32 %v3731_v8, %v3703_v35  ;;  %v3746_v9 = vmul.f32 %v3730_v23, %v3699_v36  ;;  %v3680_v35 = vadd.f32 %v3672_v13, %v8126_v19 }
 0x3ac   : > { %v3733_v42 = vsel %vm2120_vm7, %v8124_v57, %v3723_v7  ;;  %v3734_v20 = vsel %vm2120_vm7, %v3723_v7, %v5438_v10  ;;  %v8267_v7 = vand.u32 4294901760, %v3911_v5  ;;  %v4408_v13 = vand.u32 4294901760, %v8273_v63 }
 0x3ad   : > { %v3749_v1 = vmul.f32 %v3733_v42, %v3695_v60  ;;  %v3750_v44 = vmul.f32 %v3734_v20, %v3699_v36  ;;  %v3763_v49 = vmul.f32 %v8128_v12, %v3747_v29 }
 0x3ae   : > { %v8283_v38 = vsub.f32 %v3911_v5, %v8267_v7 }
 0x3af   : > { %v3709_v6 = vpop.permute.xlu1 %3708  ;;  %v3766_v28 = vmul.f32 %v8028_v25, %v3750_v44  ;;  %v3771_v61 = vadd.f32 %v3763_v49, %v3680_v35 }
 0x3b0   : > { %v3728_v41 = vsel %vm2120_vm7, %v3709_v6, %v3711_v30  ;;  %v3677_v30 = vadd.f32 %v3669_v4, %v8143_v59  ;;  %v3765_v4 = vmul.f32 %v8028_v25, %v3749_v1  ;;  %v8300_v20 = vand.u32 4294901760, %v8283_v38 }
 0x3b1   : > { %v3744_v16 = vmul.f32 %v3728_v41, %v8153_v15  ;;  %v3670_v15 = vmul.f32 %v7976_v62, %v3654_v24  ;;  %v3762_v62 = vmul.f32 %v8128_v12, %v3746_v9  ;;  %v3774_v8 = vadd.f32 %v3766_v28, %v8199_v11 }
 0x3b2   : > { %v3773_v23 = vadd.f32 %v3765_v4, %v8180_v54  ;;  %v8303_v9 = vsub.f32 %v8273_v63, %v4408_v13 }
 0x3b3   : > { %v3760_v46 = vmul.f32 %v8128_v12, %v3744_v16  ;;  %v8254_v21 = vpop.permute.xlu1 %3801  ;;  %v3678_v33 = vadd.f32 %v3670_v15, %v8119_v52  ;;  %v3770_v0 = vadd.f32 %v3762_v62, %v3679_v18 }
 0x3b4   : > { %v3820_v57 = vsel %vm2212_vm8, %v8254_v21, %v8159_v58 }
 0x3b5   : > { %v8261_v59 = vadd.f32 %v3760_v46, %v3677_v30  ;;  %v3836_v10 = vmul.f32 %v3820_v57, %v3786_v45  ;;  %v3769_v12 = vadd.f32 %v3761_v37, %v3678_v33 }
 0x3b7   : > { %v5442_v43 = vpop.permute.xlu1 %5441  ;;  %v3852_v19 = vmul.f32 %v8099_v53, %v3836_v10 }
 0x3b8   : > { %v5444_v17 = vunpack.i.h.bf16 %v5442_v43  ;;  %v5443_v32 = vunpack.i.l.bf16 %v5442_v43 }
 0x3b9   : > { %v3860_v16 = vadd.f32 %v3852_v19, %v3769_v12 }
 0x3ba   : > { %v3821_v60 = vsel %vm2212_vm8, %v8159_v58, %v5443_v32  ;;  %v3822_v36 = vsel %vm2212_vm8, %v5443_v32, %v5444_v17  ;;  %v4498_v17 = vand.u32 4294901760, %v8303_v9 }
 0x3bb   : > { %v3838_v6 = vmul.f32 %v3822_v36, %v8208_v39  ;;  %v3814_v31 = vpop.permute.xlu1 %3813  ;;  %v3837_v52 = vmul.f32 %v3821_v60, %v3790_v27 }
 0x3bc   : > { %v3824_v24 = vsel %vm2212_vm8, %v8177_v14, %v3814_v31  ;;  %v3825_v25 = vsel %vm2212_vm8, %v3814_v31, %v5448_v47 }
 0x3bd   : > { %v3854_v58 = vmul.f32 %v8099_v53, %v3838_v6  ;;  %v3840_v41 = vmul.f32 %v3824_v24, %v3786_v45  ;;  %v3841_v51 = vmul.f32 %v3825_v25, %v3790_v27  ;;  %v3853_v39 = vmul.f32 %v8099_v53, %v3837_v52 }
 0x3be   : > { %v3782_v45 = vrot.slane %v8202_v26, %v8978_v55  ;;  %v3985_v26 = vsub.f32 %v8283_v38, %v8300_v20  ;;  %v4499_v25 = vsub.f32 %v8303_v9, %v4498_v17 }
 0x3bf   : > { %v3856_v42 = vmul.f32 %v8185_v48, %v3840_v41  ;;  %v3857_v2 = vmul.f32 %v8185_v48, %v3841_v51  ;;  %v3872_v47 = vpop.permute.xlu1 %3871  ;;  %v3861_v5 = vadd.f32 %v3853_v39, %v3770_v0  ;;  %v3862_v30 = vadd.f32 %v3854_v58, %v3771_v61 }
 0x3c0   : > { %v3880_v40 = vadd.f32 %v3872_v47, %v3860_v16  ;;  %v8317_v60 = vand.u32 4294901760, %v3985_v26 }
 0x3c1   : > { %v3864_v54 = vadd.f32 %v3856_v42, %v3773_v23  ;;  %v3865_v46 = vadd.f32 %v3857_v2, %v3774_v8  ;;  %v3881_v11 = vadd.f32 %v3872_v47, %v3861_v5  ;;  %v3882_v15 = vadd.f32 %v3872_v47, %v3862_v30 }
 0x3c2   : > { %v3888_v29 = vmax.f32 %v3880_v40, 0.0 }
 0x3c3   : > { %v3884_v57 = vadd.f32 %v8226_v22, %v3864_v54  ;;  %v3885_v3 = vadd.f32 %v8226_v22, %v3865_v46  ;;  %v3889_v34 = vmax.f32 %v3881_v11, 0.0  ;;  %v3890_v1 = vmax.f32 %v3882_v15, 0.0  ;;  %v3800_v44 = vpop.permute.xlu1 %3799 }
 0x3c4   : > { %v3896_v10 = vmin.f32 %v3888_v29, 6.0  ;;  %v3819_v55 = vsel %vm2212_vm8, %v3800_v44, %v8254_v21 }
 0x3c5   : > { %v3893_v37 = vmax.f32 %v3885_v3, 0.0  ;;  %v3897_v43 = vmin.f32 %v3889_v34, 6.0  ;;  %v3898_v27 = vmin.f32 %v3890_v1, 6.0  ;;  %v3835_v35 = vmul.f32 %v3819_v55, %v3782_v45 }
 0x3c6   : > { %v3892_v49 = vmax.f32 %v3884_v57, 0.0  ;;  %v3913_v62 = vand.u32 4294901760, %v3896_v10 }
 0x3c7   : > { %v3901_v32 = vmin.f32 %v3893_v37, 6.0  ;;  %v4406_v33 = vand.u32 4294901760, %v3897_v43  ;;  %v3851_v18 = vmul.f32 %v8099_v53, %v3835_v35  ;;  %v3810_v63 = vpop.permute.xlu1 %3809  ;;  %v4404_v4 = vand.u32 4294901760, %v3898_v27 }
 0x3c8   : > { %v3823_v21 = vsel %vm2212_vm8, %v3810_v63, %v8177_v14  ;;  %v3900_v28 = vmin.f32 %v3892_v49, 6.0  ;;  %v8315_v19 = vsub.f32 %v3896_v10, %v3913_v62 }
 0x3c9   : > { %v8319_v36 = vsub.f32 %v3897_v43, %v4406_v33  ;;  %v3859_v12 = vadd.f32 %v3851_v18, %v8261_v59  ;;  %v3839_v6 = vmul.f32 %v3823_v21, %v3782_v45  ;;  %v8322_v31 = vpack.c.bf16 %v4408_v13, %v4404_v4 }
 0x3ca   : > { %v4485_v52 = vsub.f32 %v3898_v27, %v4404_v4  ;;  %v3917_v24 = vand.u32 4294901760, %v3900_v28  ;;  %v4410_v53 = vand.u32 4294901760, %v3901_v32  ;;  %v3995_v58 = vand.u32 4294901760, %v8315_v19 }
 0x3cb   : > { %v3879_v0 = vadd.f32 %v3872_v47, %v3859_v12  ;;  %v3855_v14 = vmul.f32 %v8185_v48, %v3839_v6  ;;  %5042 = vmatprep.subr.bf16.mxu1 %v8322_v31  ;;  %v4492_v61 = vand.u32 4294901760, %v8319_v36  ;;  %v4500_v48 = vand.u32 4294901760, %v4499_v25  ;;  %v5456_v6 = vld [vmem:[%s5809_s26 + $0x10] sm:$0xff] }
 0x3cc   : > { %v8329_v41 = vpack.c.bf16 %v3917_v24, %v3913_v62  ;;  %v8331_v59 = vsub.f32 %v3900_v28, %v3917_v24  ;;  %v8333_v51 = vpack.c.bf16 %v4410_v53, %v4406_v33  ;;  %v4503_v39 = vsub.f32 %v3901_v32, %v4410_v53 }
 0x3cd   : > { %v3887_v23 = vmax.f32 %v3879_v0, 0.0  ;;  %v3863_v8 = vadd.f32 %v3855_v14, %v8187_v50  ;;  %v4486_v16 = vand.u32 4294901760, %v4485_v52  ;;  %v4493_v13 = vsub.f32 %v8319_v36, %v4492_v61  ;;  %v5458_v0 = vld [vmem:[%s5809_s26] sm:$0xff] }
 0x3ce   : > { %5018 = vmatprep.subr.bf16.mxu0 %v8329_v41  ;;  %5044 = vmatpush1.bf16.msra.mxu1 %v8333_v51  ;;  %v4504_v42 = vand.u32 4294901760, %v4503_v39  ;;  %v5049_v2 = vpack.c.bf16 %v8303_v9, %v4485_v52  ;;  %v5051_v47 = vpack.c.bf16 %v4503_v39, %v8319_v36  ;;  %v3996_v45 = vsub.f32 %v8315_v19, %v3995_v58 }
 0x3cf   : > { %v3895_v5 = vmin.f32 %v3887_v23, 6.0  ;;  %v3883_v30 = vadd.f32 %v8226_v22, %v3863_v8  ;;  %v4487_v40 = vsub.f32 %v4485_v52, %v4486_v16  ;;  %v4494_v50 = vand.u32 4294901760, %v4493_v13  ;;  %v5457_v52 = vld [vmem:[%s5809_s26 + $0x18] sm:$0xff] }
 0x3d0   : > { %v4505_v54 = vsub.f32 %v4503_v39, %v4504_v42  ;;  %v4007_v46 = vand.u32 4294901760, %v8331_v59  ;;  %v5057_v11 = vpack.c.bf16 %v4498_v17, %v4486_v16  ;;  %v5025_v9 = vpack.c.bf16 %v8331_v59, %v8315_v19 }
 0x3d1   : > { %v3891_v15 = vmax.f32 %v3883_v30, 0.0  ;;  %4478 = vmatmul.mubr.f32.vlgmr.msra.gmra.mrb[4].mxu1 %v8317_v60  ;;  %v4488_v29 = vand.u32 4294901760, %v4487_v40  ;;  %v3915_v57 = vand.u32 4294901760, %v3895_v5  ;;  %v5059_v34 = vpack.c.bf16 %v4504_v42, %v4492_v61  ;;  %v5459_v61 = vld [vmem:[%s5809_s26 + $0x8] sm:$0xff]  ;;  %s5630_s26 = smov [#allocation8]  }
 0x3d2   : > { %v4506_v3 = vand.u32 4294901760, %v4505_v54  ;;  %4568 = vmatprep.mubr.f32.mxu1 %v8876_v56  ;;  %v4008_v22 = vsub.f32 %v8331_v59, %v4007_v46  ;;  %v5033_v1 = vpack.c.bf16 %v4007_v46, %v3995_v58  ;;  %v3997_v37 = vand.u32 4294901760, %v3996_v45  ;;  %s5520_s19 = sshll.u32 %s5630_s26, 4  ;;  %s5521_s19 = int_to_ptr.vmem [resolvable:$false] %s5520_s19 }
 0x3d3   : > { %v3899_v44 = vmin.f32 %v3891_v15, 6.0  ;;  %v5045_v10 = vpack.c.bf16 %v4500_v48, %v4488_v29  ;;  %v4000_v55 = vsub.f32 %v3895_v5, %v3915_v57  ;;  %s5522_s29 = scalar_lea.vmem %s5521_s19, 1024  ;;  %p5523_p4 = scmp.lt.s32.totalorder %s8386_s10, %s5521_s19 }
 0x3d4   : > { %v5047_v26 = vpack.c.bf16 %v4506_v3, %v4494_v50  ;;  %v4009_v43 = vand.u32 4294901760, %v4008_v22  ;;  %p5524_p7 = scmp.lt.s32.totalorder %s5522_s29, %s5516_s9 }
 0x3d5   : > { %5046 = vmatprep.subr.bf16.mxu1 %v5045_v10  ;;  %v3919_v27 = vand.u32 4294901760, %v3899_v44  ;;  %v4001_v35 = vand.u32 4294901760, %v4000_v55 }
 0x3d6   : > { %5048 = vmatpush1.bf16.msra.mxu1 %v5047_v26  ;;  %v5021_v49 = vpack.c.bf16 %v4009_v43, %v3997_v37  ;;  %p5525_p8 = por %p5524_p7, %p5523_p4 }
 0x3d7   : > { %5050 = vmatprep.subr.bf16.mxu1 %v5049_v2  ;;  %v5019_v62 = vpack.c.bf16 %v3919_v27, %v3915_v57  ;;  %v4012_v17 = vsub.f32 %v3899_v44, %v3919_v27  ;;  %v4002_v32 = vsub.f32 %v4000_v55, %v4001_v35 }
 0x3d8   : > { %p5526_p11 = pnand %p5525_p8, %p5519_p3 }
 0x3d9   : > { %4570 = vmatmul.mubr.f32.vlgmr.msra.gmra.mrb[4].mxu1 %v8267_v7  ;;  %5020 = vmatpush1.bf16.msra.mxu0 %v5019_v62  ;;  %v4013_v33 = vand.u32 4294901760, %v4012_v17  ;;  %v5027_v18 = vpack.c.bf16 %v4012_v17, %v4000_v55  ;;  %v4003_v21 = vand.u32 4294901760, %v4002_v32 }
 0x3da   : > { %5052 = vmatpush1.bf16.msra.mxu1 %v5051_v47  ;;  %5022 = vmatprep.subr.bf16.mxu0 %v5021_v49 }
 0x3db   : > { %5054 = vmatprep.subr.bf16.mxu1 %v8322_v31  ;;  %4648 = vmatprep.mubr.f32.mxu1 %v8876_v56  ;;  %v4014_v63 = vsub.f32 %v4012_v17, %v4013_v33  ;;  %v5035_v4 = vpack.c.bf16 %v4013_v33, %v4001_v35 }
 0x3dc   : > { %3987 = vmatmul.mubr.f32.vlgmr.msra.gmra.mrb[4].mxu0 %v8317_v60 }
 0x3dd   : > { %v4015_v28 = vand.u32 4294901760, %v4014_v63  ;;  %4077 = vmatprep.mubr.f32.mxu0 %v8876_v56 }
 0x3df   : > { %v5023_v19 = vpack.c.bf16 %v4015_v28, %v4003_v21 }
 0x3e1   : > { %4651 = vmatmul.mubr.f32.vlgmr.msra.gmra.mrb[4].mxu1 %v8283_v38  ;;  %5024 = vmatpush1.bf16.msra.mxu0 %v5023_v19 }
 0x3e2   : > { %5056 = vmatpush1.bf16.msra.mxu1 %v8333_v51  ;;  %5026 = vmatprep.subr.bf16.mxu0 %v5025_v9 }
 0x3e3   : > { %5058 = vmatprep.subr.bf16.mxu1 %v5057_v11  ;;  %4725 = vmatprep.mubr.f32.mxu1 %v8876_v56 }
 0x3e4   : > { %4079 = vmatmul.mubr.f32.vlgmr.msra.gmra.mrb[4].mxu0 %v8267_v7 }
 0x3e5   : > { %5028 = vmatpush1.bf16.msra.mxu0 %v5027_v18  ;;  %4157 = vmatprep.mubr.f32.mxu0 %v8876_v56 }
 0x3e6   : > { %5030 = vmatprep.subr.bf16.mxu0 %v8329_v41 }
 0x3e9   : > { %4729 = vmatmul.mubr.f32.vlgmr.msra.gmra.mrb[4].mxu1 %v8300_v20 }
 0x3ea   : > { %5060 = vmatpush1.bf16.msra.mxu1 %v5059_v34  ;;  %4811 = vmatprep.mubr.f32.mxu1 %v8876_v56 }
 0x3eb   : > { %5062 = vmatprep.subr.bf16.mxu1 %v8322_v31 }
 0x3ec   : > { %4160 = vmatmul.mubr.f32.vlgmr.msra.gmra.mrb[4].mxu0 %v8283_v38  ;;  %v3908_v38 = vpop.permute.xlu0 %3907 }
 0x3ed   : > { %5032 = vmatpush1.bf16.msra.mxu0 %v5019_v62  ;;  %4234 = vmatprep.mubr.f32.mxu0 %v8876_v56 }
 0x3ee   : > { %5034 = vmatprep.subr.bf16.mxu0 %v5033_v1 }
 0x3f1   : > { %4813 = vmatmul.mubr.f32.vlgmr.msra.gmra.mrb[4].mxu1 %v8267_v7 }
 0x3f2   : > { %5064 = vmatpush1.bf16.msra.mxu1 %v8333_v51  ;;  %4887 = vmatprep.mubr.f32.mxu1 %v8876_v56 }
 0x3f4   : > { %4238 = vmatmul.mubr.f32.vlgmr.msra.gmra.mrb[4].mxu0 %v8300_v20 }
 0x3f5   : > { %5036 = vmatpush1.bf16.msra.mxu0 %v5035_v4  ;;  %4320 = vmatprep.mubr.f32.mxu0 %v8876_v56 }
 0x3f6   : > { %5038 = vmatprep.subr.bf16.mxu0 %v8329_v41 }
 0x3f9   : > { %4889 = vmatmul.mubr.f32.vlgmr.msra.gmra.mrb[4].mxu1 %v8267_v7 }
 0x3fc   : > { %4322 = vmatmul.mubr.f32.vlgmr.msra.gmra.mrb[4].mxu0 %v8267_v7 }
 0x3fd   : > { %5040 = vmatpush1.bf16.msra.mxu0 %v5019_v62  ;;  %4396 = vmatprep.mubr.f32.mxu0 %v8876_v56 }
 0x404   : > { %4398 = vmatmul.mubr.f32.vlgmr.msra.gmra.mrb[4].mxu0 %v8267_v7 }
 0x4cc   : > { %v4890_v20 = vpop.f32.mrb[4].mxu1 }
 0x4cd   : > { %v5075_v60 = vadd.f32 %v4890_v20, %v3908_v38  ;;  %v4892_v36 = vpop.f32.mrb[5].mxu1 }
 0x4ce   : > { %v5076_v12 = vadd.f32 %v4892_v36, %v3908_v38 }
 0x4cf   : > { %v4897_v31 = vadd.f32 %v5456_v6, %v5075_v60 }
 0x4d0   : > { %v4898_v24 = vadd.f32 %v5457_v52, %v5076_v12 }
 0x4d1   : > { %4901 = vst [vmem:[%s328_s24 + $0x10] sm:$0xff] %v4897_v31 }
 0x4d2   : > { %4902 = vst [vmem:[%s328_s24 + $0x18] sm:$0xff] %v4898_v24 }
 0x4d7   : > { %v4399_v56 = vpop.f32.mrb[4].mxu0 }
 0x4d8   : > { %v5073_v53 = vadd.f32 %v4399_v56, %v3908_v38  ;;  %v4401_v7 = vpop.f32.mrb[5].mxu0 }
 0x4d9   : > { %v5074_v25 = vadd.f32 %v4401_v7, %v3908_v38 }
 0x4da   : > { %v4895_v14 = vadd.f32 %v5458_v0, %v5073_v53 }
 0x4db   : > { %v4896_v58 = vadd.f32 %v5459_v61, %v5074_v25 }
 0x4dc   : > { %4899 = vst [vmem:[%s328_s24] sm:$0xff] %v4895_v14 }
 0x4dd   : > { %4900 = vst [vmem:[%s328_s24 + $0x8] sm:$0xff] %v4896_v58 }
 0x4de   : > { %5529 = shalt.err (!%p5526_p11)
}
 0x4df   : > { %s5530_s14 = scalar_lea.hbm %s8384_s13, 512  ;;  %s5534_s17 = scalar_lea.hbm %s8434_s8, 1024 }
 0x4e0   : > { %p5531_p13 = scmp.ne.s32.totalorder %s8384_s13, %s5530_s14  ;;  %p5535_p6 = scmp.lt.u32.totalorder %s8384_s13, %s8434_s8 }
 0x4e1   : > { %p5536_p9 = scmp.lt.u32.totalorder %s5534_s17, %s5530_s14  ;;  %p5538_p12 = scmp.lt.u32.totalorder %s5530_s14, %s8384_s13 }
 0x4e2   : > { %p5532_p0 = pnand %p5531_p13, %p9149_p1 }
 0x4e3   : > { %p5537_p10 = por %p5536_p9, %p5535_p6 }
 0x4e4   : > { %p5533_p5 = pneg %p5532_p0 }
 0x4e5   : > { %p5539_p2 = por %p5538_p12, %p5537_p10 }
 0x4e7   : > { %p5540_p3 = pnand %p5539_p2, %p5533_p5 }
 0x4e9   : > { %5543 = shalt.err (!%p5540_p3)
}
 0x4ea   : > { %5145 = dma.vmem_to_hbm [thread:$0]  (%p9149_p1), %s8386_s10, 512, %s8384_s13, %s4904_s18  }
 0x4eb PF: > { %p5162_p4 = scmp.ge.s32.totalorder %s5586_s30, 2  ;;  %s4930_s25 = sand.u32 1, %s5574_s27  }
 0x4ec   : > { %p9150_p7 = scmp.ne.s32.totalorder %s8652_s16, 0  ;;  %s4931_s12 = scalar_lea.sflag [#allocation5], %s4930_s25 }
 0x4ee   : > { %p5155_p8 = pnand %p5162_p4, %p9150_p7 }
 0x4f0   : > { %5569 = dma.done.wait (!%p5155_p8), %s4931_s12, 512  }
 0x4f1   : > { %5571 = vsyncadd (!%p5155_p8), %s4931_s12, 4294966784  ;;  %s9151_s20 = sld [smem:[#allocation12_spill]]  ;;  %s9152_s29 = sld [smem:[#allocation13_spill]] }
 0x4f2   : > { %p20_p11 = scmp.ge.s32.totalorder %s5701_s11, 4   ;;  %s9153_s27 = smov %s5578_s28 }
 0x4f3   : > { %s9155_s30 = smov %s5701_s11 }
 0x4f4   :  { %22 = sbr.rel (!%p20_p11) target bundleno = 5 (0x5), region = 122 }
 0x4f7   : > { %s9154_s28 = smov %s9151_s20 }
 0x4fb   :  { %4936 = vsyncpa [#allocation4], 1 }
 0x4fc   :  { %4938 = vsyncpa [#allocation4 + $0x1], 1 }
 0x4fd   :  { %4939 = vsyncpa [#allocation7], 1 }
 0x4fe   :  { %4940 = vsyncpa [#allocation5], 1 }
 0x4ff   :  { %4942 = vsyncpa [#allocation5 + $0x1], 1 }

</bundles_post_ra>
